<compile_context>
chip_gen: v7x
topology: tpu7x:2x2x1
jax: 0.10.0
libtpu: 0.0.40
codegen_flags: <defaults>
</compile_context>

<pallas_src>
import functools

import numpy as np
import jax
import jax.numpy as jnp
from jax.experimental import pallas as pl
from jax.experimental.pallas import tpu as pltpu

F32 = jnp.float32

CP = pltpu.CompilerParams(dimension_semantics=("parallel",))


# ----------------------------- BlockSpec helpers -----------------------------

def _const_spec(shape):
    """Whole-array block, identical at every grid step (weights / biases)."""
    zeros = (0,) * len(shape)
    return pl.BlockSpec(shape, lambda n, _z=zeros: _z)


def _batch_spec(shape):
    """Per-batch-item block: leading dim 1, indexed by the grid position."""
    zeros = (0,) * (len(shape) - 1)
    return pl.BlockSpec(shape, lambda n, _z=zeros: (n,) + _z)


# ------------------------- in-kernel lane-dense helpers -------------------------

def _shift_w(a, dw, c):
    """Shift a lane-dense (R, W*c) array by dw W-positions with zero fill:
    out[r, w*c + ch] = a[r, (w+dw)*c + ch] if 0 <= w+dw < W else 0."""
    if dw == 0:
        return a
    rows = a.shape[0]
    z = jnp.zeros((rows, abs(dw) * c), a.dtype)
    if dw > 0:
        return jnp.concatenate([a[:, dw * c:], z], axis=1)
    return jnp.concatenate([z, a[:, :dw * c]], axis=1)


def _dw3x3_relu(row_taps, wdw, bdw, c):
    """3x3 depthwise conv + bias + relu in lane-dense space.
    row_taps: [rows h-1, h, h+1] each (R, W*c) (zero rows at the borders);
    wdw: (9, W*c) per-tap per-lane weights; bdw: (1, W*c)."""
    acc = None
    for ki in range(3):
        r = row_taps[ki]
        for kj in range(3):
            term = _shift_w(r, kj - 1, c) * wdw[ki * 3 + kj]
            acc = term if acc is None else acc + term
    return jnp.maximum(acc + bdw[0], 0.0)


# ------------------------------- Pallas kernels -------------------------------

def _crw_kernel(x0_ref, x1_ref, w1a_ref, w1b_ref, b1_ref,
                w2a_ref, w2b_ref, b2a_ref, b2b_ref, rh_ref, g0_ref, g1_ref):
    """CrossResolutionWeightModule, fully fused.  Channel-right-half selection,
    2x2 adaptive avg-pool of branch 0, the implicit channel concat, the two 1x1
    convs, the channel split and the nearest upsample back to branch-0
    resolution are all folded into packed weight matrices (MXU matmuls)."""
    x0 = x0_ref[0].astype(F32)                       # (H1, 2*W0*Cf0) row-pair merged
    x1 = x1_ref[0].astype(F32)                       # (H1, W1*Cf1)
    half = x0.shape[1] // 2
    a0 = 0.25 * (x0[:, :half] + x0[:, half:])        # H-pooled feats[0], (H1, W0*Cf0)
    hact = jnp.maximum(
        jnp.dot(a0, w1a_ref[...], preferred_element_type=F32)
        + jnp.dot(x1, w1b_ref[...], preferred_element_type=F32)
        + b1_ref[...], 0.0)                          # (H1, W1*hid)
    g0s = jax.nn.sigmoid(
        jnp.dot(hact, w2a_ref[...], preferred_element_type=F32) + b2a_ref[...])
    g0 = jnp.dot(rh_ref[...], g0s, preferred_element_type=F32)   # nearest H-up
    g1 = jax.nn.sigmoid(
        jnp.dot(hact, w2b_ref[...], preferred_element_type=F32) + b2b_ref[...])
    g0_ref[0] = g0.astype(g0_ref.dtype)
    g1_ref[0] = g1.astype(g1_ref.dtype)


def _ccw_kernel(inv_hw, cf, x_ref, g_ref, wdw_ref, bdw_ref,
                w1_ref, b1_ref, w2_ref, b2_ref, plm_ref, prm_ref, o_ref):
    """Fused CCWBlock (per batch item), everything lane-dense:
    right-half gate multiply -> 3x3 DW conv + bias + relu -> global-avg-pool SE
    (fc1/relu, fc2/sigmoid) -> channel-gate multiply; then the identity left
    branch, channel concat and channel_shuffle are applied as two 0/1
    lane-permutation matmuls (MXU)."""
    x = x_ref[0].astype(F32)                         # (H, W*Cf) full-channel width
    g = g_ref[0].astype(F32)                         # gate; left-channel lanes unused
    xg = x * g
    zrow = jnp.zeros((1, xg.shape[1]), F32)
    prev = jnp.concatenate([zrow, xg[:-1]], axis=0)
    nxt = jnp.concatenate([xg[1:], zrow], axis=0)
    y = _dw3x3_relu([prev, xg, nxt], wdw_ref[...], bdw_ref[...], cf)   # (H, W*Cf)

    # SE: DW weights/biases are zero on left-channel lanes, so y is exactly 0
    # there and the fc1 contraction (w1t zero on left lanes) stays correct.
    s = jnp.sum(y, axis=0, keepdims=True)                              # (1, L)
    t = s * w1_ref[...]                                                # (hid, L)
    z = jnp.sum(t, axis=1, keepdims=True) * inv_hw + b1_ref[...]       # (hid, 1)
    h = jnp.maximum(z, 0.0)
    gate = jax.nn.sigmoid(
        jnp.sum(h * w2_ref[...], axis=0, keepdims=True) + b2_ref[...])  # (1, L)
    yse = y * gate

    out = (jnp.dot(x, plm_ref[...], preferred_element_type=F32)
           + jnp.dot(yse, prm_ref[...], preferred_element_type=F32))
    o_ref[0] = out.astype(o_ref.dtype)


def _dsconv_kernel(has_res, cin, *refs):
    """Fused DSConvBNAct (stride 2): 3x3 DW conv (pad 1, stride 2) + bias + relu
    then 1x1 PW conv + bias + relu (+ optional fused residual add).
    Stride-2 rows come from the free (Ho, 2*W*Cin) row-pair layout of the input;
    the stride-2 column subsample is folded into the PW lane-block matrix."""
    if has_res:
        x_ref, wdw_ref, bdw_ref, wpw_ref, bpw_ref, res_ref, o_ref = refs
    else:
        x_ref, wdw_ref, bdw_ref, wpw_ref, bpw_ref, o_ref = refs
        res_ref = None
    xr = x_ref[0].astype(F32)                        # (Ho, 2*W*Cin)
    half = xr.shape[1] // 2
    even, odd = xr[:, :half], xr[:, half:]           # rows 2h / 2h+1
    zrow = jnp.zeros((1, half), F32)
    prev = jnp.concatenate([zrow, odd[:-1]], axis=0)  # rows 2h-1 (zero at h=0)
    y = _dw3x3_relu([prev, even, odd], wdw_ref[...], bdw_ref[...], cin)  # (Ho, W*Cin)
    out = jnp.maximum(
        jnp.dot(y, wpw_ref[...], preferred_element_type=F32) + bpw_ref[...], 0.0)
    if has_res:
        out = out + res_ref[0].astype(F32)
    o_ref[0] = out.astype(o_ref.dtype)


def _up_fuse_kernel(x_ref, wpw_ref, bpw_ref, uw_ref, uh_ref, res_ref, o_ref):
    """Fusion x1 path, fused: 1x1 conv + relu (MXU lane-block matmul), 2x
    bilinear upsample (align_corners=True) as two interpolation matmuls, and
    the residual add with feats[0]."""
    x = x_ref[0].astype(F32)                                            # (H1, W1*C1)
    z = jnp.maximum(
        jnp.dot(x, wpw_ref[...], preferred_element_type=F32) + bpw_ref[...], 0.0)
    zw = jnp.dot(z, uw_ref[...], preferred_element_type=F32)            # W-upsample
    out = jnp.dot(uh_ref[...], zw, preferred_element_type=F32)          # H-upsample
    o_ref[0] = (out + res_ref[0].astype(F32)).astype(o_ref.dtype)


# ------------------------------- kernel wrappers -------------------------------

def crw_forward(p, feats):
    f0, f1 = feats                         # lane-dense (N, H0, W0*Cf0), (N, H1, W1*Cf1)
    N, H0, L0 = f0.shape
    _, H1, L1 = f1.shape
    x0 = f0.reshape(N, H0 // 2, 2 * L0)    # free row-pair merge
    g0, g1 = pl.pallas_call(
        _crw_kernel,
        out_shape=(jax.ShapeDtypeStruct((N, H0, L0), f0.dtype),
                   jax.ShapeDtypeStruct((N, H1, L1), f1.dtype)),
        grid=(N,),
        in_specs=[_batch_spec((1, H0 // 2, 2 * L0)),
                  _batch_spec((1, H1, L1)),
                  _const_spec(p["w1a"].shape), _const_spec(p["w1b"].shape),
                  _const_spec(p["b1t"].shape),
                  _const_spec(p["w2a"].shape), _const_spec(p["w2b"].shape),
                  _const_spec(p["b2a"].shape), _const_spec(p["b2b"].shape),
                  _const_spec(p["rh"].shape)],
        out_specs=(_batch_spec((1, H0, L0)), _batch_spec((1, H1, L1))),
        compiler_params=CP,
    )(x0, f1, p["w1a"], p["w1b"], p["b1t"], p["w2a"], p["w2b"],
      p["b2a"], p["b2b"], p["rh"])
    return [g0, g1]


def ccw_forward(p, x, gate):
    N, H, L = x.shape
    hid = p["w1t"].shape[0]
    kern = functools.partial(_ccw_kernel, p["inv_hw"], p["cf"])
    return pl.pallas_call(
        kern,
        out_shape=jax.ShapeDtypeStruct((N, H, L), x.dtype),
        grid=(N,),
        in_specs=[_batch_spec((1, H, L)), _batch_spec((1, H, L)),
                  _const_spec((9, L)), _const_spec((1, L)),
                  _const_spec((hid, L)), _const_spec((hid, 1)),
                  _const_spec((hid, L)), _const_spec((1, L)),
                  _const_spec((L, L)), _const_spec((L, L))],
        out_specs=_batch_spec((1, H, L)),
        compiler_params=CP,
    )(x, gate, p["wdw"], p["bdw"], p["w1t"], p["b1"], p["w2t"], p["b2t"],
      p["p_left"], p["p_right"])


def dsconv_forward(p, x, residual=None):
    N, H, L = x.shape                      # lane-dense (N, H, W*Cin)
    Ho = H // 2
    Lo = p["bpw"].shape[1]                 # Wo*Cout
    xm = x.reshape(N, Ho, 2 * L)           # free row-pair merge
    has_res = residual is not None
    kern = functools.partial(_dsconv_kernel, has_res, p["cin"])
    args = [xm, p["wdw"], p["bdw"], p["wpw"], p["bpw"]]
    in_specs = [_batch_spec((1, Ho, 2 * L)),
                _const_spec((9, L)), _const_spec((1, L)),
                _const_spec(p["wpw"].shape), _const_spec((1, Lo))]
    if has_res:
        args.append(residual)
        in_specs.append(_batch_spec((1, Ho, Lo)))
    return pl.pallas_call(
        kern,
        out_shape=jax.ShapeDtypeStruct((N, Ho, Lo), x.dtype),
        grid=(N,),
        in_specs=in_specs,
        out_specs=_batch_spec((1, Ho, Lo)),
        compiler_params=CP,
    )(*args)


def up_fuse_forward(p, x1feat, res0):
    N, H1, L1 = x1feat.shape
    _, H0, L0 = res0.shape
    Lmid = p["bpw"].shape[1]
    return pl.pallas_call(
        _up_fuse_kernel,
        out_shape=jax.ShapeDtypeStruct((N, H0, L0), res0.dtype),
        grid=(N,),
        in_specs=[_batch_spec((1, H1, L1)),
                  _const_spec(p["wpw"].shape), _const_spec((1, Lmid)),
                  _const_spec(p["uw"].shape), _const_spec(p["uh"].shape),
                  _batch_spec((1, H0, L0))],
        out_specs=_batch_spec((1, H0, L0)),
        compiler_params=CP,
    )(x1feat, p["wpw"], p["bpw"], p["uw"], p["uh"], res0)


# --------------------------------- module forwards ---------------------------------

def downsample_forward(layers, x, residual=None):
    for i, layer in enumerate(layers):
        x = dsconv_forward(layer, x, residual if i == len(layers) - 1 else None)
    return x


def fusion_forward(p, feats):
    x1 = up_fuse_forward(p["s2_up"], feats[1], feats[0])
    x2 = downsample_forward(p["s1_down1"], feats[0], residual=feats[1])
    res = [x1, x2]
    if p["extra"]:
        r = downsample_forward(p["s2_down1"], feats[1])
        x3 = downsample_forward(p["s1_down2"], feats[0], residual=r)
        res.append(x3)
    return res


def stage_block_forward(params, feats):
    feats = list(feats)
    for mod in params:
        cr_w = crw_forward(mod["crw"], feats)
        for j, blocks in enumerate(mod["ccw"]):
            for bp in blocks:
                feats[j] = ccw_forward(bp, feats[j], cr_w[j])
        feats = fusion_forward(mod["fusion"], feats)
    return feats


# ------------------------------- parameter packing -------------------------------
# Synthetic weights are generated in conventional per-channel form and packed
# into lane-dense / lane-block kernel format once at init (no runtime repack).

def _rand(rng, shape, scale):
    return (scale * rng.standard_normal(shape)).astype(np.float32)


def init_crw(rng, chs, hw0, hw1, red=8):
    cf0, cf1 = chs
    cr0, cr1 = cf0 // 2, cf1 // 2
    ctot = cr0 + cr1
    hid = max(ctot // red, 1)
    H0, W0 = hw0
    H1, W1 = hw1
    assert H0 == 2 * H1 and W0 == 2 * W1          # 2x pool factor baked into packing
    w1 = _rand(rng, (hid, ctot), 1.0 / np.sqrt(ctot))
    b1 = _rand(rng, (hid,), 0.05)
    w2 = _rand(rng, (ctot, hid), 1.0 / np.sqrt(hid))
    b2 = _rand(rng, (ctot,), 0.05)

    # conv1: branch-0 path folds channel-right-half selection + 2x W-avg-pool.
    w1a = np.zeros((W0 * cf0, W1 * hid), np.float32)
    for w in range(W0):
        pw = w // 2
        for c in range(cr0):
            w1a[w * cf0 + cr0 + c, pw * hid:(pw + 1) * hid] = w1[:, c]
    w1b = np.zeros((W1 * cf1, W1 * hid), np.float32)
    for w in range(W1):
        for c in range(cr1):
            w1b[w * cf1 + cr1 + c, w * hid:(w + 1) * hid] = w1[:, cr0 + c]
    b1t = np.tile(b1, W1)[None]

    # conv2 -> branch-0 gate: nearest W-upsample + placement into the right-half
    # channel lanes of feats[0]'s full-width layout.
    w2a = np.zeros((W1 * hid, W0 * cf0), np.float32)
    b2a = np.zeros((1, W0 * cf0), np.float32)
    for w in range(W0):
        pw = w // 2
        for c in range(cr0):
            w2a[pw * hid:(pw + 1) * hid, w * cf0 + cr0 + c] = w2[c, :]
            b2a[0, w * cf0 + cr0 + c] = b2[c]
    # conv2 -> branch-1 gate (same resolution).
    w2b = np.zeros((W1 * hid, W1 * cf1), np.float32)
    b2b = np.zeros((1, W1 * cf1), np.float32)
    for w in range(W1):
        for c in range(cr1):
            w2b[w * hid:(w + 1) * hid, w * cf1 + cr1 + c] = w2[cr0 + c, :]
            b2b[0, w * cf1 + cr1 + c] = b2[cr0 + c]

    rh = np.zeros((H0, H1), np.float32)            # nearest H-upsample (row dup)
    rh[np.arange(H0), np.arange(H0) // 2] = 1.0

    packed = dict(w1a=w1a, w1b=w1b, b1t=b1t, w2a=w2a, w2b=w2b,
                  b2a=b2a, b2b=b2b, rh=rh)
    return {k: jnp.asarray(v) for k, v in packed.items()}


def init_ccw(rng, cf, hw, red=8):
    H, W = hw
    cl = cf // 2
    cr = cf - cl
    hid = max(cr // red, 1)
    dw_w = _rand(rng, (cr, 3, 3), 1.0 / 3.0)
    dw_b = _rand(rng, (cr,), 0.05)
    w1 = _rand(rng, (hid, cr), 1.0 / np.sqrt(cr))
    b1 = _rand(rng, (hid,), 0.05)
    w2 = _rand(rng, (cr, hid), 1.0 / np.sqrt(hid))
    b2 = _rand(rng, (cr,), 0.05)

    L = W * cf
    wdw = np.zeros((9, L), np.float32)
    bdw = np.zeros((1, L), np.float32)
    w1t = np.zeros((hid, L), np.float32)
    w2t = np.zeros((hid, L), np.float32)
    b2t = np.zeros((1, L), np.float32)
    for w in range(W):
        for c in range(cr):
            lane = w * cf + cl + c
            wdw[:, lane] = dw_w[c].reshape(9)
            bdw[0, lane] = dw_b[c]
            w1t[:, lane] = w1[:, c]
            w2t[:, lane] = w2[c, :]
            b2t[0, lane] = b2[c]
    # identity left branch + concat + channel_shuffle(groups=2) as 0/1 matmuls.
    # TODO(synk): left branch is Identity only for stride=1, in_l==out_l (true here).
    p_left = np.zeros((L, L), np.float32)
    p_right = np.zeros((L, L), np.float32)
    for w in range(W):
        for c in range(cl):
            p_left[w * cf + c, w * cf + 2 * c] = 1.0
        for c in range(cr):
            p_right[w * cf + cl + c, w * cf + 2 * c + 1] = 1.0
    return {"cf": cf, "inv_hw": 1.0 / float(H * W),
            "wdw": jnp.asarray(wdw), "bdw": jnp.asarray(bdw),
            "w1t": jnp.asarray(w1t), "b1": jnp.asarray(b1[:, None]),
            "w2t": jnp.asarray(w2t), "b2t": jnp.asarray(b2t),
            "p_left": jnp.asarray(p_left), "p_right": jnp.asarray(p_right)}


def init_dsconv(rng, cin, cout, hw):
    H, W = hw
    Wo = W // 2
    dw_w = _rand(rng, (cin, 3, 3), 1.0 / 3.0)
    dw_b = _rand(rng, (cin,), 0.05)
    pw_w = _rand(rng, (cin, cout), 1.0 / np.sqrt(cin))
    pw_b = _rand(rng, (cout,), 0.05)

    L = W * cin
    wdw = np.zeros((9, L), np.float32)
    for w in range(W):
        for c in range(cin):
            wdw[:, w * cin + c] = dw_w[c].reshape(9)
    bdw = np.tile(dw_b, W)[None]
    # 1x1 PW conv as a lane-block matrix; stride-2 column subsample folded in.
    wpw = np.zeros((L, Wo * cout), np.float32)
    for wo in range(Wo):
        wpw[(2 * wo) * cin:(2 * wo + 1) * cin, wo * cout:(wo + 1) * cout] = pw_w
    bpw = np.tile(pw_b, Wo)[None]
    return {"cin": cin, "wdw": jnp.asarray(wdw), "bdw": jnp.asarray(bdw),
            "wpw": jnp.asarray(wpw), "bpw": jnp.asarray(bpw)}


def _bilinear_matrix(n_in, n_out):
    a = np.zeros((n_out, n_in), np.float32)
    if n_in == 1 or n_out == 1:
        a[:, 0] = 1.0
        return a
    for i in range(n_out):
        src = i * (n_in - 1) / (n_out - 1)
        i0 = min(int(np.floor(src)), n_in - 2)
        t = src - i0
        a[i, i0] += 1.0 - t
        a[i, i0 + 1] += t
    return a


def init_up(rng, cin, cout, hw_in, hw_out):
    H1, W1 = hw_in
    H0, W0 = hw_out
    pw_w = _rand(rng, (cin, cout), 1.0 / np.sqrt(cin))
    pw_b = _rand(rng, (cout,), 0.05)
    wpw = np.zeros((W1 * cin, W1 * cout), np.float32)
    for w in range(W1):
        wpw[w * cin:(w + 1) * cin, w * cout:(w + 1) * cout] = pw_w
    bpw = np.tile(pw_b, W1)[None]
    aw = _bilinear_matrix(W1, W0)                       # align_corners=True
    uw = np.zeros((W1 * cout, W0 * cout), np.float32)
    for w2 in range(W0):
        for w in range(W1):
            if aw[w2, w] != 0.0:
                for c in range(cout):
                    uw[w * cout + c, w2 * cout + c] = aw[w2, w]
    uh = _bilinear_matrix(H1, H0)
    return {"wpw": jnp.asarray(wpw), "bpw": jnp.asarray(bpw),
            "uw": jnp.asarray(uw), "uh": jnp.asarray(uh)}


def init_fusion(rng, base_ch, hw, extra_output):
    chs = [base_ch, 2 * base_ch, 4 * base_ch]
    p = {"extra": extra_output,
         "s2_up": init_up(rng, chs[1], chs[0], hw[1], hw[0]),
         "s1_down1": [init_dsconv(rng, chs[0], chs[1], hw[0])]}
    if extra_output:
        hw0b = (hw[0][0] // 2, hw[0][1] // 2)
        p["s1_down2"] = [init_dsconv(rng, chs[0], chs[0], hw[0]),
                         init_dsconv(rng, chs[0], chs[2], hw0b)]
        p["s2_down1"] = [init_dsconv(rng, chs[1], chs[2], hw[1])]
    return p


def init_stage_block(rng, base_ch, stage, repeat, num_modules, hw0):
    assert stage == 2  # TODO(synk): only the stage=2 topology is wired up here
    chs = [2 ** i * base_ch for i in range(stage)]
    hw = [(hw0[0] // (2 ** i), hw0[1] // (2 ** i)) for i in range(stage)]
    modules = []
    for i in range(num_modules):
        crw = init_crw(rng, chs, hw[0], hw[1])
        ccw = []
        for j in range(stage):
            ccw.append([init_ccw(rng, chs[j], hw[j]) for _ in range(repeat)])
        extra = (i == num_modules - 1) and stage != 4
        fusion = init_fusion(rng, base_ch, hw, extra)
        modules.append({"crw": crw, "ccw": ccw, "fusion": fusion})
    return modules


# --------------------------------------- main ---------------------------------------

if __name__ == "__main__":
    base_ch, stage, repeat, num_modules = 16, 2, 1, 1
    H0 = W0 = 16
    key = jax.random.PRNGKey(0)
    kx0, kx1 = jax.random.split(key)

    # PyTorch-convention NCHW inputs: feats[0]=(N, C, H, W), feats[1] at half res.
    x0_nchw = jax.random.normal(kx0, (2, base_ch, H0, W0), jnp.float32)
    x1_nchw = jax.random.normal(kx1, (2, 2 * base_ch, H0 // 2, W0 // 2), jnp.float32)

    params = init_stage_block(np.random.default_rng(0), base_ch, stage, repeat,
                              num_modules, (H0, W0))

    @jax.jit
    def run(a_nchw, b_nchw):
        feats = []
        for t in (a_nchw, b_nchw):
            n, c, h, w = t.shape
            # NCHW -> NHWC -> lane-dense (N, H, W*C); intermediates stay lane-dense.
            feats.append(jnp.transpose(t, (0, 2, 3, 1)).reshape(n, h, w * c))
        outs = stage_block_forward(params, feats)
        res = []
        for i, o in enumerate(outs):
            c = base_ch * (2 ** i)
            h, w = H0 // (2 ** i), W0 // (2 ** i)
            res.append(jnp.transpose(o.reshape(o.shape[0], h, w, c), (0, 3, 1, 2)))
        return res

    outs = jax.block_until_ready(run(x0_nchw, x1_nchw))

    # stage=2, num_modules=1 -> extra_output=True -> three output resolutions (NCHW)
    assert outs[0].shape == (2, base_ch, H0, W0)
    assert outs[1].shape == (2, 2 * base_ch, H0 // 2, W0 // 2)
    assert outs[2].shape == (2, 4 * base_ch, H0 // 4, W0 // 4)
    assert all(bool(jnp.all(jnp.isfinite(o))) for o in outs)
    print("KERNEL_OK")
</pallas_src>

<mosaic_0001>
module attributes {stable_mosaic.version = 11 : i64} {
  func.func @_crw_kernel(%arg0: i32, %arg1: memref<1x8x512xf32, #tpu.memory_space<vmem>>, %arg2: memref<1x8x256xf32, #tpu.memory_space<vmem>>, %arg3: memref<256x24xf32, #tpu.memory_space<vmem>>, %arg4: memref<256x24xf32, #tpu.memory_space<vmem>>, %arg5: memref<1x24xf32, #tpu.memory_space<vmem>>, %arg6: memref<24x256xf32, #tpu.memory_space<vmem>>, %arg7: memref<24x256xf32, #tpu.memory_space<vmem>>, %arg8: memref<1x256xf32, #tpu.memory_space<vmem>>, %arg9: memref<1x256xf32, #tpu.memory_space<vmem>>, %arg10: memref<16x8xf32, #tpu.memory_space<vmem>>, %arg11: memref<1x16x256xf32, #tpu.memory_space<vmem>>, %arg12: memref<1x8x256xf32, #tpu.memory_space<vmem>>) attributes {dimension_semantics = [#tpu.dimension_semantics<parallel>], iteration_bounds = array<i64: 2>, scalar_prefetch = 0 : i64, scratch_operands = 0 : i64, tpu.core_type = #tpu.core_type<tc>, window_params = [{transform_indices = @transform_0, window_bounds = array<i64: 1, 8, 512>}, {transform_indices = @transform_1, window_bounds = array<i64: 1, 8, 256>}, {pipeline_mode = #tpu.pipeline_mode<synchronous>, transform_indices = @transform_2, window_bounds = array<i64: 256, 24>}, {pipeline_mode = #tpu.pipeline_mode<synchronous>, transform_indices = @transform_3, window_bounds = array<i64: 256, 24>}, {pipeline_mode = #tpu.pipeline_mode<synchronous>, transform_indices = @transform_4, window_bounds = array<i64: 1, 24>}, {pipeline_mode = #tpu.pipeline_mode<synchronous>, transform_indices = @transform_5, window_bounds = array<i64: 24, 256>}, {pipeline_mode = #tpu.pipeline_mode<synchronous>, transform_indices = @transform_6, window_bounds = array<i64: 24, 256>}, {pipeline_mode = #tpu.pipeline_mode<synchronous>, transform_indices = @transform_7, window_bounds = array<i64: 1, 256>}, {pipeline_mode = #tpu.pipeline_mode<synchronous>, transform_indices = @transform_8, window_bounds = array<i64: 1, 256>}, {pipeline_mode = #tpu.pipeline_mode<synchronous>, transform_indices = @transform_9, window_bounds = array<i64: 16, 8>}, {transform_indices = @transform_10, window_bounds = array<i64: 1, 16, 256>}, {transform_indices = @transform_11, window_bounds = array<i64: 1, 8, 256>}]} {
    %c0 = arith.constant 0 : index
    %c0_0 = arith.constant 0 : index
    %c0_1 = arith.constant 0 : index
    %0 = vector.load %arg1[%c0, %c0_0, %c0_1] : memref<1x8x512xf32, #tpu.memory_space<vmem>>, vector<1x8x512xf32>
    %1 = vector.shape_cast %0 : vector<1x8x512xf32> to vector<8x512xf32>
    %c0_2 = arith.constant 0 : index
    %c0_3 = arith.constant 0 : index
    %c0_4 = arith.constant 0 : index
    %2 = vector.load %arg2[%c0_2, %c0_3, %c0_4] : memref<1x8x256xf32, #tpu.memory_space<vmem>>, vector<1x8x256xf32>
    %3 = vector.shape_cast %2 : vector<1x8x256xf32> to vector<8x256xf32>
    %4 = vector.extract_strided_slice %1 {offsets = [0, 0], sizes = [8, 256], strides = [1, 1]} : vector<8x512xf32> to vector<8x256xf32>
    %5 = vector.extract_strided_slice %1 {offsets = [0, 256], sizes = [8, 256], strides = [1, 1]} : vector<8x512xf32> to vector<8x256xf32>
    %6 = arith.addf %4, %5 : vector<8x256xf32>
    %cst = arith.constant 2.500000e-01 : f32
    %7 = vector.broadcast %cst : f32 to vector<8x256xf32>
    %8 = arith.mulf %7, %6 : vector<8x256xf32>
    %c0_5 = arith.constant 0 : index
    %c0_6 = arith.constant 0 : index
    %9 = vector.load %arg3[%c0_5, %c0_6] : memref<256x24xf32, #tpu.memory_space<vmem>>, vector<256x24xf32>
    %cst_7 = arith.constant dense<0.000000e+00> : vector<8x24xf32>
    %10 = tpu.matmul %8, %9, %cst_7 {dimension_numbers = #tpu.dot_dimension_numbers<[1], [0], [0], [1], [0, 0, 1, 1], [], []>} : vector<8x256xf32>, vector<256x24xf32>, vector<8x24xf32> -> vector<8x24xf32>
    %c0_8 = arith.constant 0 : index
    %c0_9 = arith.constant 0 : index
    %11 = vector.load %arg4[%c0_8, %c0_9] : memref<256x24xf32, #tpu.memory_space<vmem>>, vector<256x24xf32>
    %cst_10 = arith.constant dense<0.000000e+00> : vector<8x24xf32>
    %12 = tpu.matmul %3, %11, %cst_10 {dimension_numbers = #tpu.dot_dimension_numbers<[1], [0], [0], [1], [0, 0, 1, 1], [], []>} : vector<8x256xf32>, vector<256x24xf32>, vector<8x24xf32> -> vector<8x24xf32>
    %13 = arith.addf %10, %12 : vector<8x24xf32>
    %c0_11 = arith.constant 0 : index
    %c0_12 = arith.constant 0 : index
    %14 = vector.load %arg5[%c0_11, %c0_12] : memref<1x24xf32, #tpu.memory_space<vmem>>, vector<1x24xf32>
    %15 = vector.broadcast %14 : vector<1x24xf32> to vector<8x24xf32>
    %16 = arith.addf %13, %15 : vector<8x24xf32>
    %cst_13 = arith.constant 0.000000e+00 : f32
    %17 = vector.broadcast %cst_13 : f32 to vector<8x24xf32>
    %18 = arith.maximumf %16, %17 : vector<8x24xf32>
    %c0_14 = arith.constant 0 : index
    %c0_15 = arith.constant 0 : index
    %19 = vector.load %arg6[%c0_14, %c0_15] : memref<24x256xf32, #tpu.memory_space<vmem>>, vector<24x256xf32>
    %cst_16 = arith.constant dense<0.000000e+00> : vector<8x256xf32>
    %20 = tpu.matmul %18, %19, %cst_16 {dimension_numbers = #tpu.dot_dimension_numbers<[1], [0], [0], [1], [0, 0, 1, 1], [], []>} : vector<8x24xf32>, vector<24x256xf32>, vector<8x256xf32> -> vector<8x256xf32>
    %c0_17 = arith.constant 0 : index
    %c0_18 = arith.constant 0 : index
    %21 = vector.load %arg8[%c0_17, %c0_18] : memref<1x256xf32, #tpu.memory_space<vmem>>, vector<1x256xf32>
    %22 = vector.broadcast %21 : vector<1x256xf32> to vector<8x256xf32>
    %23 = arith.addf %20, %22 : vector<8x256xf32>
    %24 = arith.negf %23 : vector<8x256xf32>
    %25 = math.exp %24 : vector<8x256xf32>
    %cst_19 = arith.constant 1.000000e+00 : f32
    %26 = vector.broadcast %cst_19 : f32 to vector<8x256xf32>
    %27 = arith.addf %26, %25 : vector<8x256xf32>
    %28 = arith.divf %26, %27 : vector<8x256xf32>
    %c0_20 = arith.constant 0 : index
    %c0_21 = arith.constant 0 : index
    %29 = vector.load %arg10[%c0_20, %c0_21] : memref<16x8xf32, #tpu.memory_space<vmem>>, vector<16x8xf32>
    %cst_22 = arith.constant dense<0.000000e+00> : vector<16x256xf32>
    %30 = tpu.matmul %29, %28, %cst_22 {dimension_numbers = #tpu.dot_dimension_numbers<[1], [0], [0], [1], [0, 0, 1, 1], [], []>} : vector<16x8xf32>, vector<8x256xf32>, vector<16x256xf32> -> vector<16x256xf32>
    %c0_23 = arith.constant 0 : index
    %c0_24 = arith.constant 0 : index
    %31 = vector.load %arg7[%c0_23, %c0_24] : memref<24x256xf32, #tpu.memory_space<vmem>>, vector<24x256xf32>
    %cst_25 = arith.constant dense<0.000000e+00> : vector<8x256xf32>
    %32 = tpu.matmul %18, %31, %cst_25 {dimension_numbers = #tpu.dot_dimension_numbers<[1], [0], [0], [1], [0, 0, 1, 1], [], []>} : vector<8x24xf32>, vector<24x256xf32>, vector<8x256xf32> -> vector<8x256xf32>
    %c0_26 = arith.constant 0 : index
    %c0_27 = arith.constant 0 : index
    %33 = vector.load %arg9[%c0_26, %c0_27] : memref<1x256xf32, #tpu.memory_space<vmem>>, vector<1x256xf32>
    %34 = vector.broadcast %33 : vector<1x256xf32> to vector<8x256xf32>
    %35 = arith.addf %32, %34 : vector<8x256xf32>
    %36 = arith.negf %35 : vector<8x256xf32>
    %37 = math.exp %36 : vector<8x256xf32>
    %cst_28 = arith.constant 1.000000e+00 : f32
    %38 = vector.broadcast %cst_28 : f32 to vector<8x256xf32>
    %39 = arith.addf %38, %37 : vector<8x256xf32>
    %40 = arith.divf %38, %39 : vector<8x256xf32>
    %c0_29 = arith.constant 0 : index
    %c0_30 = arith.constant 0 : index
    %c0_31 = arith.constant 0 : index
    %41 = vector.load %arg11[%c0_29, %c0_30, %c0_31] : memref<1x16x256xf32, #tpu.memory_space<vmem>>, vector<1x16x256xf32>
    %42 = vector.shape_cast %41 : vector<1x16x256xf32> to vector<16x256xf32>
    %43 = vector.shape_cast %30 : vector<16x256xf32> to vector<1x16x256xf32>
    tpu.vector_store %arg11[%c0_29, %c0_30, %c0_31], %43 {strides = array<i32>} : memref<1x16x256xf32, #tpu.memory_space<vmem>>, vector<1x16x256xf32>,
    %c0_32 = arith.constant 0 : index
    %c0_33 = arith.constant 0 : index
    %c0_34 = arith.constant 0 : index
    %44 = vector.load %arg12[%c0_32, %c0_33, %c0_34] : memref<1x8x256xf32, #tpu.memory_space<vmem>>, vector<1x8x256xf32>
    %45 = vector.shape_cast %44 : vector<1x8x256xf32> to vector<8x256xf32>
    %46 = vector.shape_cast %40 : vector<8x256xf32> to vector<1x8x256xf32>
    tpu.vector_store %arg12[%c0_32, %c0_33, %c0_34], %46 {strides = array<i32>} : memref<1x8x256xf32, #tpu.memory_space<vmem>>, vector<1x8x256xf32>,
    return
  }
  func.func @transform_0(%arg0: i32) -> (i32, i32, i32) {
    %c0_i32 = arith.constant 0 : i32
    %c0_i32_0 = arith.constant 0 : i32
    %c0_i32_1 = arith.constant 0 : i32
    return %arg0, %c0_i32, %c0_i32_0 : i32, i32, i32
  }
  func.func @transform_1(%arg0: i32) -> (i32, i32, i32) {
    %c0_i32 = arith.constant 0 : i32
    %c0_i32_0 = arith.constant 0 : i32
    %c0_i32_1 = arith.constant 0 : i32
    return %arg0, %c0_i32, %c0_i32_0 : i32, i32, i32
  }
  func.func @transform_2(%arg0: i32) -> (i32, i32) {
    %c0_i32 = arith.constant 0 : i32
    %c0_i32_0 = arith.constant 0 : i32
    %c0_i32_1 = arith.constant 0 : i32
    return %c0_i32, %c0_i32_0 : i32, i32
  }
  func.func @transform_3(%arg0: i32) -> (i32, i32) {
    %c0_i32 = arith.constant 0 : i32
    %c0_i32_0 = arith.constant 0 : i32
    %c0_i32_1 = arith.constant 0 : i32
    return %c0_i32, %c0_i32_0 : i32, i32
  }
  func.func @transform_4(%arg0: i32) -> (i32, i32) {
    %c0_i32 = arith.constant 0 : i32
    %c0_i32_0 = arith.constant 0 : i32
    %c0_i32_1 = arith.constant 0 : i32
    return %c0_i32, %c0_i32_0 : i32, i32
  }
  func.func @transform_5(%arg0: i32) -> (i32, i32) {
    %c0_i32 = arith.constant 0 : i32
    %c0_i32_0 = arith.constant 0 : i32
    %c0_i32_1 = arith.constant 0 : i32
    return %c0_i32, %c0_i32_0 : i32, i32
  }
  func.func @transform_6(%arg0: i32) -> (i32, i32) {
    %c0_i32 = arith.constant 0 : i32
    %c0_i32_0 = arith.constant 0 : i32
    %c0_i32_1 = arith.constant 0 : i32
    return %c0_i32, %c0_i32_0 : i32, i32
  }
  func.func @transform_7(%arg0: i32) -> (i32, i32) {
    %c0_i32 = arith.constant 0 : i32
    %c0_i32_0 = arith.constant 0 : i32
    %c0_i32_1 = arith.constant 0 : i32
    return %c0_i32, %c0_i32_0 : i32, i32
  }
  func.func @transform_8(%arg0: i32) -> (i32, i32) {
    %c0_i32 = arith.constant 0 : i32
    %c0_i32_0 = arith.constant 0 : i32
    %c0_i32_1 = arith.constant 0 : i32
    return %c0_i32, %c0_i32_0 : i32, i32
  }
  func.func @transform_9(%arg0: i32) -> (i32, i32) {
    %c0_i32 = arith.constant 0 : i32
    %c0_i32_0 = arith.constant 0 : i32
    %c0_i32_1 = arith.constant 0 : i32
    return %c0_i32, %c0_i32_0 : i32, i32
  }
  func.func @transform_10(%arg0: i32) -> (i32, i32, i32) {
    %c0_i32 = arith.constant 0 : i32
    %c0_i32_0 = arith.constant 0 : i32
    %c0_i32_1 = arith.constant 0 : i32
    return %arg0, %c0_i32, %c0_i32_0 : i32, i32, i32
  }
  func.func @transform_11(%arg0: i32) -> (i32, i32, i32) {
    %c0_i32 = arith.constant 0 : i32
    %c0_i32_0 = arith.constant 0 : i32
    %c0_i32_1 = arith.constant 0 : i32
    return %arg0, %c0_i32, %c0_i32_0 : i32, i32, i32
  }
}

module attributes {stable_mosaic.version = 11 : i64} {
  func.func @_ccw_kernel(%arg0: i32, %arg1: memref<1x8x256xf32, #tpu.memory_space<vmem>>, %arg2: memref<1x8x256xf32, #tpu.memory_space<vmem>>, %arg3: memref<9x256xf32, #tpu.memory_space<vmem>>, %arg4: memref<1x256xf32, #tpu.memory_space<vmem>>, %arg5: memref<2x256xf32, #tpu.memory_space<vmem>>, %arg6: memref<2x1xf32, #tpu.memory_space<vmem>>, %arg7: memref<2x256xf32, #tpu.memory_space<vmem>>, %arg8: memref<1x256xf32, #tpu.memory_space<vmem>>, %arg9: memref<256x256xf32, #tpu.memory_space<vmem>>, %arg10: memref<256x256xf32, #tpu.memory_space<vmem>>, %arg11: memref<1x8x256xf32, #tpu.memory_space<vmem>>) attributes {dimension_semantics = [#tpu.dimension_semantics<parallel>], iteration_bounds = array<i64: 2>, scalar_prefetch = 0 : i64, scratch_operands = 0 : i64, tpu.core_type = #tpu.core_type<tc>, window_params = [{transform_indices = @transform_0, window_bounds = array<i64: 1, 8, 256>}, {transform_indices = @transform_1, window_bounds = array<i64: 1, 8, 256>}, {pipeline_mode = #tpu.pipeline_mode<synchronous>, transform_indices = @transform_2, window_bounds = array<i64: 9, 256>}, {pipeline_mode = #tpu.pipeline_mode<synchronous>, transform_indices = @transform_3, window_bounds = array<i64: 1, 256>}, {pipeline_mode = #tpu.pipeline_mode<synchronous>, transform_indices = @transform_4, window_bounds = array<i64: 2, 256>}, {pipeline_mode = #tpu.pipeline_mode<synchronous>, transform_indices = @transform_5, window_bounds = array<i64: 2, 1>}, {pipeline_mode = #tpu.pipeline_mode<synchronous>, transform_indices = @transform_6, window_bounds = array<i64: 2, 256>}, {pipeline_mode = #tpu.pipeline_mode<synchronous>, transform_indices = @transform_7, window_bounds = array<i64: 1, 256>}, {pipeline_mode = #tpu.pipeline_mode<synchronous>, transform_indices = @transform_8, window_bounds = array<i64: 256, 256>}, {pipeline_mode = #tpu.pipeline_mode<synchronous>, transform_indices = @transform_9, window_bounds = array<i64: 256, 256>}, {transform_indices = @transform_10, window_bounds = array<i64: 1, 8, 256>}]} {
    %c0 = arith.constant 0 : index
    %c0_0 = arith.constant 0 : index
    %c0_1 = arith.constant 0 : index
    %0 = vector.load %arg1[%c0, %c0_0, %c0_1] : memref<1x8x256xf32, #tpu.memory_space<vmem>>, vector<1x8x256xf32>
    %1 = vector.shape_cast %0 : vector<1x8x256xf32> to vector<8x256xf32>
    %c0_2 = arith.constant 0 : index
    %c0_3 = arith.constant 0 : index
    %c0_4 = arith.constant 0 : index
    %2 = vector.load %arg2[%c0_2, %c0_3, %c0_4] : memref<1x8x256xf32, #tpu.memory_space<vmem>>, vector<1x8x256xf32>
    %3 = vector.shape_cast %2 : vector<1x8x256xf32> to vector<8x256xf32>
    %4 = arith.mulf %1, %3 : vector<8x256xf32>
    %cst = arith.constant 0.000000e+00 : f32
    %5 = vector.broadcast %cst : f32 to vector<1x256xf32>
    %6 = vector.extract_strided_slice %4 {offsets = [0, 0], sizes = [7, 256], strides = [1, 1]} : vector<8x256xf32> to vector<7x256xf32>
    %7 = tpu.concatenate %5, %6 in 0 : vector<1x256xf32>, vector<7x256xf32> -> vector<8x256xf32>
    %8 = vector.extract_strided_slice %4 {offsets = [1, 0], sizes = [7, 256], strides = [1, 1]} : vector<8x256xf32> to vector<7x256xf32>
    %9 = tpu.concatenate %8, %5 in 0 : vector<7x256xf32>, vector<1x256xf32> -> vector<8x256xf32>
    %c0_5 = arith.constant 0 : index
    %c0_6 = arith.constant 0 : index
    %10 = vector.load %arg3[%c0_5, %c0_6] : memref<9x256xf32, #tpu.memory_space<vmem>>, vector<9x256xf32>
    %c0_7 = arith.constant 0 : index
    %c0_8 = arith.constant 0 : index
    %11 = vector.load %arg4[%c0_7, %c0_8] : memref<1x256xf32, #tpu.memory_space<vmem>>, vector<1x256xf32>
    %cst_9 = arith.constant 0.000000e+00 : f32
    %12 = vector.broadcast %cst_9 : f32 to vector<8x32xf32>
    %13 = vector.extract_strided_slice %7 {offsets = [0, 0], sizes = [8, 224], strides = [1, 1]} : vector<8x256xf32> to vector<8x224xf32>
    %14 = tpu.concatenate %12, %13 in 1 : vector<8x32xf32>, vector<8x224xf32> -> vector<8x256xf32>
    %15 = vector.extract_strided_slice %10 {offsets = [0, 0], sizes = [1, 256], strides = [1, 1]} : vector<9x256xf32> to vector<1x256xf32>
    %16 = vector.shape_cast %15 : vector<1x256xf32> to vector<256xf32>
    %17 = vector.shape_cast %16 : vector<256xf32> to vector<1x256xf32>
    %18 = vector.broadcast %17 : vector<1x256xf32> to vector<8x256xf32>
    %19 = arith.mulf %14, %18 : vector<8x256xf32>
    %20 = vector.extract_strided_slice %10 {offsets = [1, 0], sizes = [1, 256], strides = [1, 1]} : vector<9x256xf32> to vector<1x256xf32>
    %21 = vector.shape_cast %20 : vector<1x256xf32> to vector<256xf32>
    %22 = vector.shape_cast %21 : vector<256xf32> to vector<1x256xf32>
    %23 = vector.broadcast %22 : vector<1x256xf32> to vector<8x256xf32>
    %24 = arith.mulf %7, %23 : vector<8x256xf32>
    %25 = arith.addf %19, %24 : vector<8x256xf32>
    %cst_10 = arith.constant 0.000000e+00 : f32
    %26 = vector.broadcast %cst_10 : f32 to vector<8x32xf32>
    %27 = vector.extract_strided_slice %7 {offsets = [0, 32], sizes = [8, 224], strides = [1, 1]} : vector<8x256xf32> to vector<8x224xf32>
    %28 = tpu.concatenate %27, %26 in 1 : vector<8x224xf32>, vector<8x32xf32> -> vector<8x256xf32>
    %29 = vector.extract_strided_slice %10 {offsets = [2, 0], sizes = [1, 256], strides = [1, 1]} : vector<9x256xf32> to vector<1x256xf32>
    %30 = vector.shape_cast %29 : vector<1x256xf32> to vector<256xf32>
    %31 = vector.shape_cast %30 : vector<256xf32> to vector<1x256xf32>
    %32 = vector.broadcast %31 : vector<1x256xf32> to vector<8x256xf32>
    %33 = arith.mulf %28, %32 : vector<8x256xf32>
    %34 = arith.addf %25, %33 : vector<8x256xf32>
    %cst_11 = arith.constant 0.000000e+00 : f32
    %35 = vector.broadcast %cst_11 : f32 to vector<8x32xf32>
    %36 = vector.extract_strided_slice %4 {offsets = [0, 0], sizes = [8, 224], strides = [1, 1]} : vector<8x256xf32> to vector<8x224xf32>
    %37 = tpu.concatenate %35, %36 in 1 : vector<8x32xf32>, vector<8x224xf32> -> vector<8x256xf32>
    %38 = vector.extract_strided_slice %10 {offsets = [3, 0], sizes = [1, 256], strides = [1, 1]} : vector<9x256xf32> to vector<1x256xf32>
    %39 = vector.shape_cast %38 : vector<1x256xf32> to vector<256xf32>
    %40 = vector.shape_cast %39 : vector<256xf32> to vector<1x256xf32>
    %41 = vector.broadcast %40 : vector<1x256xf32> to vector<8x256xf32>
    %42 = arith.mulf %37, %41 : vector<8x256xf32>
    %43 = arith.addf %34, %42 : vector<8x256xf32>
    %44 = vector.extract_strided_slice %10 {offsets = [4, 0], sizes = [1, 256], strides = [1, 1]} : vector<9x256xf32> to vector<1x256xf32>
    %45 = vector.shape_cast %44 : vector<1x256xf32> to vector<256xf32>
    %46 = vector.shape_cast %45 : vector<256xf32> to vector<1x256xf32>
    %47 = vector.broadcast %46 : vector<1x256xf32> to vector<8x256xf32>
    %48 = arith.mulf %4, %47 : vector<8x256xf32>
    %49 = arith.addf %43, %48 : vector<8x256xf32>
    %cst_12 = arith.constant 0.000000e+00 : f32
    %50 = vector.broadcast %cst_12 : f32 to vector<8x32xf32>
    %51 = vector.extract_strided_slice %4 {offsets = [0, 32], sizes = [8, 224], strides = [1, 1]} : vector<8x256xf32> to vector<8x224xf32>
    %52 = tpu.concatenate %51, %50 in 1 : vector<8x224xf32>, vector<8x32xf32> -> vector<8x256xf32>
    %53 = vector.extract_strided_slice %10 {offsets = [5, 0], sizes = [1, 256], strides = [1, 1]} : vector<9x256xf32> to vector<1x256xf32>
    %54 = vector.shape_cast %53 : vector<1x256xf32> to vector<256xf32>
    %55 = vector.shape_cast %54 : vector<256xf32> to vector<1x256xf32>
    %56 = vector.broadcast %55 : vector<1x256xf32> to vector<8x256xf32>
    %57 = arith.mulf %52, %56 : vector<8x256xf32>
    %58 = arith.addf %49, %57 : vector<8x256xf32>
    %cst_13 = arith.constant 0.000000e+00 : f32
    %59 = vector.broadcast %cst_13 : f32 to vector<8x32xf32>
    %60 = vector.extract_strided_slice %9 {offsets = [0, 0], sizes = [8, 224], strides = [1, 1]} : vector<8x256xf32> to vector<8x224xf32>
    %61 = tpu.concatenate %59, %60 in 1 : vector<8x32xf32>, vector<8x224xf32> -> vector<8x256xf32>
    %62 = vector.extract_strided_slice %10 {offsets = [6, 0], sizes = [1, 256], strides = [1, 1]} : vector<9x256xf32> to vector<1x256xf32>
    %63 = vector.shape_cast %62 : vector<1x256xf32> to vector<256xf32>
    %64 = vector.shape_cast %63 : vector<256xf32> to vector<1x256xf32>
    %65 = vector.broadcast %64 : vector<1x256xf32> to vector<8x256xf32>
    %66 = arith.mulf %61, %65 : vector<8x256xf32>
    %67 = arith.addf %58, %66 : vector<8x256xf32>
    %68 = vector.extract_strided_slice %10 {offsets = [7, 0], sizes = [1, 256], strides = [1, 1]} : vector<9x256xf32> to vector<1x256xf32>
    %69 = vector.shape_cast %68 : vector<1x256xf32> to vector<256xf32>
    %70 = vector.shape_cast %69 : vector<256xf32> to vector<1x256xf32>
    %71 = vector.broadcast %70 : vector<1x256xf32> to vector<8x256xf32>
    %72 = arith.mulf %9, %71 : vector<8x256xf32>
    %73 = arith.addf %67, %72 : vector<8x256xf32>
    %cst_14 = arith.constant 0.000000e+00 : f32
    %74 = vector.broadcast %cst_14 : f32 to vector<8x32xf32>
    %75 = vector.extract_strided_slice %9 {offsets = [0, 32], sizes = [8, 224], strides = [1, 1]} : vector<8x256xf32> to vector<8x224xf32>
    %76 = tpu.concatenate %75, %74 in 1 : vector<8x224xf32>, vector<8x32xf32> -> vector<8x256xf32>
    %77 = vector.extract_strided_slice %10 {offsets = [8, 0], sizes = [1, 256], strides = [1, 1]} : vector<9x256xf32> to vector<1x256xf32>
    %78 = vector.shape_cast %77 : vector<1x256xf32> to vector<256xf32>
    %79 = vector.shape_cast %78 : vector<256xf32> to vector<1x256xf32>
    %80 = vector.broadcast %79 : vector<1x256xf32> to vector<8x256xf32>
    %81 = arith.mulf %76, %80 : vector<8x256xf32>
    %82 = arith.addf %73, %81 : vector<8x256xf32>
    %83 = vector.shape_cast %11 : vector<1x256xf32> to vector<256xf32>
    %84 = vector.shape_cast %83 : vector<256xf32> to vector<1x256xf32>
    %85 = vector.broadcast %84 : vector<1x256xf32> to vector<8x256xf32>
    %86 = arith.addf %82, %85 : vector<8x256xf32>
    %cst_15 = arith.constant 0.000000e+00 : f32
    %87 = vector.broadcast %cst_15 : f32 to vector<8x256xf32>
    %88 = arith.maximumf %86, %87 : vector<8x256xf32>
    %cst_16 = arith.constant dense<0.000000e+00> : vector<256xf32>
    %89 = vector.multi_reduction <add>, %88, %cst_16 [0] : vector<8x256xf32> to vector<256xf32>
    %90 = vector.shape_cast %89 : vector<256xf32> to vector<1x256xf32>
    %c0_17 = arith.constant 0 : index
    %c0_18 = arith.constant 0 : index
    %91 = vector.load %arg5[%c0_17, %c0_18] : memref<2x256xf32, #tpu.memory_space<vmem>>, vector<2x256xf32>
    %92 = vector.broadcast %90 : vector<1x256xf32> to vector<2x256xf32>
    %93 = arith.mulf %92, %91 : vector<2x256xf32>
    %cst_19 = arith.constant dense<0.000000e+00> : vector<2xf32>
    %94 = vector.multi_reduction <add>, %93, %cst_19 [1] : vector<2x256xf32> to vector<2xf32>
    %95 = vector.shape_cast %94 : vector<2xf32> to vector<2x1xf32>
    %cst_20 = arith.constant 1.562500e-02 : f32
    %96 = vector.broadcast %cst_20 : f32 to vector<2x1xf32>
    %97 = arith.mulf %95, %96 : vector<2x1xf32>
    %c0_21 = arith.constant 0 : index
    %c0_22 = arith.constant 0 : index
    %98 = vector.load %arg6[%c0_21, %c0_22] : memref<2x1xf32, #tpu.memory_space<vmem>>, vector<2x1xf32>
    %99 = arith.addf %97, %98 : vector<2x1xf32>
    %cst_23 = arith.constant 0.000000e+00 : f32
    %100 = vector.broadcast %cst_23 : f32 to vector<2x1xf32>
    %101 = arith.maximumf %99, %100 : vector<2x1xf32>
    %c0_24 = arith.constant 0 : index
    %c0_25 = arith.constant 0 : index
    %102 = vector.load %arg7[%c0_24, %c0_25] : memref<2x256xf32, #tpu.memory_space<vmem>>, vector<2x256xf32>
    %103 = vector.broadcast %101 : vector<2x1xf32> to vector<2x256xf32>
    %104 = arith.mulf %103, %102 : vector<2x256xf32>
    %cst_26 = arith.constant dense<0.000000e+00> : vector<256xf32>
    %105 = vector.multi_reduction <add>, %104, %cst_26 [0] : vector<2x256xf32> to vector<256xf32>
    %106 = vector.shape_cast %105 : vector<256xf32> to vector<1x256xf32>
    %c0_27 = arith.constant 0 : index
    %c0_28 = arith.constant 0 : index
    %107 = vector.load %arg8[%c0_27, %c0_28] : memref<1x256xf32, #tpu.memory_space<vmem>>, vector<1x256xf32>
    %108 = arith.addf %106, %107 : vector<1x256xf32>
    %109 = arith.negf %108 : vector<1x256xf32>
    %110 = math.exp %109 : vector<1x256xf32>
    %cst_29 = arith.constant 1.000000e+00 : f32
    %111 = vector.broadcast %cst_29 : f32 to vector<1x256xf32>
    %112 = arith.addf %111, %110 : vector<1x256xf32>
    %113 = arith.divf %111, %112 : vector<1x256xf32>
    %114 = vector.broadcast %113 : vector<1x256xf32> to vector<8x256xf32>
    %115 = arith.mulf %88, %114 : vector<8x256xf32>
    %c0_30 = arith.constant 0 : index
    %c0_31 = arith.constant 0 : index
    %116 = vector.load %arg9[%c0_30, %c0_31] : memref<256x256xf32, #tpu.memory_space<vmem>>, vector<256x256xf32>
    %cst_32 = arith.constant dense<0.000000e+00> : vector<8x256xf32>
    %117 = tpu.matmul %1, %116, %cst_32 {dimension_numbers = #tpu.dot_dimension_numbers<[1], [0], [0], [1], [0, 0, 1, 1], [], []>} : vector<8x256xf32>, vector<256x256xf32>, vector<8x256xf32> -> vector<8x256xf32>
    %c0_33 = arith.constant 0 : index
    %c0_34 = arith.constant 0 : index
    %118 = vector.load %arg10[%c0_33, %c0_34] : memref<256x256xf32, #tpu.memory_space<vmem>>, vector<256x256xf32>
    %cst_35 = arith.constant dense<0.000000e+00> : vector<8x256xf32>
    %119 = tpu.matmul %115, %118, %cst_35 {dimension_numbers = #tpu.dot_dimension_numbers<[1], [0], [0], [1], [0, 0, 1, 1], [], []>} : vector<8x256xf32>, vector<256x256xf32>, vector<8x256xf32> -> vector<8x256xf32>
    %120 = arith.addf %117, %119 : vector<8x256xf32>
    %c0_36 = arith.constant 0 : index
    %c0_37 = arith.constant 0 : index
    %c0_38 = arith.constant 0 : index
    %121 = vector.load %arg11[%c0_36, %c0_37, %c0_38] : memref<1x8x256xf32, #tpu.memory_space<vmem>>, vector<1x8x256xf32>
    %122 = vector.shape_cast %121 : vector<1x8x256xf32> to vector<8x256xf32>
    %123 = vector.shape_cast %120 : vector<8x256xf32> to vector<1x8x256xf32>
    tpu.vector_store %arg11[%c0_36, %c0_37, %c0_38], %123 {strides = array<i32>} : memref<1x8x256xf32, #tpu.memory_space<vmem>>, vector<1x8x256xf32>,
    return
  }
  func.func @transform_0(%arg0: i32) -> (i32, i32, i32) {
    %c0_i32 = arith.constant 0 : i32
    %c0_i32_0 = arith.constant 0 : i32
    %c0_i32_1 = arith.constant 0 : i32
    return %arg0, %c0_i32, %c0_i32_0 : i32, i32, i32
  }
  func.func @transform_1(%arg0: i32) -> (i32, i32, i32) {
    %c0_i32 = arith.constant 0 : i32
    %c0_i32_0 = arith.constant 0 : i32
    %c0_i32_1 = arith.constant 0 : i32
    return %arg0, %c0_i32, %c0_i32_0 : i32, i32, i32
  }
  func.func @transform_2(%arg0: i32) -> (i32, i32) {
    %c0_i32 = arith.constant 0 : i32
    %c0_i32_0 = arith.constant 0 : i32
    %c0_i32_1 = arith.constant 0 : i32
    return %c0_i32, %c0_i32_0 : i32, i32
  }
  func.func @transform_3(%arg0: i32) -> (i32, i32) {
    %c0_i32 = arith.constant 0 : i32
    %c0_i32_0 = arith.constant 0 : i32
    %c0_i32_1 = arith.constant 0 : i32
    return %c0_i32, %c0_i32_0 : i32, i32
  }
  func.func @transform_4(%arg0: i32) -> (i32, i32) {
    %c0_i32 = arith.constant 0 : i32
    %c0_i32_0 = arith.constant 0 : i32
    %c0_i32_1 = arith.constant 0 : i32
    return %c0_i32, %c0_i32_0 : i32, i32
  }
  func.func @transform_5(%arg0: i32) -> (i32, i32) {
    %c0_i32 = arith.constant 0 : i32
    %c0_i32_0 = arith.constant 0 : i32
    %c0_i32_1 = arith.constant 0 : i32
    return %c0_i32, %c0_i32_0 : i32, i32
  }
  func.func @transform_6(%arg0: i32) -> (i32, i32) {
    %c0_i32 = arith.constant 0 : i32
    %c0_i32_0 = arith.constant 0 : i32
    %c0_i32_1 = arith.constant 0 : i32
    return %c0_i32, %c0_i32_0 : i32, i32
  }
  func.func @transform_7(%arg0: i32) -> (i32, i32) {
    %c0_i32 = arith.constant 0 : i32
    %c0_i32_0 = arith.constant 0 : i32
    %c0_i32_1 = arith.constant 0 : i32
    return %c0_i32, %c0_i32_0 : i32, i32
  }
  func.func @transform_8(%arg0: i32) -> (i32, i32) {
    %c0_i32 = arith.constant 0 : i32
    %c0_i32_0 = arith.constant 0 : i32
    %c0_i32_1 = arith.constant 0 : i32
    return %c0_i32, %c0_i32_0 : i32, i32
  }
  func.func @transform_9(%arg0: i32) -> (i32, i32) {
    %c0_i32 = arith.constant 0 : i32
    %c0_i32_0 = arith.constant 0 : i32
    %c0_i32_1 = arith.constant 0 : i32
    return %c0_i32, %c0_i32_0 : i32, i32
  }
  func.func @transform_10(%arg0: i32) -> (i32, i32, i32) {
    %c0_i32 = arith.constant 0 : i32
    %c0_i32_0 = arith.constant 0 : i32
    %c0_i32_1 = arith.constant 0 : i32
    return %arg0, %c0_i32, %c0_i32_0 : i32, i32, i32
  }
}

module attributes {stable_mosaic.version = 11 : i64} {
  func.func @_up_fuse_kernel(%arg0: i32, %arg1: memref<1x8x256xf32, #tpu.memory_space<vmem>>, %arg2: memref<256x128xf32, #tpu.memory_space<vmem>>, %arg3: memref<1x128xf32, #tpu.memory_space<vmem>>, %arg4: memref<128x256xf32, #tpu.memory_space<vmem>>, %arg5: memref<16x8xf32, #tpu.memory_space<vmem>>, %arg6: memref<1x16x256xf32, #tpu.memory_space<vmem>>, %arg7: memref<1x16x256xf32, #tpu.memory_space<vmem>>) attributes {dimension_semantics = [#tpu.dimension_semantics<parallel>], iteration_bounds = array<i64: 2>, scalar_prefetch = 0 : i64, scratch_operands = 0 : i64, tpu.core_type = #tpu.core_type<tc>, window_params = [{transform_indices = @transform_0, window_bounds = array<i64: 1, 8, 256>}, {pipeline_mode = #tpu.pipeline_mode<synchronous>, transform_indices = @transform_1, window_bounds = array<i64: 256, 128>}, {pipeline_mode = #tpu.pipeline_mode<synchronous>, transform_indices = @transform_2, window_bounds = array<i64: 1, 128>}, {pipeline_mode = #tpu.pipeline_mode<synchronous>, transform_indices = @transform_3, window_bounds = array<i64: 128, 256>}, {pipeline_mode = #tpu.pipeline_mode<synchronous>, transform_indices = @transform_4, window_bounds = array<i64: 16, 8>}, {transform_indices = @transform_5, window_bounds = array<i64: 1, 16, 256>}, {transform_indices = @transform_6, window_bounds = array<i64: 1, 16, 256>}]} {
    %c0 = arith.constant 0 : index
    %c0_0 = arith.constant 0 : index
    %c0_1 = arith.constant 0 : index
    %0 = vector.load %arg1[%c0, %c0_0, %c0_1] : memref<1x8x256xf32, #tpu.memory_space<vmem>>, vector<1x8x256xf32>
    %1 = vector.shape_cast %0 : vector<1x8x256xf32> to vector<8x256xf32>
    %c0_2 = arith.constant 0 : index
    %c0_3 = arith.constant 0 : index
    %2 = vector.load %arg2[%c0_2, %c0_3] : memref<256x128xf32, #tpu.memory_space<vmem>>, vector<256x128xf32>
    %cst = arith.constant dense<0.000000e+00> : vector<8x128xf32>
    %3 = tpu.matmul %1, %2, %cst {dimension_numbers = #tpu.dot_dimension_numbers<[1], [0], [0], [1], [0, 0, 1, 1], [], []>} : vector<8x256xf32>, vector<256x128xf32>, vector<8x128xf32> -> vector<8x128xf32>
    %c0_4 = arith.constant 0 : index
    %c0_5 = arith.constant 0 : index
    %4 = vector.load %arg3[%c0_4, %c0_5] : memref<1x128xf32, #tpu.memory_space<vmem>>, vector<1x128xf32>
    %5 = vector.broadcast %4 : vector<1x128xf32> to vector<8x128xf32>
    %6 = arith.addf %3, %5 : vector<8x128xf32>
    %cst_6 = arith.constant 0.000000e+00 : f32
    %7 = vector.broadcast %cst_6 : f32 to vector<8x128xf32>
    %8 = arith.maximumf %6, %7 : vector<8x128xf32>
    %c0_7 = arith.constant 0 : index
    %c0_8 = arith.constant 0 : index
    %9 = vector.load %arg4[%c0_7, %c0_8] : memref<128x256xf32, #tpu.memory_space<vmem>>, vector<128x256xf32>
    %cst_9 = arith.constant dense<0.000000e+00> : vector<8x256xf32>
    %10 = tpu.matmul %8, %9, %cst_9 {dimension_numbers = #tpu.dot_dimension_numbers<[1], [0], [0], [1], [0, 0, 1, 1], [], []>} : vector<8x128xf32>, vector<128x256xf32>, vector<8x256xf32> -> vector<8x256xf32>
    %c0_10 = arith.constant 0 : index
    %c0_11 = arith.constant 0 : index
    %11 = vector.load %arg5[%c0_10, %c0_11] : memref<16x8xf32, #tpu.memory_space<vmem>>, vector<16x8xf32>
    %cst_12 = arith.constant dense<0.000000e+00> : vector<16x256xf32>
    %12 = tpu.matmul %11, %10, %cst_12 {dimension_numbers = #tpu.dot_dimension_numbers<[1], [0], [0], [1], [0, 0, 1, 1], [], []>} : vector<16x8xf32>, vector<8x256xf32>, vector<16x256xf32> -> vector<16x256xf32>
    %c0_13 = arith.constant 0 : index
    %c0_14 = arith.constant 0 : index
    %c0_15 = arith.constant 0 : index
    %13 = vector.load %arg6[%c0_13, %c0_14, %c0_15] : memref<1x16x256xf32, #tpu.memory_space<vmem>>, vector<1x16x256xf32>
    %14 = vector.shape_cast %13 : vector<1x16x256xf32> to vector<16x256xf32>
    %15 = arith.addf %12, %14 : vector<16x256xf32>
    %c0_16 = arith.constant 0 : index
    %c0_17 = arith.constant 0 : index
    %c0_18 = arith.constant 0 : index
    %16 = vector.load %arg7[%c0_16, %c0_17, %c0_18] : memref<1x16x256xf32, #tpu.memory_space<vmem>>, vector<1x16x256xf32>
    %17 = vector.shape_cast %16 : vector<1x16x256xf32> to vector<16x256xf32>
    %18 = vector.shape_cast %15 : vector<16x256xf32> to vector<1x16x256xf32>
    tpu.vector_store %arg7[%c0_16, %c0_17, %c0_18], %18 {strides = array<i32>} : memref<1x16x256xf32, #tpu.memory_space<vmem>>, vector<1x16x256xf32>,
    return
  }
  func.func @transform_0(%arg0: i32) -> (i32, i32, i32) {
    %c0_i32 = arith.constant 0 : i32
    %c0_i32_0 = arith.constant 0 : i32
    %c0_i32_1 = arith.constant 0 : i32
    return %arg0, %c0_i32, %c0_i32_0 : i32, i32, i32
  }
  func.func @transform_1(%arg0: i32) -> (i32, i32) {
    %c0_i32 = arith.constant 0 : i32
    %c0_i32_0 = arith.constant 0 : i32
    %c0_i32_1 = arith.constant 0 : i32
    return %c0_i32, %c0_i32_0 : i32, i32
  }
  func.func @transform_2(%arg0: i32) -> (i32, i32) {
    %c0_i32 = arith.constant 0 : i32
    %c0_i32_0 = arith.constant 0 : i32
    %c0_i32_1 = arith.constant 0 : i32
    return %c0_i32, %c0_i32_0 : i32, i32
  }
  func.func @transform_3(%arg0: i32) -> (i32, i32) {
    %c0_i32 = arith.constant 0 : i32
    %c0_i32_0 = arith.constant 0 : i32
    %c0_i32_1 = arith.constant 0 : i32
    return %c0_i32, %c0_i32_0 : i32, i32
  }
  func.func @transform_4(%arg0: i32) -> (i32, i32) {
    %c0_i32 = arith.constant 0 : i32
    %c0_i32_0 = arith.constant 0 : i32
    %c0_i32_1 = arith.constant 0 : i32
    return %c0_i32, %c0_i32_0 : i32, i32
  }
  func.func @transform_5(%arg0: i32) -> (i32, i32, i32) {
    %c0_i32 = arith.constant 0 : i32
    %c0_i32_0 = arith.constant 0 : i32
    %c0_i32_1 = arith.constant 0 : i32
    return %arg0, %c0_i32, %c0_i32_0 : i32, i32, i32
  }
  func.func @transform_6(%arg0: i32) -> (i32, i32, i32) {
    %c0_i32 = arith.constant 0 : i32
    %c0_i32_0 = arith.constant 0 : i32
    %c0_i32_1 = arith.constant 0 : i32
    return %arg0, %c0_i32, %c0_i32_0 : i32, i32, i32
  }
}

module attributes {stable_mosaic.version = 11 : i64} {
  func.func @_ccw_kernel(%arg0: i32, %arg1: memref<1x16x256xf32, #tpu.memory_space<vmem>>, %arg2: memref<1x16x256xf32, #tpu.memory_space<vmem>>, %arg3: memref<9x256xf32, #tpu.memory_space<vmem>>, %arg4: memref<1x256xf32, #tpu.memory_space<vmem>>, %arg5: memref<1x256xf32, #tpu.memory_space<vmem>>, %arg6: memref<1x1xf32, #tpu.memory_space<vmem>>, %arg7: memref<1x256xf32, #tpu.memory_space<vmem>>, %arg8: memref<1x256xf32, #tpu.memory_space<vmem>>, %arg9: memref<256x256xf32, #tpu.memory_space<vmem>>, %arg10: memref<256x256xf32, #tpu.memory_space<vmem>>, %arg11: memref<1x16x256xf32, #tpu.memory_space<vmem>>) attributes {dimension_semantics = [#tpu.dimension_semantics<parallel>], iteration_bounds = array<i64: 2>, scalar_prefetch = 0 : i64, scratch_operands = 0 : i64, tpu.core_type = #tpu.core_type<tc>, window_params = [{transform_indices = @transform_0, window_bounds = array<i64: 1, 16, 256>}, {transform_indices = @transform_1, window_bounds = array<i64: 1, 16, 256>}, {pipeline_mode = #tpu.pipeline_mode<synchronous>, transform_indices = @transform_2, window_bounds = array<i64: 9, 256>}, {pipeline_mode = #tpu.pipeline_mode<synchronous>, transform_indices = @transform_3, window_bounds = array<i64: 1, 256>}, {pipeline_mode = #tpu.pipeline_mode<synchronous>, transform_indices = @transform_4, window_bounds = array<i64: 1, 256>}, {pipeline_mode = #tpu.pipeline_mode<synchronous>, transform_indices = @transform_5, window_bounds = array<i64: 1, 1>}, {pipeline_mode = #tpu.pipeline_mode<synchronous>, transform_indices = @transform_6, window_bounds = array<i64: 1, 256>}, {pipeline_mode = #tpu.pipeline_mode<synchronous>, transform_indices = @transform_7, window_bounds = array<i64: 1, 256>}, {pipeline_mode = #tpu.pipeline_mode<synchronous>, transform_indices = @transform_8, window_bounds = array<i64: 256, 256>}, {pipeline_mode = #tpu.pipeline_mode<synchronous>, transform_indices = @transform_9, window_bounds = array<i64: 256, 256>}, {transform_indices = @transform_10, window_bounds = array<i64: 1, 16, 256>}]} {
    %c0 = arith.constant 0 : index
    %c0_0 = arith.constant 0 : index
    %c0_1 = arith.constant 0 : index
    %0 = vector.load %arg1[%c0, %c0_0, %c0_1] : memref<1x16x256xf32, #tpu.memory_space<vmem>>, vector<1x16x256xf32>
    %1 = vector.shape_cast %0 : vector<1x16x256xf32> to vector<16x256xf32>
    %c0_2 = arith.constant 0 : index
    %c0_3 = arith.constant 0 : index
    %c0_4 = arith.constant 0 : index
    %2 = vector.load %arg2[%c0_2, %c0_3, %c0_4] : memref<1x16x256xf32, #tpu.memory_space<vmem>>, vector<1x16x256xf32>
    %3 = vector.shape_cast %2 : vector<1x16x256xf32> to vector<16x256xf32>
    %4 = arith.mulf %1, %3 : vector<16x256xf32>
    %cst = arith.constant 0.000000e+00 : f32
    %5 = vector.broadcast %cst : f32 to vector<1x256xf32>
    %6 = vector.extract_strided_slice %4 {offsets = [0, 0], sizes = [15, 256], strides = [1, 1]} : vector<16x256xf32> to vector<15x256xf32>
    %7 = tpu.concatenate %5, %6 in 0 : vector<1x256xf32>, vector<15x256xf32> -> vector<16x256xf32>
    %8 = vector.extract_strided_slice %4 {offsets = [1, 0], sizes = [15, 256], strides = [1, 1]} : vector<16x256xf32> to vector<15x256xf32>
    %9 = tpu.concatenate %8, %5 in 0 : vector<15x256xf32>, vector<1x256xf32> -> vector<16x256xf32>
    %c0_5 = arith.constant 0 : index
    %c0_6 = arith.constant 0 : index
    %10 = vector.load %arg3[%c0_5, %c0_6] : memref<9x256xf32, #tpu.memory_space<vmem>>, vector<9x256xf32>
    %c0_7 = arith.constant 0 : index
    %c0_8 = arith.constant 0 : index
    %11 = vector.load %arg4[%c0_7, %c0_8] : memref<1x256xf32, #tpu.memory_space<vmem>>, vector<1x256xf32>
    %cst_9 = arith.constant 0.000000e+00 : f32
    %12 = vector.broadcast %cst_9 : f32 to vector<16x16xf32>
    %13 = vector.extract_strided_slice %7 {offsets = [0, 0], sizes = [16, 240], strides = [1, 1]} : vector<16x256xf32> to vector<16x240xf32>
    %14 = tpu.concatenate %12, %13 in 1 : vector<16x16xf32>, vector<16x240xf32> -> vector<16x256xf32>
    %15 = vector.extract_strided_slice %10 {offsets = [0, 0], sizes = [1, 256], strides = [1, 1]} : vector<9x256xf32> to vector<1x256xf32>
    %16 = vector.shape_cast %15 : vector<1x256xf32> to vector<256xf32>
    %17 = vector.shape_cast %16 : vector<256xf32> to vector<1x256xf32>
    %18 = vector.broadcast %17 : vector<1x256xf32> to vector<16x256xf32>
    %19 = arith.mulf %14, %18 : vector<16x256xf32>
    %20 = vector.extract_strided_slice %10 {offsets = [1, 0], sizes = [1, 256], strides = [1, 1]} : vector<9x256xf32> to vector<1x256xf32>
    %21 = vector.shape_cast %20 : vector<1x256xf32> to vector<256xf32>
    %22 = vector.shape_cast %21 : vector<256xf32> to vector<1x256xf32>
    %23 = vector.broadcast %22 : vector<1x256xf32> to vector<16x256xf32>
    %24 = arith.mulf %7, %23 : vector<16x256xf32>
    %25 = arith.addf %19, %24 : vector<16x256xf32>
    %cst_10 = arith.constant 0.000000e+00 : f32
    %26 = vector.broadcast %cst_10 : f32 to vector<16x16xf32>
    %27 = vector.extract_strided_slice %7 {offsets = [0, 16], sizes = [16, 240], strides = [1, 1]} : vector<16x256xf32> to vector<16x240xf32>
    %28 = tpu.concatenate %27, %26 in 1 : vector<16x240xf32>, vector<16x16xf32> -> vector<16x256xf32>
    %29 = vector.extract_strided_slice %10 {offsets = [2, 0], sizes = [1, 256], strides = [1, 1]} : vector<9x256xf32> to vector<1x256xf32>
    %30 = vector.shape_cast %29 : vector<1x256xf32> to vector<256xf32>
    %31 = vector.shape_cast %30 : vector<256xf32> to vector<1x256xf32>
    %32 = vector.broadcast %31 : vector<1x256xf32> to vector<16x256xf32>
    %33 = arith.mulf %28, %32 : vector<16x256xf32>
    %34 = arith.addf %25, %33 : vector<16x256xf32>
    %cst_11 = arith.constant 0.000000e+00 : f32
    %35 = vector.broadcast %cst_11 : f32 to vector<16x16xf32>
    %36 = vector.extract_strided_slice %4 {offsets = [0, 0], sizes = [16, 240], strides = [1, 1]} : vector<16x256xf32> to vector<16x240xf32>
    %37 = tpu.concatenate %35, %36 in 1 : vector<16x16xf32>, vector<16x240xf32> -> vector<16x256xf32>
    %38 = vector.extract_strided_slice %10 {offsets = [3, 0], sizes = [1, 256], strides = [1, 1]} : vector<9x256xf32> to vector<1x256xf32>
    %39 = vector.shape_cast %38 : vector<1x256xf32> to vector<256xf32>
    %40 = vector.shape_cast %39 : vector<256xf32> to vector<1x256xf32>
    %41 = vector.broadcast %40 : vector<1x256xf32> to vector<16x256xf32>
    %42 = arith.mulf %37, %41 : vector<16x256xf32>
    %43 = arith.addf %34, %42 : vector<16x256xf32>
    %44 = vector.extract_strided_slice %10 {offsets = [4, 0], sizes = [1, 256], strides = [1, 1]} : vector<9x256xf32> to vector<1x256xf32>
    %45 = vector.shape_cast %44 : vector<1x256xf32> to vector<256xf32>
    %46 = vector.shape_cast %45 : vector<256xf32> to vector<1x256xf32>
    %47 = vector.broadcast %46 : vector<1x256xf32> to vector<16x256xf32>
    %48 = arith.mulf %4, %47 : vector<16x256xf32>
    %49 = arith.addf %43, %48 : vector<16x256xf32>
    %cst_12 = arith.constant 0.000000e+00 : f32
    %50 = vector.broadcast %cst_12 : f32 to vector<16x16xf32>
    %51 = vector.extract_strided_slice %4 {offsets = [0, 16], sizes = [16, 240], strides = [1, 1]} : vector<16x256xf32> to vector<16x240xf32>
    %52 = tpu.concatenate %51, %50 in 1 : vector<16x240xf32>, vector<16x16xf32> -> vector<16x256xf32>
    %53 = vector.extract_strided_slice %10 {offsets = [5, 0], sizes = [1, 256], strides = [1, 1]} : vector<9x256xf32> to vector<1x256xf32>
    %54 = vector.shape_cast %53 : vector<1x256xf32> to vector<256xf32>
    %55 = vector.shape_cast %54 : vector<256xf32> to vector<1x256xf32>
    %56 = vector.broadcast %55 : vector<1x256xf32> to vector<16x256xf32>
    %57 = arith.mulf %52, %56 : vector<16x256xf32>
    %58 = arith.addf %49, %57 : vector<16x256xf32>
    %cst_13 = arith.constant 0.000000e+00 : f32
    %59 = vector.broadcast %cst_13 : f32 to vector<16x16xf32>
    %60 = vector.extract_strided_slice %9 {offsets = [0, 0], sizes = [16, 240], strides = [1, 1]} : vector<16x256xf32> to vector<16x240xf32>
    %61 = tpu.concatenate %59, %60 in 1 : vector<16x16xf32>, vector<16x240xf32> -> vector<16x256xf32>
    %62 = vector.extract_strided_slice %10 {offsets = [6, 0], sizes = [1, 256], strides = [1, 1]} : vector<9x256xf32> to vector<1x256xf32>
    %63 = vector.shape_cast %62 : vector<1x256xf32> to vector<256xf32>
    %64 = vector.shape_cast %63 : vector<256xf32> to vector<1x256xf32>
    %65 = vector.broadcast %64 : vector<1x256xf32> to vector<16x256xf32>
    %66 = arith.mulf %61, %65 : vector<16x256xf32>
    %67 = arith.addf %58, %66 : vector<16x256xf32>
    %68 = vector.extract_strided_slice %10 {offsets = [7, 0], sizes = [1, 256], strides = [1, 1]} : vector<9x256xf32> to vector<1x256xf32>
    %69 = vector.shape_cast %68 : vector<1x256xf32> to vector<256xf32>
    %70 = vector.shape_cast %69 : vector<256xf32> to vector<1x256xf32>
    %71 = vector.broadcast %70 : vector<1x256xf32> to vector<16x256xf32>
    %72 = arith.mulf %9, %71 : vector<16x256xf32>
    %73 = arith.addf %67, %72 : vector<16x256xf32>
    %cst_14 = arith.constant 0.000000e+00 : f32
    %74 = vector.broadcast %cst_14 : f32 to vector<16x16xf32>
    %75 = vector.extract_strided_slice %9 {offsets = [0, 16], sizes = [16, 240], strides = [1, 1]} : vector<16x256xf32> to vector<16x240xf32>
    %76 = tpu.concatenate %75, %74 in 1 : vector<16x240xf32>, vector<16x16xf32> -> vector<16x256xf32>
    %77 = vector.extract_strided_slice %10 {offsets = [8, 0], sizes = [1, 256], strides = [1, 1]} : vector<9x256xf32> to vector<1x256xf32>
    %78 = vector.shape_cast %77 : vector<1x256xf32> to vector<256xf32>
    %79 = vector.shape_cast %78 : vector<256xf32> to vector<1x256xf32>
    %80 = vector.broadcast %79 : vector<1x256xf32> to vector<16x256xf32>
    %81 = arith.mulf %76, %80 : vector<16x256xf32>
    %82 = arith.addf %73, %81 : vector<16x256xf32>
    %83 = vector.shape_cast %11 : vector<1x256xf32> to vector<256xf32>
    %84 = vector.shape_cast %83 : vector<256xf32> to vector<1x256xf32>
    %85 = vector.broadcast %84 : vector<1x256xf32> to vector<16x256xf32>
    %86 = arith.addf %82, %85 : vector<16x256xf32>
    %cst_15 = arith.constant 0.000000e+00 : f32
    %87 = vector.broadcast %cst_15 : f32 to vector<16x256xf32>
    %88 = arith.maximumf %86, %87 : vector<16x256xf32>
    %cst_16 = arith.constant dense<0.000000e+00> : vector<256xf32>
    %89 = vector.multi_reduction <add>, %88, %cst_16 [0] : vector<16x256xf32> to vector<256xf32>
    %90 = vector.shape_cast %89 : vector<256xf32> to vector<1x256xf32>
    %c0_17 = arith.constant 0 : index
    %c0_18 = arith.constant 0 : index
    %91 = vector.load %arg5[%c0_17, %c0_18] : memref<1x256xf32, #tpu.memory_space<vmem>>, vector<1x256xf32>
    %92 = arith.mulf %90, %91 : vector<1x256xf32>
    %cst_19 = arith.constant dense<0.000000e+00> : vector<1xf32>
    %93 = vector.multi_reduction <add>, %92, %cst_19 [1] : vector<1x256xf32> to vector<1xf32>
    %94 = vector.shape_cast %93 : vector<1xf32> to vector<1x1xf32>
    %cst_20 = arith.constant 3.906250e-03 : f32
    %95 = vector.broadcast %cst_20 : f32 to vector<1x1xf32>
    %96 = arith.mulf %94, %95 : vector<1x1xf32>
    %c0_21 = arith.constant 0 : index
    %c0_22 = arith.constant 0 : index
    %97 = vector.load %arg6[%c0_21, %c0_22] : memref<1x1xf32, #tpu.memory_space<vmem>>, vector<1x1xf32>
    %98 = arith.addf %96, %97 : vector<1x1xf32>
    %cst_23 = arith.constant 0.000000e+00 : f32
    %99 = vector.broadcast %cst_23 : f32 to vector<1x1xf32>
    %100 = arith.maximumf %98, %99 : vector<1x1xf32>
    %c0_24 = arith.constant 0 : index
    %c0_25 = arith.constant 0 : index
    %101 = vector.load %arg7[%c0_24, %c0_25] : memref<1x256xf32, #tpu.memory_space<vmem>>, vector<1x256xf32>
    %102 = vector.broadcast %100 : vector<1x1xf32> to vector<1x256xf32>
    %103 = arith.mulf %102, %101 : vector<1x256xf32>
    %cst_26 = arith.constant dense<0.000000e+00> : vector<256xf32>
    %104 = vector.multi_reduction <add>, %103, %cst_26 [0] : vector<1x256xf32> to vector<256xf32>
    %105 = vector.shape_cast %104 : vector<256xf32> to vector<1x256xf32>
    %c0_27 = arith.constant 0 : index
    %c0_28 = arith.constant 0 : index
    %106 = vector.load %arg8[%c0_27, %c0_28] : memref<1x256xf32, #tpu.memory_space<vmem>>, vector<1x256xf32>
    %107 = arith.addf %105, %106 : vector<1x256xf32>
    %108 = arith.negf %107 : vector<1x256xf32>
    %109 = math.exp %108 : vector<1x256xf32>
    %cst_29 = arith.constant 1.000000e+00 : f32
    %110 = vector.broadcast %cst_29 : f32 to vector<1x256xf32>
    %111 = arith.addf %110, %109 : vector<1x256xf32>
    %112 = arith.divf %110, %111 : vector<1x256xf32>
    %113 = vector.broadcast %112 : vector<1x256xf32> to vector<16x256xf32>
    %114 = arith.mulf %88, %113 : vector<16x256xf32>
    %c0_30 = arith.constant 0 : index
    %c0_31 = arith.constant 0 : index
    %115 = vector.load %arg9[%c0_30, %c0_31] : memref<256x256xf32, #tpu.memory_space<vmem>>, vector<256x256xf32>
    %cst_32 = arith.constant dense<0.000000e+00> : vector<16x256xf32>
    %116 = tpu.matmul %1, %115, %cst_32 {dimension_numbers = #tpu.dot_dimension_numbers<[1], [0], [0], [1], [0, 0, 1, 1], [], []>} : vector<16x256xf32>, vector<256x256xf32>, vector<16x256xf32> -> vector<16x256xf32>
    %c0_33 = arith.constant 0 : index
    %c0_34 = arith.constant 0 : index
    %117 = vector.load %arg10[%c0_33, %c0_34] : memref<256x256xf32, #tpu.memory_space<vmem>>, vector<256x256xf32>
    %cst_35 = arith.constant dense<0.000000e+00> : vector<16x256xf32>
    %118 = tpu.matmul %114, %117, %cst_35 {dimension_numbers = #tpu.dot_dimension_numbers<[1], [0], [0], [1], [0, 0, 1, 1], [], []>} : vector<16x256xf32>, vector<256x256xf32>, vector<16x256xf32> -> vector<16x256xf32>
    %119 = arith.addf %116, %118 : vector<16x256xf32>
    %c0_36 = arith.constant 0 : index
    %c0_37 = arith.constant 0 : index
    %c0_38 = arith.constant 0 : index
    %120 = vector.load %arg11[%c0_36, %c0_37, %c0_38] : memref<1x16x256xf32, #tpu.memory_space<vmem>>, vector<1x16x256xf32>
    %121 = vector.shape_cast %120 : vector<1x16x256xf32> to vector<16x256xf32>
    %122 = vector.shape_cast %119 : vector<16x256xf32> to vector<1x16x256xf32>
    tpu.vector_store %arg11[%c0_36, %c0_37, %c0_38], %122 {strides = array<i32>} : memref<1x16x256xf32, #tpu.memory_space<vmem>>, vector<1x16x256xf32>,
    return
  }
  func.func @transform_0(%arg0: i32) -> (i32, i32, i32) {
    %c0_i32 = arith.constant 0 : i32
    %c0_i32_0 = arith.constant 0 : i32
    %c0_i32_1 = arith.constant 0 : i32
    return %arg0, %c0_i32, %c0_i32_0 : i32, i32, i32
  }
  func.func @transform_1(%arg0: i32) -> (i32, i32, i32) {
    %c0_i32 = arith.constant 0 : i32
    %c0_i32_0 = arith.constant 0 : i32
    %c0_i32_1 = arith.constant 0 : i32
    return %arg0, %c0_i32, %c0_i32_0 : i32, i32, i32
  }
  func.func @transform_2(%arg0: i32) -> (i32, i32) {
    %c0_i32 = arith.constant 0 : i32
    %c0_i32_0 = arith.constant 0 : i32
    %c0_i32_1 = arith.constant 0 : i32
    return %c0_i32, %c0_i32_0 : i32, i32
  }
  func.func @transform_3(%arg0: i32) -> (i32, i32) {
    %c0_i32 = arith.constant 0 : i32
    %c0_i32_0 = arith.constant 0 : i32
    %c0_i32_1 = arith.constant 0 : i32
    return %c0_i32, %c0_i32_0 : i32, i32
  }
  func.func @transform_4(%arg0: i32) -> (i32, i32) {
    %c0_i32 = arith.constant 0 : i32
    %c0_i32_0 = arith.constant 0 : i32
    %c0_i32_1 = arith.constant 0 : i32
    return %c0_i32, %c0_i32_0 : i32, i32
  }
  func.func @transform_5(%arg0: i32) -> (i32, i32) {
    %c0_i32 = arith.constant 0 : i32
    %c0_i32_0 = arith.constant 0 : i32
    %c0_i32_1 = arith.constant 0 : i32
    return %c0_i32, %c0_i32_0 : i32, i32
  }
  func.func @transform_6(%arg0: i32) -> (i32, i32) {
    %c0_i32 = arith.constant 0 : i32
    %c0_i32_0 = arith.constant 0 : i32
    %c0_i32_1 = arith.constant 0 : i32
    return %c0_i32, %c0_i32_0 : i32, i32
  }
  func.func @transform_7(%arg0: i32) -> (i32, i32) {
    %c0_i32 = arith.constant 0 : i32
    %c0_i32_0 = arith.constant 0 : i32
    %c0_i32_1 = arith.constant 0 : i32
    return %c0_i32, %c0_i32_0 : i32, i32
  }
  func.func @transform_8(%arg0: i32) -> (i32, i32) {
    %c0_i32 = arith.constant 0 : i32
    %c0_i32_0 = arith.constant 0 : i32
    %c0_i32_1 = arith.constant 0 : i32
    return %c0_i32, %c0_i32_0 : i32, i32
  }
  func.func @transform_9(%arg0: i32) -> (i32, i32) {
    %c0_i32 = arith.constant 0 : i32
    %c0_i32_0 = arith.constant 0 : i32
    %c0_i32_1 = arith.constant 0 : i32
    return %c0_i32, %c0_i32_0 : i32, i32
  }
  func.func @transform_10(%arg0: i32) -> (i32, i32, i32) {
    %c0_i32 = arith.constant 0 : i32
    %c0_i32_0 = arith.constant 0 : i32
    %c0_i32_1 = arith.constant 0 : i32
    return %arg0, %c0_i32, %c0_i32_0 : i32, i32, i32
  }
}

module attributes {stable_mosaic.version = 11 : i64} {
  func.func @_dsconv_kernel(%arg0: i32, %arg1: memref<1x8x512xf32, #tpu.memory_space<vmem>>, %arg2: memref<9x256xf32, #tpu.memory_space<vmem>>, %arg3: memref<1x256xf32, #tpu.memory_space<vmem>>, %arg4: memref<256x256xf32, #tpu.memory_space<vmem>>, %arg5: memref<1x256xf32, #tpu.memory_space<vmem>>, %arg6: memref<1x8x256xf32, #tpu.memory_space<vmem>>, %arg7: memref<1x8x256xf32, #tpu.memory_space<vmem>>) attributes {dimension_semantics = [#tpu.dimension_semantics<parallel>], iteration_bounds = array<i64: 2>, scalar_prefetch = 0 : i64, scratch_operands = 0 : i64, tpu.core_type = #tpu.core_type<tc>, window_params = [{transform_indices = @transform_0, window_bounds = array<i64: 1, 8, 512>}, {pipeline_mode = #tpu.pipeline_mode<synchronous>, transform_indices = @transform_1, window_bounds = array<i64: 9, 256>}, {pipeline_mode = #tpu.pipeline_mode<synchronous>, transform_indices = @transform_2, window_bounds = array<i64: 1, 256>}, {pipeline_mode = #tpu.pipeline_mode<synchronous>, transform_indices = @transform_3, window_bounds = array<i64: 256, 256>}, {pipeline_mode = #tpu.pipeline_mode<synchronous>, transform_indices = @transform_4, window_bounds = array<i64: 1, 256>}, {transform_indices = @transform_5, window_bounds = array<i64: 1, 8, 256>}, {transform_indices = @transform_6, window_bounds = array<i64: 1, 8, 256>}]} {
    %c0 = arith.constant 0 : index
    %c0_0 = arith.constant 0 : index
    %c0_1 = arith.constant 0 : index
    %0 = vector.load %arg1[%c0, %c0_0, %c0_1] : memref<1x8x512xf32, #tpu.memory_space<vmem>>, vector<1x8x512xf32>
    %1 = vector.shape_cast %0 : vector<1x8x512xf32> to vector<8x512xf32>
    %2 = vector.extract_strided_slice %1 {offsets = [0, 0], sizes = [8, 256], strides = [1, 1]} : vector<8x512xf32> to vector<8x256xf32>
    %3 = vector.extract_strided_slice %1 {offsets = [0, 256], sizes = [8, 256], strides = [1, 1]} : vector<8x512xf32> to vector<8x256xf32>
    %cst = arith.constant 0.000000e+00 : f32
    %4 = vector.broadcast %cst : f32 to vector<1x256xf32>
    %5 = vector.extract_strided_slice %3 {offsets = [0, 0], sizes = [7, 256], strides = [1, 1]} : vector<8x256xf32> to vector<7x256xf32>
    %6 = tpu.concatenate %4, %5 in 0 : vector<1x256xf32>, vector<7x256xf32> -> vector<8x256xf32>
    %c0_2 = arith.constant 0 : index
    %c0_3 = arith.constant 0 : index
    %7 = vector.load %arg2[%c0_2, %c0_3] : memref<9x256xf32, #tpu.memory_space<vmem>>, vector<9x256xf32>
    %c0_4 = arith.constant 0 : index
    %c0_5 = arith.constant 0 : index
    %8 = vector.load %arg3[%c0_4, %c0_5] : memref<1x256xf32, #tpu.memory_space<vmem>>, vector<1x256xf32>
    %cst_6 = arith.constant 0.000000e+00 : f32
    %9 = vector.broadcast %cst_6 : f32 to vector<8x16xf32>
    %10 = vector.extract_strided_slice %6 {offsets = [0, 0], sizes = [8, 240], strides = [1, 1]} : vector<8x256xf32> to vector<8x240xf32>
    %11 = tpu.concatenate %9, %10 in 1 : vector<8x16xf32>, vector<8x240xf32> -> vector<8x256xf32>
    %12 = vector.extract_strided_slice %7 {offsets = [0, 0], sizes = [1, 256], strides = [1, 1]} : vector<9x256xf32> to vector<1x256xf32>
    %13 = vector.shape_cast %12 : vector<1x256xf32> to vector<256xf32>
    %14 = vector.shape_cast %13 : vector<256xf32> to vector<1x256xf32>
    %15 = vector.broadcast %14 : vector<1x256xf32> to vector<8x256xf32>
    %16 = arith.mulf %11, %15 : vector<8x256xf32>
    %17 = vector.extract_strided_slice %7 {offsets = [1, 0], sizes = [1, 256], strides = [1, 1]} : vector<9x256xf32> to vector<1x256xf32>
    %18 = vector.shape_cast %17 : vector<1x256xf32> to vector<256xf32>
    %19 = vector.shape_cast %18 : vector<256xf32> to vector<1x256xf32>
    %20 = vector.broadcast %19 : vector<1x256xf32> to vector<8x256xf32>
    %21 = arith.mulf %6, %20 : vector<8x256xf32>
    %22 = arith.addf %16, %21 : vector<8x256xf32>
    %cst_7 = arith.constant 0.000000e+00 : f32
    %23 = vector.broadcast %cst_7 : f32 to vector<8x16xf32>
    %24 = vector.extract_strided_slice %6 {offsets = [0, 16], sizes = [8, 240], strides = [1, 1]} : vector<8x256xf32> to vector<8x240xf32>
    %25 = tpu.concatenate %24, %23 in 1 : vector<8x240xf32>, vector<8x16xf32> -> vector<8x256xf32>
    %26 = vector.extract_strided_slice %7 {offsets = [2, 0], sizes = [1, 256], strides = [1, 1]} : vector<9x256xf32> to vector<1x256xf32>
    %27 = vector.shape_cast %26 : vector<1x256xf32> to vector<256xf32>
    %28 = vector.shape_cast %27 : vector<256xf32> to vector<1x256xf32>
    %29 = vector.broadcast %28 : vector<1x256xf32> to vector<8x256xf32>
    %30 = arith.mulf %25, %29 : vector<8x256xf32>
    %31 = arith.addf %22, %30 : vector<8x256xf32>
    %cst_8 = arith.constant 0.000000e+00 : f32
    %32 = vector.broadcast %cst_8 : f32 to vector<8x16xf32>
    %33 = vector.extract_strided_slice %2 {offsets = [0, 0], sizes = [8, 240], strides = [1, 1]} : vector<8x256xf32> to vector<8x240xf32>
    %34 = tpu.concatenate %32, %33 in 1 : vector<8x16xf32>, vector<8x240xf32> -> vector<8x256xf32>
    %35 = vector.extract_strided_slice %7 {offsets = [3, 0], sizes = [1, 256], strides = [1, 1]} : vector<9x256xf32> to vector<1x256xf32>
    %36 = vector.shape_cast %35 : vector<1x256xf32> to vector<256xf32>
    %37 = vector.shape_cast %36 : vector<256xf32> to vector<1x256xf32>
    %38 = vector.broadcast %37 : vector<1x256xf32> to vector<8x256xf32>
    %39 = arith.mulf %34, %38 : vector<8x256xf32>
    %40 = arith.addf %31, %39 : vector<8x256xf32>
    %41 = vector.extract_strided_slice %7 {offsets = [4, 0], sizes = [1, 256], strides = [1, 1]} : vector<9x256xf32> to vector<1x256xf32>
    %42 = vector.shape_cast %41 : vector<1x256xf32> to vector<256xf32>
    %43 = vector.shape_cast %42 : vector<256xf32> to vector<1x256xf32>
    %44 = vector.broadcast %43 : vector<1x256xf32> to vector<8x256xf32>
    %45 = arith.mulf %2, %44 : vector<8x256xf32>
    %46 = arith.addf %40, %45 : vector<8x256xf32>
    %cst_9 = arith.constant 0.000000e+00 : f32
    %47 = vector.broadcast %cst_9 : f32 to vector<8x16xf32>
    %48 = vector.extract_strided_slice %2 {offsets = [0, 16], sizes = [8, 240], strides = [1, 1]} : vector<8x256xf32> to vector<8x240xf32>
    %49 = tpu.concatenate %48, %47 in 1 : vector<8x240xf32>, vector<8x16xf32> -> vector<8x256xf32>
    %50 = vector.extract_strided_slice %7 {offsets = [5, 0], sizes = [1, 256], strides = [1, 1]} : vector<9x256xf32> to vector<1x256xf32>
    %51 = vector.shape_cast %50 : vector<1x256xf32> to vector<256xf32>
    %52 = vector.shape_cast %51 : vector<256xf32> to vector<1x256xf32>
    %53 = vector.broadcast %52 : vector<1x256xf32> to vector<8x256xf32>
    %54 = arith.mulf %49, %53 : vector<8x256xf32>
    %55 = arith.addf %46, %54 : vector<8x256xf32>
    %cst_10 = arith.constant 0.000000e+00 : f32
    %56 = vector.broadcast %cst_10 : f32 to vector<8x16xf32>
    %57 = vector.extract_strided_slice %3 {offsets = [0, 0], sizes = [8, 240], strides = [1, 1]} : vector<8x256xf32> to vector<8x240xf32>
    %58 = tpu.concatenate %56, %57 in 1 : vector<8x16xf32>, vector<8x240xf32> -> vector<8x256xf32>
    %59 = vector.extract_strided_slice %7 {offsets = [6, 0], sizes = [1, 256], strides = [1, 1]} : vector<9x256xf32> to vector<1x256xf32>
    %60 = vector.shape_cast %59 : vector<1x256xf32> to vector<256xf32>
    %61 = vector.shape_cast %60 : vector<256xf32> to vector<1x256xf32>
    %62 = vector.broadcast %61 : vector<1x256xf32> to vector<8x256xf32>
    %63 = arith.mulf %58, %62 : vector<8x256xf32>
    %64 = arith.addf %55, %63 : vector<8x256xf32>
    %65 = vector.extract_strided_slice %7 {offsets = [7, 0], sizes = [1, 256], strides = [1, 1]} : vector<9x256xf32> to vector<1x256xf32>
    %66 = vector.shape_cast %65 : vector<1x256xf32> to vector<256xf32>
    %67 = vector.shape_cast %66 : vector<256xf32> to vector<1x256xf32>
    %68 = vector.broadcast %67 : vector<1x256xf32> to vector<8x256xf32>
    %69 = arith.mulf %3, %68 : vector<8x256xf32>
    %70 = arith.addf %64, %69 : vector<8x256xf32>
    %cst_11 = arith.constant 0.000000e+00 : f32
    %71 = vector.broadcast %cst_11 : f32 to vector<8x16xf32>
    %72 = vector.extract_strided_slice %3 {offsets = [0, 16], sizes = [8, 240], strides = [1, 1]} : vector<8x256xf32> to vector<8x240xf32>
    %73 = tpu.concatenate %72, %71 in 1 : vector<8x240xf32>, vector<8x16xf32> -> vector<8x256xf32>
    %74 = vector.extract_strided_slice %7 {offsets = [8, 0], sizes = [1, 256], strides = [1, 1]} : vector<9x256xf32> to vector<1x256xf32>
    %75 = vector.shape_cast %74 : vector<1x256xf32> to vector<256xf32>
    %76 = vector.shape_cast %75 : vector<256xf32> to vector<1x256xf32>
    %77 = vector.broadcast %76 : vector<1x256xf32> to vector<8x256xf32>
    %78 = arith.mulf %73, %77 : vector<8x256xf32>
    %79 = arith.addf %70, %78 : vector<8x256xf32>
    %80 = vector.shape_cast %8 : vector<1x256xf32> to vector<256xf32>
    %81 = vector.shape_cast %80 : vector<256xf32> to vector<1x256xf32>
    %82 = vector.broadcast %81 : vector<1x256xf32> to vector<8x256xf32>
    %83 = arith.addf %79, %82 : vector<8x256xf32>
    %cst_12 = arith.constant 0.000000e+00 : f32
    %84 = vector.broadcast %cst_12 : f32 to vector<8x256xf32>
    %85 = arith.maximumf %83, %84 : vector<8x256xf32>
    %c0_13 = arith.constant 0 : index
    %c0_14 = arith.constant 0 : index
    %86 = vector.load %arg4[%c0_13, %c0_14] : memref<256x256xf32, #tpu.memory_space<vmem>>, vector<256x256xf32>
    %cst_15 = arith.constant dense<0.000000e+00> : vector<8x256xf32>
    %87 = tpu.matmul %85, %86, %cst_15 {dimension_numbers = #tpu.dot_dimension_numbers<[1], [0], [0], [1], [0, 0, 1, 1], [], []>} : vector<8x256xf32>, vector<256x256xf32>, vector<8x256xf32> -> vector<8x256xf32>
    %c0_16 = arith.constant 0 : index
    %c0_17 = arith.constant 0 : index
    %88 = vector.load %arg5[%c0_16, %c0_17] : memref<1x256xf32, #tpu.memory_space<vmem>>, vector<1x256xf32>
    %89 = vector.broadcast %88 : vector<1x256xf32> to vector<8x256xf32>
    %90 = arith.addf %87, %89 : vector<8x256xf32>
    %cst_18 = arith.constant 0.000000e+00 : f32
    %91 = vector.broadcast %cst_18 : f32 to vector<8x256xf32>
    %92 = arith.maximumf %90, %91 : vector<8x256xf32>
    %c0_19 = arith.constant 0 : index
    %c0_20 = arith.constant 0 : index
    %c0_21 = arith.constant 0 : index
    %93 = vector.load %arg6[%c0_19, %c0_20, %c0_21] : memref<1x8x256xf32, #tpu.memory_space<vmem>>, vector<1x8x256xf32>
    %94 = vector.shape_cast %93 : vector<1x8x256xf32> to vector<8x256xf32>
    %95 = arith.addf %92, %94 : vector<8x256xf32>
    %c0_22 = arith.constant 0 : index
    %c0_23 = arith.constant 0 : index
    %c0_24 = arith.constant 0 : index
    %96 = vector.load %arg7[%c0_22, %c0_23, %c0_24] : memref<1x8x256xf32, #tpu.memory_space<vmem>>, vector<1x8x256xf32>
    %97 = vector.shape_cast %96 : vector<1x8x256xf32> to vector<8x256xf32>
    %98 = vector.shape_cast %95 : vector<8x256xf32> to vector<1x8x256xf32>
    tpu.vector_store %arg7[%c0_22, %c0_23, %c0_24], %98 {strides = array<i32>} : memref<1x8x256xf32, #tpu.memory_space<vmem>>, vector<1x8x256xf32>,
    return
  }
  func.func @transform_0(%arg0: i32) -> (i32, i32, i32) {
    %c0_i32 = arith.constant 0 : i32
    %c0_i32_0 = arith.constant 0 : i32
    %c0_i32_1 = arith.constant 0 : i32
    return %arg0, %c0_i32, %c0_i32_0 : i32, i32, i32
  }
  func.func @transform_1(%arg0: i32) -> (i32, i32) {
    %c0_i32 = arith.constant 0 : i32
    %c0_i32_0 = arith.constant 0 : i32
    %c0_i32_1 = arith.constant 0 : i32
    return %c0_i32, %c0_i32_0 : i32, i32
  }
  func.func @transform_2(%arg0: i32) -> (i32, i32) {
    %c0_i32 = arith.constant 0 : i32
    %c0_i32_0 = arith.constant 0 : i32
    %c0_i32_1 = arith.constant 0 : i32
    return %c0_i32, %c0_i32_0 : i32, i32
  }
  func.func @transform_3(%arg0: i32) -> (i32, i32) {
    %c0_i32 = arith.constant 0 : i32
    %c0_i32_0 = arith.constant 0 : i32
    %c0_i32_1 = arith.constant 0 : i32
    return %c0_i32, %c0_i32_0 : i32, i32
  }
  func.func @transform_4(%arg0: i32) -> (i32, i32) {
    %c0_i32 = arith.constant 0 : i32
    %c0_i32_0 = arith.constant 0 : i32
    %c0_i32_1 = arith.constant 0 : i32
    return %c0_i32, %c0_i32_0 : i32, i32
  }
  func.func @transform_5(%arg0: i32) -> (i32, i32, i32) {
    %c0_i32 = arith.constant 0 : i32
    %c0_i32_0 = arith.constant 0 : i32
    %c0_i32_1 = arith.constant 0 : i32
    return %arg0, %c0_i32, %c0_i32_0 : i32, i32, i32
  }
  func.func @transform_6(%arg0: i32) -> (i32, i32, i32) {
    %c0_i32 = arith.constant 0 : i32
    %c0_i32_0 = arith.constant 0 : i32
    %c0_i32_1 = arith.constant 0 : i32
    return %arg0, %c0_i32, %c0_i32_0 : i32, i32, i32
  }
}

module attributes {stable_mosaic.version = 11 : i64} {
  func.func @_dsconv_kernel(%arg0: i32, %arg1: memref<1x8x512xf32, #tpu.memory_space<vmem>>, %arg2: memref<9x256xf32, #tpu.memory_space<vmem>>, %arg3: memref<1x256xf32, #tpu.memory_space<vmem>>, %arg4: memref<256x128xf32, #tpu.memory_space<vmem>>, %arg5: memref<1x128xf32, #tpu.memory_space<vmem>>, %arg6: memref<1x8x128xf32, #tpu.memory_space<vmem>>) attributes {dimension_semantics = [#tpu.dimension_semantics<parallel>], iteration_bounds = array<i64: 2>, scalar_prefetch = 0 : i64, scratch_operands = 0 : i64, tpu.core_type = #tpu.core_type<tc>, window_params = [{transform_indices = @transform_0, window_bounds = array<i64: 1, 8, 512>}, {pipeline_mode = #tpu.pipeline_mode<synchronous>, transform_indices = @transform_1, window_bounds = array<i64: 9, 256>}, {pipeline_mode = #tpu.pipeline_mode<synchronous>, transform_indices = @transform_2, window_bounds = array<i64: 1, 256>}, {pipeline_mode = #tpu.pipeline_mode<synchronous>, transform_indices = @transform_3, window_bounds = array<i64: 256, 128>}, {pipeline_mode = #tpu.pipeline_mode<synchronous>, transform_indices = @transform_4, window_bounds = array<i64: 1, 128>}, {transform_indices = @transform_5, window_bounds = array<i64: 1, 8, 128>}]} {
    %c0 = arith.constant 0 : index
    %c0_0 = arith.constant 0 : index
    %c0_1 = arith.constant 0 : index
    %0 = vector.load %arg1[%c0, %c0_0, %c0_1] : memref<1x8x512xf32, #tpu.memory_space<vmem>>, vector<1x8x512xf32>
    %1 = vector.shape_cast %0 : vector<1x8x512xf32> to vector<8x512xf32>
    %2 = vector.extract_strided_slice %1 {offsets = [0, 0], sizes = [8, 256], strides = [1, 1]} : vector<8x512xf32> to vector<8x256xf32>
    %3 = vector.extract_strided_slice %1 {offsets = [0, 256], sizes = [8, 256], strides = [1, 1]} : vector<8x512xf32> to vector<8x256xf32>
    %cst = arith.constant 0.000000e+00 : f32
    %4 = vector.broadcast %cst : f32 to vector<1x256xf32>
    %5 = vector.extract_strided_slice %3 {offsets = [0, 0], sizes = [7, 256], strides = [1, 1]} : vector<8x256xf32> to vector<7x256xf32>
    %6 = tpu.concatenate %4, %5 in 0 : vector<1x256xf32>, vector<7x256xf32> -> vector<8x256xf32>
    %c0_2 = arith.constant 0 : index
    %c0_3 = arith.constant 0 : index
    %7 = vector.load %arg2[%c0_2, %c0_3] : memref<9x256xf32, #tpu.memory_space<vmem>>, vector<9x256xf32>
    %c0_4 = arith.constant 0 : index
    %c0_5 = arith.constant 0 : index
    %8 = vector.load %arg3[%c0_4, %c0_5] : memref<1x256xf32, #tpu.memory_space<vmem>>, vector<1x256xf32>
    %cst_6 = arith.constant 0.000000e+00 : f32
    %9 = vector.broadcast %cst_6 : f32 to vector<8x16xf32>
    %10 = vector.extract_strided_slice %6 {offsets = [0, 0], sizes = [8, 240], strides = [1, 1]} : vector<8x256xf32> to vector<8x240xf32>
    %11 = tpu.concatenate %9, %10 in 1 : vector<8x16xf32>, vector<8x240xf32> -> vector<8x256xf32>
    %12 = vector.extract_strided_slice %7 {offsets = [0, 0], sizes = [1, 256], strides = [1, 1]} : vector<9x256xf32> to vector<1x256xf32>
    %13 = vector.shape_cast %12 : vector<1x256xf32> to vector<256xf32>
    %14 = vector.shape_cast %13 : vector<256xf32> to vector<1x256xf32>
    %15 = vector.broadcast %14 : vector<1x256xf32> to vector<8x256xf32>
    %16 = arith.mulf %11, %15 : vector<8x256xf32>
    %17 = vector.extract_strided_slice %7 {offsets = [1, 0], sizes = [1, 256], strides = [1, 1]} : vector<9x256xf32> to vector<1x256xf32>
    %18 = vector.shape_cast %17 : vector<1x256xf32> to vector<256xf32>
    %19 = vector.shape_cast %18 : vector<256xf32> to vector<1x256xf32>
    %20 = vector.broadcast %19 : vector<1x256xf32> to vector<8x256xf32>
    %21 = arith.mulf %6, %20 : vector<8x256xf32>
    %22 = arith.addf %16, %21 : vector<8x256xf32>
    %cst_7 = arith.constant 0.000000e+00 : f32
    %23 = vector.broadcast %cst_7 : f32 to vector<8x16xf32>
    %24 = vector.extract_strided_slice %6 {offsets = [0, 16], sizes = [8, 240], strides = [1, 1]} : vector<8x256xf32> to vector<8x240xf32>
    %25 = tpu.concatenate %24, %23 in 1 : vector<8x240xf32>, vector<8x16xf32> -> vector<8x256xf32>
    %26 = vector.extract_strided_slice %7 {offsets = [2, 0], sizes = [1, 256], strides = [1, 1]} : vector<9x256xf32> to vector<1x256xf32>
    %27 = vector.shape_cast %26 : vector<1x256xf32> to vector<256xf32>
    %28 = vector.shape_cast %27 : vector<256xf32> to vector<1x256xf32>
    %29 = vector.broadcast %28 : vector<1x256xf32> to vector<8x256xf32>
    %30 = arith.mulf %25, %29 : vector<8x256xf32>
    %31 = arith.addf %22, %30 : vector<8x256xf32>
    %cst_8 = arith.constant 0.000000e+00 : f32
    %32 = vector.broadcast %cst_8 : f32 to vector<8x16xf32>
    %33 = vector.extract_strided_slice %2 {offsets = [0, 0], sizes = [8, 240], strides = [1, 1]} : vector<8x256xf32> to vector<8x240xf32>
    %34 = tpu.concatenate %32, %33 in 1 : vector<8x16xf32>, vector<8x240xf32> -> vector<8x256xf32>
    %35 = vector.extract_strided_slice %7 {offsets = [3, 0], sizes = [1, 256], strides = [1, 1]} : vector<9x256xf32> to vector<1x256xf32>
    %36 = vector.shape_cast %35 : vector<1x256xf32> to vector<256xf32>
    %37 = vector.shape_cast %36 : vector<256xf32> to vector<1x256xf32>
    %38 = vector.broadcast %37 : vector<1x256xf32> to vector<8x256xf32>
    %39 = arith.mulf %34, %38 : vector<8x256xf32>
    %40 = arith.addf %31, %39 : vector<8x256xf32>
    %41 = vector.extract_strided_slice %7 {offsets = [4, 0], sizes = [1, 256], strides = [1, 1]} : vector<9x256xf32> to vector<1x256xf32>
    %42 = vector.shape_cast %41 : vector<1x256xf32> to vector<256xf32>
    %43 = vector.shape_cast %42 : vector<256xf32> to vector<1x256xf32>
    %44 = vector.broadcast %43 : vector<1x256xf32> to vector<8x256xf32>
    %45 = arith.mulf %2, %44 : vector<8x256xf32>
    %46 = arith.addf %40, %45 : vector<8x256xf32>
    %cst_9 = arith.constant 0.000000e+00 : f32
    %47 = vector.broadcast %cst_9 : f32 to vector<8x16xf32>
    %48 = vector.extract_strided_slice %2 {offsets = [0, 16], sizes = [8, 240], strides = [1, 1]} : vector<8x256xf32> to vector<8x240xf32>
    %49 = tpu.concatenate %48, %47 in 1 : vector<8x240xf32>, vector<8x16xf32> -> vector<8x256xf32>
    %50 = vector.extract_strided_slice %7 {offsets = [5, 0], sizes = [1, 256], strides = [1, 1]} : vector<9x256xf32> to vector<1x256xf32>
    %51 = vector.shape_cast %50 : vector<1x256xf32> to vector<256xf32>
    %52 = vector.shape_cast %51 : vector<256xf32> to vector<1x256xf32>
    %53 = vector.broadcast %52 : vector<1x256xf32> to vector<8x256xf32>
    %54 = arith.mulf %49, %53 : vector<8x256xf32>
    %55 = arith.addf %46, %54 : vector<8x256xf32>
    %cst_10 = arith.constant 0.000000e+00 : f32
    %56 = vector.broadcast %cst_10 : f32 to vector<8x16xf32>
    %57 = vector.extract_strided_slice %3 {offsets = [0, 0], sizes = [8, 240], strides = [1, 1]} : vector<8x256xf32> to vector<8x240xf32>
    %58 = tpu.concatenate %56, %57 in 1 : vector<8x16xf32>, vector<8x240xf32> -> vector<8x256xf32>
    %59 = vector.extract_strided_slice %7 {offsets = [6, 0], sizes = [1, 256], strides = [1, 1]} : vector<9x256xf32> to vector<1x256xf32>
    %60 = vector.shape_cast %59 : vector<1x256xf32> to vector<256xf32>
    %61 = vector.shape_cast %60 : vector<256xf32> to vector<1x256xf32>
    %62 = vector.broadcast %61 : vector<1x256xf32> to vector<8x256xf32>
    %63 = arith.mulf %58, %62 : vector<8x256xf32>
    %64 = arith.addf %55, %63 : vector<8x256xf32>
    %65 = vector.extract_strided_slice %7 {offsets = [7, 0], sizes = [1, 256], strides = [1, 1]} : vector<9x256xf32> to vector<1x256xf32>
    %66 = vector.shape_cast %65 : vector<1x256xf32> to vector<256xf32>
    %67 = vector.shape_cast %66 : vector<256xf32> to vector<1x256xf32>
    %68 = vector.broadcast %67 : vector<1x256xf32> to vector<8x256xf32>
    %69 = arith.mulf %3, %68 : vector<8x256xf32>
    %70 = arith.addf %64, %69 : vector<8x256xf32>
    %cst_11 = arith.constant 0.000000e+00 : f32
    %71 = vector.broadcast %cst_11 : f32 to vector<8x16xf32>
    %72 = vector.extract_strided_slice %3 {offsets = [0, 16], sizes = [8, 240], strides = [1, 1]} : vector<8x256xf32> to vector<8x240xf32>
    %73 = tpu.concatenate %72, %71 in 1 : vector<8x240xf32>, vector<8x16xf32> -> vector<8x256xf32>
    %74 = vector.extract_strided_slice %7 {offsets = [8, 0], sizes = [1, 256], strides = [1, 1]} : vector<9x256xf32> to vector<1x256xf32>
    %75 = vector.shape_cast %74 : vector<1x256xf32> to vector<256xf32>
    %76 = vector.shape_cast %75 : vector<256xf32> to vector<1x256xf32>
    %77 = vector.broadcast %76 : vector<1x256xf32> to vector<8x256xf32>
    %78 = arith.mulf %73, %77 : vector<8x256xf32>
    %79 = arith.addf %70, %78 : vector<8x256xf32>
    %80 = vector.shape_cast %8 : vector<1x256xf32> to vector<256xf32>
    %81 = vector.shape_cast %80 : vector<256xf32> to vector<1x256xf32>
    %82 = vector.broadcast %81 : vector<1x256xf32> to vector<8x256xf32>
    %83 = arith.addf %79, %82 : vector<8x256xf32>
    %cst_12 = arith.constant 0.000000e+00 : f32
    %84 = vector.broadcast %cst_12 : f32 to vector<8x256xf32>
    %85 = arith.maximumf %83, %84 : vector<8x256xf32>
    %c0_13 = arith.constant 0 : index
    %c0_14 = arith.constant 0 : index
    %86 = vector.load %arg4[%c0_13, %c0_14] : memref<256x128xf32, #tpu.memory_space<vmem>>, vector<256x128xf32>
    %cst_15 = arith.constant dense<0.000000e+00> : vector<8x128xf32>
    %87 = tpu.matmul %85, %86, %cst_15 {dimension_numbers = #tpu.dot_dimension_numbers<[1], [0], [0], [1], [0, 0, 1, 1], [], []>} : vector<8x256xf32>, vector<256x128xf32>, vector<8x128xf32> -> vector<8x128xf32>
    %c0_16 = arith.constant 0 : index
    %c0_17 = arith.constant 0 : index
    %88 = vector.load %arg5[%c0_16, %c0_17] : memref<1x128xf32, #tpu.memory_space<vmem>>, vector<1x128xf32>
    %89 = vector.broadcast %88 : vector<1x128xf32> to vector<8x128xf32>
    %90 = arith.addf %87, %89 : vector<8x128xf32>
    %cst_18 = arith.constant 0.000000e+00 : f32
    %91 = vector.broadcast %cst_18 : f32 to vector<8x128xf32>
    %92 = arith.maximumf %90, %91 : vector<8x128xf32>
    %c0_19 = arith.constant 0 : index
    %c0_20 = arith.constant 0 : index
    %c0_21 = arith.constant 0 : index
    %93 = vector.load %arg6[%c0_19, %c0_20, %c0_21] : memref<1x8x128xf32, #tpu.memory_space<vmem>>, vector<1x8x128xf32>
    %94 = vector.shape_cast %93 : vector<1x8x128xf32> to vector<8x128xf32>
    %95 = vector.shape_cast %92 : vector<8x128xf32> to vector<1x8x128xf32>
    tpu.vector_store %arg6[%c0_19, %c0_20, %c0_21], %95 {strides = array<i32>} : memref<1x8x128xf32, #tpu.memory_space<vmem>>, vector<1x8x128xf32>,
    return
  }
  func.func @transform_0(%arg0: i32) -> (i32, i32, i32) {
    %c0_i32 = arith.constant 0 : i32
    %c0_i32_0 = arith.constant 0 : i32
    %c0_i32_1 = arith.constant 0 : i32
    return %arg0, %c0_i32, %c0_i32_0 : i32, i32, i32
  }
  func.func @transform_1(%arg0: i32) -> (i32, i32) {
    %c0_i32 = arith.constant 0 : i32
    %c0_i32_0 = arith.constant 0 : i32
    %c0_i32_1 = arith.constant 0 : i32
    return %c0_i32, %c0_i32_0 : i32, i32
  }
  func.func @transform_2(%arg0: i32) -> (i32, i32) {
    %c0_i32 = arith.constant 0 : i32
    %c0_i32_0 = arith.constant 0 : i32
    %c0_i32_1 = arith.constant 0 : i32
    return %c0_i32, %c0_i32_0 : i32, i32
  }
  func.func @transform_3(%arg0: i32) -> (i32, i32) {
    %c0_i32 = arith.constant 0 : i32
    %c0_i32_0 = arith.constant 0 : i32
    %c0_i32_1 = arith.constant 0 : i32
    return %c0_i32, %c0_i32_0 : i32, i32
  }
  func.func @transform_4(%arg0: i32) -> (i32, i32) {
    %c0_i32 = arith.constant 0 : i32
    %c0_i32_0 = arith.constant 0 : i32
    %c0_i32_1 = arith.constant 0 : i32
    return %c0_i32, %c0_i32_0 : i32, i32
  }
  func.func @transform_5(%arg0: i32) -> (i32, i32, i32) {
    %c0_i32 = arith.constant 0 : i32
    %c0_i32_0 = arith.constant 0 : i32
    %c0_i32_1 = arith.constant 0 : i32
    return %arg0, %c0_i32, %c0_i32_0 : i32, i32, i32
  }
}

module attributes {stable_mosaic.version = 11 : i64} {
  func.func @_dsconv_kernel(%arg0: i32, %arg1: memref<1x4x256xf32, #tpu.memory_space<vmem>>, %arg2: memref<9x128xf32, #tpu.memory_space<vmem>>, %arg3: memref<1x128xf32, #tpu.memory_space<vmem>>, %arg4: memref<128x256xf32, #tpu.memory_space<vmem>>, %arg5: memref<1x256xf32, #tpu.memory_space<vmem>>, %arg6: memref<1x4x256xf32, #tpu.memory_space<vmem>>, %arg7: memref<1x4x256xf32, #tpu.memory_space<vmem>>) attributes {dimension_semantics = [#tpu.dimension_semantics<parallel>], iteration_bounds = array<i64: 2>, scalar_prefetch = 0 : i64, scratch_operands = 0 : i64, tpu.core_type = #tpu.core_type<tc>, window_params = [{transform_indices = @transform_0, window_bounds = array<i64: 1, 4, 256>}, {pipeline_mode = #tpu.pipeline_mode<synchronous>, transform_indices = @transform_1, window_bounds = array<i64: 9, 128>}, {pipeline_mode = #tpu.pipeline_mode<synchronous>, transform_indices = @transform_2, window_bounds = array<i64: 1, 128>}, {pipeline_mode = #tpu.pipeline_mode<synchronous>, transform_indices = @transform_3, window_bounds = array<i64: 128, 256>}, {pipeline_mode = #tpu.pipeline_mode<synchronous>, transform_indices = @transform_4, window_bounds = array<i64: 1, 256>}, {transform_indices = @transform_5, window_bounds = array<i64: 1, 4, 256>}, {transform_indices = @transform_6, window_bounds = array<i64: 1, 4, 256>}]} {
    %c0 = arith.constant 0 : index
    %c0_0 = arith.constant 0 : index
    %c0_1 = arith.constant 0 : index
    %0 = vector.load %arg1[%c0, %c0_0, %c0_1] : memref<1x4x256xf32, #tpu.memory_space<vmem>>, vector<1x4x256xf32>
    %1 = vector.shape_cast %0 : vector<1x4x256xf32> to vector<4x256xf32>
    %2 = vector.extract_strided_slice %1 {offsets = [0, 0], sizes = [4, 128], strides = [1, 1]} : vector<4x256xf32> to vector<4x128xf32>
    %3 = vector.extract_strided_slice %1 {offsets = [0, 128], sizes = [4, 128], strides = [1, 1]} : vector<4x256xf32> to vector<4x128xf32>
    %cst = arith.constant 0.000000e+00 : f32
    %4 = vector.broadcast %cst : f32 to vector<1x128xf32>
    %5 = vector.extract_strided_slice %3 {offsets = [0, 0], sizes = [3, 128], strides = [1, 1]} : vector<4x128xf32> to vector<3x128xf32>
    %6 = tpu.concatenate %4, %5 in 0 : vector<1x128xf32>, vector<3x128xf32> -> vector<4x128xf32>
    %c0_2 = arith.constant 0 : index
    %c0_3 = arith.constant 0 : index
    %7 = vector.load %arg2[%c0_2, %c0_3] : memref<9x128xf32, #tpu.memory_space<vmem>>, vector<9x128xf32>
    %c0_4 = arith.constant 0 : index
    %c0_5 = arith.constant 0 : index
    %8 = vector.load %arg3[%c0_4, %c0_5] : memref<1x128xf32, #tpu.memory_space<vmem>>, vector<1x128xf32>
    %cst_6 = arith.constant 0.000000e+00 : f32
    %9 = vector.broadcast %cst_6 : f32 to vector<4x16xf32>
    %10 = vector.extract_strided_slice %6 {offsets = [0, 0], sizes = [4, 112], strides = [1, 1]} : vector<4x128xf32> to vector<4x112xf32>
    %11 = tpu.concatenate %9, %10 in 1 : vector<4x16xf32>, vector<4x112xf32> -> vector<4x128xf32>
    %12 = vector.extract_strided_slice %7 {offsets = [0, 0], sizes = [1, 128], strides = [1, 1]} : vector<9x128xf32> to vector<1x128xf32>
    %13 = vector.shape_cast %12 : vector<1x128xf32> to vector<128xf32>
    %14 = vector.shape_cast %13 : vector<128xf32> to vector<1x128xf32>
    %15 = vector.broadcast %14 : vector<1x128xf32> to vector<4x128xf32>
    %16 = arith.mulf %11, %15 : vector<4x128xf32>
    %17 = vector.extract_strided_slice %7 {offsets = [1, 0], sizes = [1, 128], strides = [1, 1]} : vector<9x128xf32> to vector<1x128xf32>
    %18 = vector.shape_cast %17 : vector<1x128xf32> to vector<128xf32>
    %19 = vector.shape_cast %18 : vector<128xf32> to vector<1x128xf32>
    %20 = vector.broadcast %19 : vector<1x128xf32> to vector<4x128xf32>
    %21 = arith.mulf %6, %20 : vector<4x128xf32>
    %22 = arith.addf %16, %21 : vector<4x128xf32>
    %cst_7 = arith.constant 0.000000e+00 : f32
    %23 = vector.broadcast %cst_7 : f32 to vector<4x16xf32>
    %24 = vector.extract_strided_slice %6 {offsets = [0, 16], sizes = [4, 112], strides = [1, 1]} : vector<4x128xf32> to vector<4x112xf32>
    %25 = tpu.concatenate %24, %23 in 1 : vector<4x112xf32>, vector<4x16xf32> -> vector<4x128xf32>
    %26 = vector.extract_strided_slice %7 {offsets = [2, 0], sizes = [1, 128], strides = [1, 1]} : vector<9x128xf32> to vector<1x128xf32>
    %27 = vector.shape_cast %26 : vector<1x128xf32> to vector<128xf32>
    %28 = vector.shape_cast %27 : vector<128xf32> to vector<1x128xf32>
    %29 = vector.broadcast %28 : vector<1x128xf32> to vector<4x128xf32>
    %30 = arith.mulf %25, %29 : vector<4x128xf32>
    %31 = arith.addf %22, %30 : vector<4x128xf32>
    %cst_8 = arith.constant 0.000000e+00 : f32
    %32 = vector.broadcast %cst_8 : f32 to vector<4x16xf32>
    %33 = vector.extract_strided_slice %2 {offsets = [0, 0], sizes = [4, 112], strides = [1, 1]} : vector<4x128xf32> to vector<4x112xf32>
    %34 = tpu.concatenate %32, %33 in 1 : vector<4x16xf32>, vector<4x112xf32> -> vector<4x128xf32>
    %35 = vector.extract_strided_slice %7 {offsets = [3, 0], sizes = [1, 128], strides = [1, 1]} : vector<9x128xf32> to vector<1x128xf32>
    %36 = vector.shape_cast %35 : vector<1x128xf32> to vector<128xf32>
    %37 = vector.shape_cast %36 : vector<128xf32> to vector<1x128xf32>
    %38 = vector.broadcast %37 : vector<1x128xf32> to vector<4x128xf32>
    %39 = arith.mulf %34, %38 : vector<4x128xf32>
    %40 = arith.addf %31, %39 : vector<4x128xf32>
    %41 = vector.extract_strided_slice %7 {offsets = [4, 0], sizes = [1, 128], strides = [1, 1]} : vector<9x128xf32> to vector<1x128xf32>
    %42 = vector.shape_cast %41 : vector<1x128xf32> to vector<128xf32>
    %43 = vector.shape_cast %42 : vector<128xf32> to vector<1x128xf32>
    %44 = vector.broadcast %43 : vector<1x128xf32> to vector<4x128xf32>
    %45 = arith.mulf %2, %44 : vector<4x128xf32>
    %46 = arith.addf %40, %45 : vector<4x128xf32>
    %cst_9 = arith.constant 0.000000e+00 : f32
    %47 = vector.broadcast %cst_9 : f32 to vector<4x16xf32>
    %48 = vector.extract_strided_slice %2 {offsets = [0, 16], sizes = [4, 112], strides = [1, 1]} : vector<4x128xf32> to vector<4x112xf32>
    %49 = tpu.concatenate %48, %47 in 1 : vector<4x112xf32>, vector<4x16xf32> -> vector<4x128xf32>
    %50 = vector.extract_strided_slice %7 {offsets = [5, 0], sizes = [1, 128], strides = [1, 1]} : vector<9x128xf32> to vector<1x128xf32>
    %51 = vector.shape_cast %50 : vector<1x128xf32> to vector<128xf32>
    %52 = vector.shape_cast %51 : vector<128xf32> to vector<1x128xf32>
    %53 = vector.broadcast %52 : vector<1x128xf32> to vector<4x128xf32>
    %54 = arith.mulf %49, %53 : vector<4x128xf32>
    %55 = arith.addf %46, %54 : vector<4x128xf32>
    %cst_10 = arith.constant 0.000000e+00 : f32
    %56 = vector.broadcast %cst_10 : f32 to vector<4x16xf32>
    %57 = vector.extract_strided_slice %3 {offsets = [0, 0], sizes = [4, 112], strides = [1, 1]} : vector<4x128xf32> to vector<4x112xf32>
    %58 = tpu.concatenate %56, %57 in 1 : vector<4x16xf32>, vector<4x112xf32> -> vector<4x128xf32>
    %59 = vector.extract_strided_slice %7 {offsets = [6, 0], sizes = [1, 128], strides = [1, 1]} : vector<9x128xf32> to vector<1x128xf32>
    %60 = vector.shape_cast %59 : vector<1x128xf32> to vector<128xf32>
    %61 = vector.shape_cast %60 : vector<128xf32> to vector<1x128xf32>
    %62 = vector.broadcast %61 : vector<1x128xf32> to vector<4x128xf32>
    %63 = arith.mulf %58, %62 : vector<4x128xf32>
    %64 = arith.addf %55, %63 : vector<4x128xf32>
    %65 = vector.extract_strided_slice %7 {offsets = [7, 0], sizes = [1, 128], strides = [1, 1]} : vector<9x128xf32> to vector<1x128xf32>
    %66 = vector.shape_cast %65 : vector<1x128xf32> to vector<128xf32>
    %67 = vector.shape_cast %66 : vector<128xf32> to vector<1x128xf32>
    %68 = vector.broadcast %67 : vector<1x128xf32> to vector<4x128xf32>
    %69 = arith.mulf %3, %68 : vector<4x128xf32>
    %70 = arith.addf %64, %69 : vector<4x128xf32>
    %cst_11 = arith.constant 0.000000e+00 : f32
    %71 = vector.broadcast %cst_11 : f32 to vector<4x16xf32>
    %72 = vector.extract_strided_slice %3 {offsets = [0, 16], sizes = [4, 112], strides = [1, 1]} : vector<4x128xf32> to vector<4x112xf32>
    %73 = tpu.concatenate %72, %71 in 1 : vector<4x112xf32>, vector<4x16xf32> -> vector<4x128xf32>
    %74 = vector.extract_strided_slice %7 {offsets = [8, 0], sizes = [1, 128], strides = [1, 1]} : vector<9x128xf32> to vector<1x128xf32>
    %75 = vector.shape_cast %74 : vector<1x128xf32> to vector<128xf32>
    %76 = vector.shape_cast %75 : vector<128xf32> to vector<1x128xf32>
    %77 = vector.broadcast %76 : vector<1x128xf32> to vector<4x128xf32>
    %78 = arith.mulf %73, %77 : vector<4x128xf32>
    %79 = arith.addf %70, %78 : vector<4x128xf32>
    %80 = vector.shape_cast %8 : vector<1x128xf32> to vector<128xf32>
    %81 = vector.shape_cast %80 : vector<128xf32> to vector<1x128xf32>
    %82 = vector.broadcast %81 : vector<1x128xf32> to vector<4x128xf32>
    %83 = arith.addf %79, %82 : vector<4x128xf32>
    %cst_12 = arith.constant 0.000000e+00 : f32
    %84 = vector.broadcast %cst_12 : f32 to vector<4x128xf32>
    %85 = arith.maximumf %83, %84 : vector<4x128xf32>
    %c0_13 = arith.constant 0 : index
    %c0_14 = arith.constant 0 : index
    %86 = vector.load %arg4[%c0_13, %c0_14] : memref<128x256xf32, #tpu.memory_space<vmem>>, vector<128x256xf32>
    %cst_15 = arith.constant dense<0.000000e+00> : vector<4x256xf32>
    %87 = tpu.matmul %85, %86, %cst_15 {dimension_numbers = #tpu.dot_dimension_numbers<[1], [0], [0], [1], [0, 0, 1, 1], [], []>} : vector<4x128xf32>, vector<128x256xf32>, vector<4x256xf32> -> vector<4x256xf32>
    %c0_16 = arith.constant 0 : index
    %c0_17 = arith.constant 0 : index
    %88 = vector.load %arg5[%c0_16, %c0_17] : memref<1x256xf32, #tpu.memory_space<vmem>>, vector<1x256xf32>
    %89 = vector.broadcast %88 : vector<1x256xf32> to vector<4x256xf32>
    %90 = arith.addf %87, %89 : vector<4x256xf32>
    %cst_18 = arith.constant 0.000000e+00 : f32
    %91 = vector.broadcast %cst_18 : f32 to vector<4x256xf32>
    %92 = arith.maximumf %90, %91 : vector<4x256xf32>
    %c0_19 = arith.constant 0 : index
    %c0_20 = arith.constant 0 : index
    %c0_21 = arith.constant 0 : index
    %93 = vector.load %arg6[%c0_19, %c0_20, %c0_21] : memref<1x4x256xf32, #tpu.memory_space<vmem>>, vector<1x4x256xf32>
    %94 = vector.shape_cast %93 : vector<1x4x256xf32> to vector<4x256xf32>
    %95 = arith.addf %92, %94 : vector<4x256xf32>
    %c0_22 = arith.constant 0 : index
    %c0_23 = arith.constant 0 : index
    %c0_24 = arith.constant 0 : index
    %96 = vector.load %arg7[%c0_22, %c0_23, %c0_24] : memref<1x4x256xf32, #tpu.memory_space<vmem>>, vector<1x4x256xf32>
    %97 = vector.shape_cast %96 : vector<1x4x256xf32> to vector<4x256xf32>
    %98 = vector.shape_cast %95 : vector<4x256xf32> to vector<1x4x256xf32>
    tpu.vector_store %arg7[%c0_22, %c0_23, %c0_24], %98 {strides = array<i32>} : memref<1x4x256xf32, #tpu.memory_space<vmem>>, vector<1x4x256xf32>,
    return
  }
  func.func @transform_0(%arg0: i32) -> (i32, i32, i32) {
    %c0_i32 = arith.constant 0 : i32
    %c0_i32_0 = arith.constant 0 : i32
    %c0_i32_1 = arith.constant 0 : i32
    return %arg0, %c0_i32, %c0_i32_0 : i32, i32, i32
  }
  func.func @transform_1(%arg0: i32) -> (i32, i32) {
    %c0_i32 = arith.constant 0 : i32
    %c0_i32_0 = arith.constant 0 : i32
    %c0_i32_1 = arith.constant 0 : i32
    return %c0_i32, %c0_i32_0 : i32, i32
  }
  func.func @transform_2(%arg0: i32) -> (i32, i32) {
    %c0_i32 = arith.constant 0 : i32
    %c0_i32_0 = arith.constant 0 : i32
    %c0_i32_1 = arith.constant 0 : i32
    return %c0_i32, %c0_i32_0 : i32, i32
  }
  func.func @transform_3(%arg0: i32) -> (i32, i32) {
    %c0_i32 = arith.constant 0 : i32
    %c0_i32_0 = arith.constant 0 : i32
    %c0_i32_1 = arith.constant 0 : i32
    return %c0_i32, %c0_i32_0 : i32, i32
  }
  func.func @transform_4(%arg0: i32) -> (i32, i32) {
    %c0_i32 = arith.constant 0 : i32
    %c0_i32_0 = arith.constant 0 : i32
    %c0_i32_1 = arith.constant 0 : i32
    return %c0_i32, %c0_i32_0 : i32, i32
  }
  func.func @transform_5(%arg0: i32) -> (i32, i32, i32) {
    %c0_i32 = arith.constant 0 : i32
    %c0_i32_0 = arith.constant 0 : i32
    %c0_i32_1 = arith.constant 0 : i32
    return %arg0, %c0_i32, %c0_i32_0 : i32, i32, i32
  }
  func.func @transform_6(%arg0: i32) -> (i32, i32, i32) {
    %c0_i32 = arith.constant 0 : i32
    %c0_i32_0 = arith.constant 0 : i32
    %c0_i32_1 = arith.constant 0 : i32
    return %arg0, %c0_i32, %c0_i32_0 : i32, i32, i32
  }
}

module attributes {stable_mosaic.version = 11 : i64} {
  func.func @_dsconv_kernel(%arg0: i32, %arg1: memref<1x4x512xf32, #tpu.memory_space<vmem>>, %arg2: memref<9x256xf32, #tpu.memory_space<vmem>>, %arg3: memref<1x256xf32, #tpu.memory_space<vmem>>, %arg4: memref<256x256xf32, #tpu.memory_space<vmem>>, %arg5: memref<1x256xf32, #tpu.memory_space<vmem>>, %arg6: memref<1x4x256xf32, #tpu.memory_space<vmem>>) attributes {dimension_semantics = [#tpu.dimension_semantics<parallel>], iteration_bounds = array<i64: 2>, scalar_prefetch = 0 : i64, scratch_operands = 0 : i64, tpu.core_type = #tpu.core_type<tc>, window_params = [{transform_indices = @transform_0, window_bounds = array<i64: 1, 4, 512>}, {pipeline_mode = #tpu.pipeline_mode<synchronous>, transform_indices = @transform_1, window_bounds = array<i64: 9, 256>}, {pipeline_mode = #tpu.pipeline_mode<synchronous>, transform_indices = @transform_2, window_bounds = array<i64: 1, 256>}, {pipeline_mode = #tpu.pipeline_mode<synchronous>, transform_indices = @transform_3, window_bounds = array<i64: 256, 256>}, {pipeline_mode = #tpu.pipeline_mode<synchronous>, transform_indices = @transform_4, window_bounds = array<i64: 1, 256>}, {transform_indices = @transform_5, window_bounds = array<i64: 1, 4, 256>}]} {
    %c0 = arith.constant 0 : index
    %c0_0 = arith.constant 0 : index
    %c0_1 = arith.constant 0 : index
    %0 = vector.load %arg1[%c0, %c0_0, %c0_1] : memref<1x4x512xf32, #tpu.memory_space<vmem>>, vector<1x4x512xf32>
    %1 = vector.shape_cast %0 : vector<1x4x512xf32> to vector<4x512xf32>
    %2 = vector.extract_strided_slice %1 {offsets = [0, 0], sizes = [4, 256], strides = [1, 1]} : vector<4x512xf32> to vector<4x256xf32>
    %3 = vector.extract_strided_slice %1 {offsets = [0, 256], sizes = [4, 256], strides = [1, 1]} : vector<4x512xf32> to vector<4x256xf32>
    %cst = arith.constant 0.000000e+00 : f32
    %4 = vector.broadcast %cst : f32 to vector<1x256xf32>
    %5 = vector.extract_strided_slice %3 {offsets = [0, 0], sizes = [3, 256], strides = [1, 1]} : vector<4x256xf32> to vector<3x256xf32>
    %6 = tpu.concatenate %4, %5 in 0 : vector<1x256xf32>, vector<3x256xf32> -> vector<4x256xf32>
    %c0_2 = arith.constant 0 : index
    %c0_3 = arith.constant 0 : index
    %7 = vector.load %arg2[%c0_2, %c0_3] : memref<9x256xf32, #tpu.memory_space<vmem>>, vector<9x256xf32>
    %c0_4 = arith.constant 0 : index
    %c0_5 = arith.constant 0 : index
    %8 = vector.load %arg3[%c0_4, %c0_5] : memref<1x256xf32, #tpu.memory_space<vmem>>, vector<1x256xf32>
    %cst_6 = arith.constant 0.000000e+00 : f32
    %9 = vector.broadcast %cst_6 : f32 to vector<4x32xf32>
    %10 = vector.extract_strided_slice %6 {offsets = [0, 0], sizes = [4, 224], strides = [1, 1]} : vector<4x256xf32> to vector<4x224xf32>
    %11 = tpu.concatenate %9, %10 in 1 : vector<4x32xf32>, vector<4x224xf32> -> vector<4x256xf32>
    %12 = vector.extract_strided_slice %7 {offsets = [0, 0], sizes = [1, 256], strides = [1, 1]} : vector<9x256xf32> to vector<1x256xf32>
    %13 = vector.shape_cast %12 : vector<1x256xf32> to vector<256xf32>
    %14 = vector.shape_cast %13 : vector<256xf32> to vector<1x256xf32>
    %15 = vector.broadcast %14 : vector<1x256xf32> to vector<4x256xf32>
    %16 = arith.mulf %11, %15 : vector<4x256xf32>
    %17 = vector.extract_strided_slice %7 {offsets = [1, 0], sizes = [1, 256], strides = [1, 1]} : vector<9x256xf32> to vector<1x256xf32>
    %18 = vector.shape_cast %17 : vector<1x256xf32> to vector<256xf32>
    %19 = vector.shape_cast %18 : vector<256xf32> to vector<1x256xf32>
    %20 = vector.broadcast %19 : vector<1x256xf32> to vector<4x256xf32>
    %21 = arith.mulf %6, %20 : vector<4x256xf32>
    %22 = arith.addf %16, %21 : vector<4x256xf32>
    %cst_7 = arith.constant 0.000000e+00 : f32
    %23 = vector.broadcast %cst_7 : f32 to vector<4x32xf32>
    %24 = vector.extract_strided_slice %6 {offsets = [0, 32], sizes = [4, 224], strides = [1, 1]} : vector<4x256xf32> to vector<4x224xf32>
    %25 = tpu.concatenate %24, %23 in 1 : vector<4x224xf32>, vector<4x32xf32> -> vector<4x256xf32>
    %26 = vector.extract_strided_slice %7 {offsets = [2, 0], sizes = [1, 256], strides = [1, 1]} : vector<9x256xf32> to vector<1x256xf32>
    %27 = vector.shape_cast %26 : vector<1x256xf32> to vector<256xf32>
    %28 = vector.shape_cast %27 : vector<256xf32> to vector<1x256xf32>
    %29 = vector.broadcast %28 : vector<1x256xf32> to vector<4x256xf32>
    %30 = arith.mulf %25, %29 : vector<4x256xf32>
    %31 = arith.addf %22, %30 : vector<4x256xf32>
    %cst_8 = arith.constant 0.000000e+00 : f32
    %32 = vector.broadcast %cst_8 : f32 to vector<4x32xf32>
    %33 = vector.extract_strided_slice %2 {offsets = [0, 0], sizes = [4, 224], strides = [1, 1]} : vector<4x256xf32> to vector<4x224xf32>
    %34 = tpu.concatenate %32, %33 in 1 : vector<4x32xf32>, vector<4x224xf32> -> vector<4x256xf32>
    %35 = vector.extract_strided_slice %7 {offsets = [3, 0], sizes = [1, 256], strides = [1, 1]} : vector<9x256xf32> to vector<1x256xf32>
    %36 = vector.shape_cast %35 : vector<1x256xf32> to vector<256xf32>
    %37 = vector.shape_cast %36 : vector<256xf32> to vector<1x256xf32>
    %38 = vector.broadcast %37 : vector<1x256xf32> to vector<4x256xf32>
    %39 = arith.mulf %34, %38 : vector<4x256xf32>
    %40 = arith.addf %31, %39 : vector<4x256xf32>
    %41 = vector.extract_strided_slice %7 {offsets = [4, 0], sizes = [1, 256], strides = [1, 1]} : vector<9x256xf32> to vector<1x256xf32>
    %42 = vector.shape_cast %41 : vector<1x256xf32> to vector<256xf32>
    %43 = vector.shape_cast %42 : vector<256xf32> to vector<1x256xf32>
    %44 = vector.broadcast %43 : vector<1x256xf32> to vector<4x256xf32>
    %45 = arith.mulf %2, %44 : vector<4x256xf32>
    %46 = arith.addf %40, %45 : vector<4x256xf32>
    %cst_9 = arith.constant 0.000000e+00 : f32
    %47 = vector.broadcast %cst_9 : f32 to vector<4x32xf32>
    %48 = vector.extract_strided_slice %2 {offsets = [0, 32], sizes = [4, 224], strides = [1, 1]} : vector<4x256xf32> to vector<4x224xf32>
    %49 = tpu.concatenate %48, %47 in 1 : vector<4x224xf32>, vector<4x32xf32> -> vector<4x256xf32>
    %50 = vector.extract_strided_slice %7 {offsets = [5, 0], sizes = [1, 256], strides = [1, 1]} : vector<9x256xf32> to vector<1x256xf32>
    %51 = vector.shape_cast %50 : vector<1x256xf32> to vector<256xf32>
    %52 = vector.shape_cast %51 : vector<256xf32> to vector<1x256xf32>
    %53 = vector.broadcast %52 : vector<1x256xf32> to vector<4x256xf32>
    %54 = arith.mulf %49, %53 : vector<4x256xf32>
    %55 = arith.addf %46, %54 : vector<4x256xf32>
    %cst_10 = arith.constant 0.000000e+00 : f32
    %56 = vector.broadcast %cst_10 : f32 to vector<4x32xf32>
    %57 = vector.extract_strided_slice %3 {offsets = [0, 0], sizes = [4, 224], strides = [1, 1]} : vector<4x256xf32> to vector<4x224xf32>
    %58 = tpu.concatenate %56, %57 in 1 : vector<4x32xf32>, vector<4x224xf32> -> vector<4x256xf32>
    %59 = vector.extract_strided_slice %7 {offsets = [6, 0], sizes = [1, 256], strides = [1, 1]} : vector<9x256xf32> to vector<1x256xf32>
    %60 = vector.shape_cast %59 : vector<1x256xf32> to vector<256xf32>
    %61 = vector.shape_cast %60 : vector<256xf32> to vector<1x256xf32>
    %62 = vector.broadcast %61 : vector<1x256xf32> to vector<4x256xf32>
    %63 = arith.mulf %58, %62 : vector<4x256xf32>
    %64 = arith.addf %55, %63 : vector<4x256xf32>
    %65 = vector.extract_strided_slice %7 {offsets = [7, 0], sizes = [1, 256], strides = [1, 1]} : vector<9x256xf32> to vector<1x256xf32>
    %66 = vector.shape_cast %65 : vector<1x256xf32> to vector<256xf32>
    %67 = vector.shape_cast %66 : vector<256xf32> to vector<1x256xf32>
    %68 = vector.broadcast %67 : vector<1x256xf32> to vector<4x256xf32>
    %69 = arith.mulf %3, %68 : vector<4x256xf32>
    %70 = arith.addf %64, %69 : vector<4x256xf32>
    %cst_11 = arith.constant 0.000000e+00 : f32
    %71 = vector.broadcast %cst_11 : f32 to vector<4x32xf32>
    %72 = vector.extract_strided_slice %3 {offsets = [0, 32], sizes = [4, 224], strides = [1, 1]} : vector<4x256xf32> to vector<4x224xf32>
    %73 = tpu.concatenate %72, %71 in 1 : vector<4x224xf32>, vector<4x32xf32> -> vector<4x256xf32>
    %74 = vector.extract_strided_slice %7 {offsets = [8, 0], sizes = [1, 256], strides = [1, 1]} : vector<9x256xf32> to vector<1x256xf32>
    %75 = vector.shape_cast %74 : vector<1x256xf32> to vector<256xf32>
    %76 = vector.shape_cast %75 : vector<256xf32> to vector<1x256xf32>
    %77 = vector.broadcast %76 : vector<1x256xf32> to vector<4x256xf32>
    %78 = arith.mulf %73, %77 : vector<4x256xf32>
    %79 = arith.addf %70, %78 : vector<4x256xf32>
    %80 = vector.shape_cast %8 : vector<1x256xf32> to vector<256xf32>
    %81 = vector.shape_cast %80 : vector<256xf32> to vector<1x256xf32>
    %82 = vector.broadcast %81 : vector<1x256xf32> to vector<4x256xf32>
    %83 = arith.addf %79, %82 : vector<4x256xf32>
    %cst_12 = arith.constant 0.000000e+00 : f32
    %84 = vector.broadcast %cst_12 : f32 to vector<4x256xf32>
    %85 = arith.maximumf %83, %84 : vector<4x256xf32>
    %c0_13 = arith.constant 0 : index
    %c0_14 = arith.constant 0 : index
    %86 = vector.load %arg4[%c0_13, %c0_14] : memref<256x256xf32, #tpu.memory_space<vmem>>, vector<256x256xf32>
    %cst_15 = arith.constant dense<0.000000e+00> : vector<4x256xf32>
    %87 = tpu.matmul %85, %86, %cst_15 {dimension_numbers = #tpu.dot_dimension_numbers<[1], [0], [0], [1], [0, 0, 1, 1], [], []>} : vector<4x256xf32>, vector<256x256xf32>, vector<4x256xf32> -> vector<4x256xf32>
    %c0_16 = arith.constant 0 : index
    %c0_17 = arith.constant 0 : index
    %88 = vector.load %arg5[%c0_16, %c0_17] : memref<1x256xf32, #tpu.memory_space<vmem>>, vector<1x256xf32>
    %89 = vector.broadcast %88 : vector<1x256xf32> to vector<4x256xf32>
    %90 = arith.addf %87, %89 : vector<4x256xf32>
    %cst_18 = arith.constant 0.000000e+00 : f32
    %91 = vector.broadcast %cst_18 : f32 to vector<4x256xf32>
    %92 = arith.maximumf %90, %91 : vector<4x256xf32>
    %c0_19 = arith.constant 0 : index
    %c0_20 = arith.constant 0 : index
    %c0_21 = arith.constant 0 : index
    %93 = vector.load %arg6[%c0_19, %c0_20, %c0_21] : memref<1x4x256xf32, #tpu.memory_space<vmem>>, vector<1x4x256xf32>
    %94 = vector.shape_cast %93 : vector<1x4x256xf32> to vector<4x256xf32>
    %95 = vector.shape_cast %92 : vector<4x256xf32> to vector<1x4x256xf32>
    tpu.vector_store %arg6[%c0_19, %c0_20, %c0_21], %95 {strides = array<i32>} : memref<1x4x256xf32, #tpu.memory_space<vmem>>, vector<1x4x256xf32>,
    return
  }
  func.func @transform_0(%arg0: i32) -> (i32, i32, i32) {
    %c0_i32 = arith.constant 0 : i32
    %c0_i32_0 = arith.constant 0 : i32
    %c0_i32_1 = arith.constant 0 : i32
    return %arg0, %c0_i32, %c0_i32_0 : i32, i32, i32
  }
  func.func @transform_1(%arg0: i32) -> (i32, i32) {
    %c0_i32 = arith.constant 0 : i32
    %c0_i32_0 = arith.constant 0 : i32
    %c0_i32_1 = arith.constant 0 : i32
    return %c0_i32, %c0_i32_0 : i32, i32
  }
  func.func @transform_2(%arg0: i32) -> (i32, i32) {
    %c0_i32 = arith.constant 0 : i32
    %c0_i32_0 = arith.constant 0 : i32
    %c0_i32_1 = arith.constant 0 : i32
    return %c0_i32, %c0_i32_0 : i32, i32
  }
  func.func @transform_3(%arg0: i32) -> (i32, i32) {
    %c0_i32 = arith.constant 0 : i32
    %c0_i32_0 = arith.constant 0 : i32
    %c0_i32_1 = arith.constant 0 : i32
    return %c0_i32, %c0_i32_0 : i32, i32
  }
  func.func @transform_4(%arg0: i32) -> (i32, i32) {
    %c0_i32 = arith.constant 0 : i32
    %c0_i32_0 = arith.constant 0 : i32
    %c0_i32_1 = arith.constant 0 : i32
    return %c0_i32, %c0_i32_0 : i32, i32
  }
  func.func @transform_5(%arg0: i32) -> (i32, i32, i32) {
    %c0_i32 = arith.constant 0 : i32
    %c0_i32_0 = arith.constant 0 : i32
    %c0_i32_1 = arith.constant 0 : i32
    return %arg0, %c0_i32, %c0_i32_0 : i32, i32, i32
  }
}

</mosaic_0001>

<bundles_post_ra>
// kernel: run.8
= control target key start
LH: loop header
LB: loop body
LE: loop exit
PB: predicated region body
PF: predicated region fallthrough
CT: control target
= control target key end

     0   :  { %s1305_s17 = smov 0   ;;  %s1607_s0 = inlined_call_operand.vmem [shape: f32[2,8,512], index: 0, kind: input, shape index: {}]   ;;  %s1608_s1 = inlined_call_operand.vmem [shape: f32[2,8,256], index: 1, kind: input, shape index: {}]   ;;  %s1609_s2 = inlined_call_operand.vmem [shape: f32[256,24], index: 2, kind: input, shape index: {}]   ;;  %s1610_s3 = inlined_call_operand.vmem [shape: f32[256,24], index: 3, kind: input, shape index: {}]   ;;  %s1611_s4 = inlined_call_operand.vmem [shape: f32[1,24], index: 4, kind: input, shape index: {}]   ;;  %s1612_s5 = inlined_call_operand.vmem [shape: f32[24,256], index: 5, kind: input, shape index: {}]   ;;  %s1613_s6 = inlined_call_operand.vmem [shape: f32[24,256], index: 6, kind: input, shape index: {}]   ;;  %s1614_s7 = inlined_call_operand.vmem [shape: f32[1,256], index: 7, kind: input, shape index: {}]   ;;  %s1615_s8 = inlined_call_operand.vmem [shape: f32[1,256], index: 8, kind: input, shape index: {}]   ;;  %s1616_s9 = inlined_call_operand.vmem [shape: f32[16,8], index: 9, kind: input, shape index: {}]   ;;  %s1617_s10 = inlined_call_operand.vmem [shape: f32[2,16,256], index: 10, kind: output, shape index: {0}]   ;;  %s1618_s11 = inlined_call_operand.vmem [shape: f32[2,8,256], index: 11, kind: output, shape index: {1}]  }
   0x1 LB: > { %s1041_s18 = sadd.s32 4294967295, %s1242_s17   ;;  %p1045_p0 = scmp.ge.s32.totalorder %s1242_s17, 1  ;;  %s1242_s17 = sphi %s1305_s17, %s22_s17  }
   0x2   : > { %p350_p1 = scmp.lt.s32.totalorder %s1242_s17, 3 }
   0x4   : > { %p351_p2 = pnand %p1045_p0, %p350_p1 }
   0x5   : > { %v478_v0 = vld [vmem:[%s1610_s3 + $0x80] sm:$0xff] (!%p351_p2)  ;;  %v479_v1 = vld [vmem:[%s1610_s3 + $0x88] sm:$0xff] (!%p351_p2)  ;;  %v480_v11 = vld [vmem:[%s1610_s3 + $0x90] sm:$0xff] (!%p351_p2)  ;;  %p1387_p3 = scmp.lt.s32.totalorder (!%p351_p2), %s1041_s18, 1  ;;  %vm661_vm0 = vcmask (!%p351_p2), 195584   ;;  %vm750_vm1 = vcmask (!%p351_p2), 64512  }
   0x6   : > { %354 = sbr.rel (%p351_p2) target bundleno = 724 (0x2d4), region = 60  ;;  %v446_v2 = vld [vmem:[%s1609_s2 + $0x80] sm:$0xff] (!%p351_p2)  ;;  %v1139_v3 = vpack.c.bf16 (!%p351_p2), %v479_v1, %v478_v0  ;;  %v447_v4 = vld [vmem:[%s1609_s2 + $0x88] sm:$0xff] (!%p351_p2)  ;;  %v481_v13 = vld [vmem:[%s1610_s3 + $0x98] sm:$0xff] (!%p351_p2) }
   0x7   : > { %v462_v5 = vld [vmem:[%s1610_s3] sm:$0xff] (!%p351_p2)  ;;  %v463_v6 = vld [vmem:[%s1610_s3 + $0x8] sm:$0xff] (!%p351_p2)  ;;  %v1171_v7 = vpack.c.bf16 (!%p351_p2), %v447_v4, %v446_v2  ;;  %v448_v14 = vld [vmem:[%s1609_s2 + $0x90] sm:$0xff] (!%p351_p2)  ;;  %v1143_v16 = vpack.c.bf16 (!%p351_p2), %v481_v13, %v480_v11 }
   0x8   : > { %v1141_v8 = vpack.c.bf16 (!%p351_p2), %v463_v6, %v462_v5  ;;  %v430_v9 = vld [vmem:[%s1609_s2] sm:$0xff] (!%p351_p2)  ;;  %v431_v10 = vld [vmem:[%s1609_s2 + $0x8] sm:$0xff] (!%p351_p2)  ;;  %1140 = vmatprep.subr.bf16.mxu0 (!%p351_p2), %v1139_v3  ;;  %v449_v15 = vld [vmem:[%s1609_s2 + $0x98] sm:$0xff] (!%p351_p2) }
   0x9   : > { %v1173_v12 = vpack.c.bf16 (!%p351_p2), %v431_v10, %v430_v9  ;;  %1172 = vmatprep.subr.bf16.mxu1 (!%p351_p2), %v1171_v7  ;;  %v1175_v17 = vpack.c.bf16 (!%p351_p2), %v449_v15, %v448_v14  ;;  %v464_v18 = vld [vmem:[%s1610_s3 + $0x10] sm:$0xff] (!%p351_p2)  ;;  %v465_v19 = vld [vmem:[%s1610_s3 + $0x18] sm:$0xff] (!%p351_p2)  ;;  %v482_v23 = vld [vmem:[%s1610_s3 + $0xa0] sm:$0xff] (!%p351_p2) }
   0xa   : > { %1142 = vmatpush3.bf16.msra.mxu0 (!%p351_p2), %v1141_v8  ;;  %v432_v20 = vld [vmem:[%s1609_s2 + $0x10] sm:$0xff] (!%p351_p2)  ;;  %v1145_v21 = vpack.c.bf16 (!%p351_p2), %v465_v19, %v464_v18  ;;  %v433_v22 = vld [vmem:[%s1609_s2 + $0x18] sm:$0xff] (!%p351_p2)  ;;  %v483_v24 = vld [vmem:[%s1610_s3 + $0xa8] sm:$0xff] (!%p351_p2) }
   0xb   : > { %1174 = vmatpush3.bf16.msra.mxu1 (!%p351_p2), %v1173_v12  ;;  %1144 = vmatprep.subr.bf16.mxu0 (!%p351_p2), %v1143_v16  ;;  %v1177_v25 = vpack.c.bf16 (!%p351_p2), %v433_v22, %v432_v20  ;;  %v1147_v26 = vpack.c.bf16 (!%p351_p2), %v483_v24, %v482_v23  ;;  %v450_v27 = vld [vmem:[%s1609_s2 + $0xa0] sm:$0xff] (!%p351_p2)  ;;  %v451_v28 = vld [vmem:[%s1609_s2 + $0xa8] sm:$0xff] (!%p351_p2)  ;;  %v484_v35 = vld [vmem:[%s1610_s3 + $0xb0] sm:$0xff] (!%p351_p2) }
   0xc   : > { %1176 = vmatprep.subr.bf16.mxu1 (!%p351_p2), %v1175_v17  ;;  %v466_v29 = vld [vmem:[%s1610_s3 + $0x20] sm:$0xff] (!%p351_p2)  ;;  %v1179_v30 = vpack.c.bf16 (!%p351_p2), %v451_v28, %v450_v27  ;;  %v467_v31 = vld [vmem:[%s1610_s3 + $0x28] sm:$0xff] (!%p351_p2)  ;;  %v485_v36 = vld [vmem:[%s1610_s3 + $0xb8] sm:$0xff] (!%p351_p2) }
   0xd   : > { %v434_v32 = vld [vmem:[%s1609_s2 + $0x20] sm:$0xff]  ;;  %v435_v33 = vld [vmem:[%s1609_s2 + $0x28] sm:$0xff]  ;;  %v1149_v34 = vpack.c.bf16 %v467_v31, %v466_v29  ;;  %v452_v37 = vld [vmem:[%s1609_s2 + $0xb0] sm:$0xff]  ;;  %v1151_v39 = vpack.c.bf16 %v485_v36, %v484_v35  ;;  %s1621_s18 = smov (!%p1387_p3, %s1041_s18), 1 }
   0xe   : > { %1146 = vmatpush3.bf16.msra.mxu0 %v1145_v21  ;;  %v1181_v38 = vpack.c.bf16 %v435_v33, %v434_v32  ;;  %v453_v40 = vld [vmem:[%s1609_s2 + $0xb8] sm:$0xff]  ;;  %v468_v41 = vld [vmem:[%s1610_s3 + $0x30] sm:$0xff]  ;;  %v486_v46 = vld [vmem:[%s1610_s3 + $0xc0] sm:$0xff]  ;;  %s1065_s24 = sshll.u32 %s1621_s18, 5  ;;  %s1066_s25 = sshll.u32 %s1621_s18, 4 }
   0xf   : > { %1178 = vmatpush3.bf16.msra.mxu1 %v1177_v25  ;;  %1148 = vmatprep.subr.bf16.mxu0 %v1147_v26  ;;  %v469_v42 = vld [vmem:[%s1610_s3 + $0x38] sm:$0xff]  ;;  %v1183_v43 = vpack.c.bf16 %v453_v40, %v452_v37  ;;  %v436_v44 = vld [vmem:[%s1609_s2 + $0x30] sm:$0xff]  ;;  %v487_v47 = vld [vmem:[%s1610_s3 + $0xc8] sm:$0xff]  ;;  %s1482_s23 = scalar_lea.vmem %s1608_s1, %s1066_s25  ;;  %s1489_s28 = scalar_lea.vmem %s1607_s0, %s1065_s24 }
  0x10   : > { %1180 = vmatprep.subr.bf16.mxu1 %v1179_v30  ;;  %v437_v45 = vld [vmem:[%s1609_s2 + $0x38] sm:$0xff]  ;;  %v454_v48 = vld [vmem:[%s1609_s2 + $0xc0] sm:$0xff]  ;;  %v455_v49 = vld [vmem:[%s1609_s2 + $0xc8] sm:$0xff]  ;;  %v1153_v50 = vpack.c.bf16 %v469_v42, %v468_v41  ;;  %v1155_v52 = vpack.c.bf16 %v487_v47, %v486_v46  ;;  %s419_s15 = scalar_lea.vmem %s1618_s11, %s1066_s25  ;;  %s414_s21 = scalar_lea.vmem %s1617_s10, %s1065_s24 }
  0x11   : > { %v1185_v51 = vpack.c.bf16 %v437_v45, %v436_v44  ;;  %v470_v53 = vld [vmem:[%s1610_s3 + $0x40] sm:$0xff]  ;;  %v471_v54 = vld [vmem:[%s1610_s3 + $0x48] sm:$0xff]  ;;  %v1187_v56 = vpack.c.bf16 %v455_v49, %v454_v48  ;;  %v488_v58 = vld [vmem:[%s1610_s3 + $0xd0] sm:$0xff] }
  0x12   : > { %1150 = vmatpush3.bf16.msra.mxu0 %v1149_v34  ;;  %v438_v55 = vld [vmem:[%s1609_s2 + $0x40] sm:$0xff]  ;;  %v439_v57 = vld [vmem:[%s1609_s2 + $0x48] sm:$0xff]  ;;  %v489_v59 = vld [vmem:[%s1610_s3 + $0xd8] sm:$0xff]  ;;  %v1157_v62 = vpack.c.bf16 %v471_v54, %v470_v53  ;;  %v1244_v53 = vmov 0.0  }
  0x13   : > { %1182 = vmatpush3.bf16.msra.mxu1 %v1181_v38  ;;  %1152 = vmatprep.subr.bf16.mxu0 %v1151_v39  ;;  %v456_v60 = vld [vmem:[%s1609_s2 + $0xd0] sm:$0xff]  ;;  %v457_v61 = vld [vmem:[%s1609_s2 + $0xd8] sm:$0xff]  ;;  %v1189_v63 = vpack.c.bf16 %v439_v57, %v438_v55  ;;  %v1159_v0 = vpack.c.bf16 %v489_v59, %v488_v58  ;;  %v490_v6 = vld [vmem:[%s1610_s3 + $0xe0] sm:$0xff] }
  0x14   : > { %1184 = vmatprep.subr.bf16.mxu1 %v1183_v43  ;;  %v472_v1 = vld [vmem:[%s1610_s3 + $0x50] sm:$0xff]  ;;  %v473_v2 = vld [vmem:[%s1610_s3 + $0x58] sm:$0xff]  ;;  %v1191_v4 = vpack.c.bf16 %v457_v61, %v456_v60  ;;  %v491_v7 = vld [vmem:[%s1610_s3 + $0xe8] sm:$0xff] }
  0x15   : > { %v440_v3 = vld [vmem:[%s1609_s2 + $0x50] sm:$0xff]  ;;  %v441_v5 = vld [vmem:[%s1609_s2 + $0x58] sm:$0xff]  ;;  %v458_v8 = vld [vmem:[%s1609_s2 + $0xe0] sm:$0xff]  ;;  %v1161_v10 = vpack.c.bf16 %v473_v2, %v472_v1  ;;  %v1163_v15 = vpack.c.bf16 %v491_v7, %v490_v6 }
  0x16   : > { %1154 = vmatpush3.bf16.msra.mxu0 %v1153_v50  ;;  %v459_v9 = vld [vmem:[%s1609_s2 + $0xe8] sm:$0xff]  ;;  %v474_v11 = vld [vmem:[%s1610_s3 + $0x60] sm:$0xff]  ;;  %v1193_v14 = vpack.c.bf16 %v441_v5, %v440_v3  ;;  %v492_v20 = vld [vmem:[%s1610_s3 + $0xf0] sm:$0xff]  ;;  %v651_v5 = vlaneseq }
  0x17   : > { %1186 = vmatpush3.bf16.msra.mxu1 %v1185_v51  ;;  %1156 = vmatprep.subr.bf16.mxu0 %v1155_v52  ;;  %v475_v12 = vld [vmem:[%s1610_s3 + $0x68] sm:$0xff]  ;;  %v442_v13 = vld [vmem:[%s1609_s2 + $0x60] sm:$0xff]  ;;  %v1195_v19 = vpack.c.bf16 %v459_v9, %v458_v8  ;;  %v493_v21 = vld [vmem:[%s1610_s3 + $0xf8] sm:$0xff] }
  0x18   : > { %1188 = vmatprep.subr.bf16.mxu1 %v1187_v56  ;;  %v443_v16 = vld [vmem:[%s1609_s2 + $0x68] sm:$0xff]  ;;  %v423_v22 = vld [vmem:[%s1489_s28 + $0x18] sm:$0xff]  ;;  %v460_v23 = vld [vmem:[%s1609_s2 + $0xf0] sm:$0xff]  ;;  %v1165_v26 = vpack.c.bf16 %v475_v12, %v474_v11  ;;  %v1167_v29 = vpack.c.bf16 %v493_v21, %v492_v20  ;;  %v652_v6 = vshrl.u32 %v651_v5, 7 }
  0x19   : > { %v425_v17 = vld [vmem:[%s1482_s23 + $0x8] sm:$0xff]  ;;  %v461_v24 = vld [vmem:[%s1609_s2 + $0xf8] sm:$0xff]  ;;  %v476_v27 = vld [vmem:[%s1610_s3 + $0x70] sm:$0xff]  ;;  %v1197_v28 = vpack.c.bf16 %v443_v16, %v442_v13 }
  0x1a   : > { %1158 = vmatpush3.bf16.msra.mxu0 %v1157_v62  ;;  %v421_v18 = vld [vmem:[%s1489_s28 + $0x8] sm:$0xff]  ;;  %558 = vmatprep.mubr.f32.mxu0 %v425_v17  ;;  %v477_v30 = vld [vmem:[%s1610_s3 + $0x78] sm:$0xff]  ;;  %v420_v32 = vld [vmem:[%s1489_s28] sm:$0xff]  ;;  %v1199_v34 = vpack.c.bf16 %v461_v24, %v460_v23  ;;  %v653_v7 = vsub.s32 0, %v652_v6  ;;  %v657_v9 = vsub.s32 1, %v652_v6 }
  0x1b   : > { %1190 = vmatpush3.bf16.msra.mxu1 %v1189_v63  ;;  %1160 = vmatprep.subr.bf16.mxu0 %v1159_v0  ;;  %v427_v25 = vadd.f32 %v423_v22, %v421_v18  ;;  %v422_v33 = vld [vmem:[%s1489_s28 + $0x10] sm:$0xff]  ;;  %v445_v36 = vld [vmem:[%s1609_s2 + $0x78] sm:$0xff]  ;;  %v1169_v37 = vpack.c.bf16 %v477_v30, %v476_v27  ;;  %v424_v40 = vld [vmem:[%s1482_s23] sm:$0xff] }
  0x1c   : > { %1192 = vmatprep.subr.bf16.mxu1 %v1191_v4  ;;  %v444_v35 = vld [vmem:[%s1609_s2 + $0x70] sm:$0xff]  ;;  %v426_v38 = vadd.f32 %v422_v33, %v420_v32  ;;  %v644_v42 = vld [vmem:[%s1612_s5 + $0x8] sm:$0xff]  ;;  %v646_v43 = vld [vmem:[%s1612_s5 + $0x18] sm:$0xff] }
  0x1d   : > { %v429_v31 = vmul.f32 0.25, %v427_v25  ;;  %v1201_v39 = vpack.c.bf16 %v445_v36, %v444_v35  ;;  %v1203_v44 = vpack.c.bf16 %v646_v43, %v644_v42  ;;  %v643_v45 = vld [vmem:[%s1612_s5] sm:$0xff]  ;;  %v645_v46 = vld [vmem:[%s1612_s5 + $0x10] sm:$0xff]  ;;  %v648_v48 = vld [vmem:[%s1612_s5 + $0x28] sm:$0xff] }
  0x1e   : > { %1162 = vmatpush3.bf16.msra.mxu0 %v1161_v10  ;;  %v428_v41 = vmul.f32 0.25, %v426_v38  ;;  %v1205_v47 = vpack.c.bf16 %v645_v46, %v643_v45  ;;  %v835_v49 = vld [vmem:[%s1613_s6 + $0x8] sm:$0xff]  ;;  %v837_v50 = vld [vmem:[%s1613_s6 + $0x18] sm:$0xff]  ;;  %v647_v51 = vld [vmem:[%s1612_s5 + $0x20] sm:$0xff] }
  0x1f   : > { %1194 = vmatpush3.bf16.msra.mxu1 %v1193_v14  ;;  %1164 = vmatprep.subr.bf16.mxu0 %v1163_v15  ;;  %v1207_v52 = vpack.c.bf16 %v837_v50, %v835_v49  ;;  %v1054_v60 = vld [vmem:[%s1611_s4] ss:$0 sm:$0xff]  ;;  %v836_v63 = vld [vmem:[%s1613_s6 + $0x10] sm:$0xff]  ;;  %v839_v3 = vld [vmem:[%s1613_s6 + $0x28] sm:$0xff] }
  0x20   : > { %1196 = vmatprep.subr.bf16.mxu1 %v1195_v19  ;;  %628 = vmatprep.mubr.f32.mxu1 %v429_v31  ;;  %v834_v62 = vld [vmem:[%s1613_s6] sm:$0xff]  ;;  %v749_v38 = vld [vmem:[%s1616_s9 + $0x8] sm:$0xff] }
  0x21   : > { %v1209_v1 = vpack.c.bf16 %v836_v63, %v834_v62  ;;  %v838_v4 = vld [vmem:[%s1613_s6 + $0x20] sm:$0xff] }
  0x22   : > { %1166 = vmatpush3.bf16.msra.mxu0 %v1165_v26  ;;  %v649_v8 = vld [vmem:[%s1614_s7] sm:$0x3] }
  0x23   : > { %1198 = vmatpush3.bf16.msra.mxu1 %v1197_v28  ;;  %1168 = vmatprep.subr.bf16.mxu0 %v1167_v29  ;;  %v654_v10 = vrot.slane %v649_v8, %v653_v7  ;;  %v658_v11 = vrot.slane %v649_v8, %v657_v9  ;;  %v840_v13 = vld [vmem:[%s1615_s8] sm:$0x3] }
  0x24   : > { %1200 = vmatprep.subr.bf16.mxu1 %v1199_v34  ;;  %v845_v18 = vrot.slane %v840_v13, %v653_v7  ;;  %v849_v20 = vrot.slane %v840_v13, %v657_v9  ;;  %v748_v36 = vld [vmem:[%s1616_s9] sm:$0xff] }
  0x26   : > { %1170 = vmatpush3.bf16.msra.mxu0 %v1169_v37 }
  0x27   : > { %1202 = vmatpush3.bf16.msra.mxu1 %v1201_v39  ;;  %1204 = vmatprep.subr.bf16.mxu0 %v1203_v44 }
  0x29   : > { %559 = vmatmul.mubr.f32.vlgmr.msra.gmra.mrb[0].mxu0 %v424_v40 }
  0x2a   : > { %629 = vmatmul.mubr.f32.vlgmr.msra.gmra.mrb[0].mxu1 %v428_v41  ;;  %1206 = vmatpush1.bf16.msra.mxu0 %v1205_v47 }
  0x2b   : > { %669 = vmatprep.subr.mxu0 %v648_v48  ;;  %729 = vmatprep.mubr.f32.mxu0 %v1244_v53 }
  0x2c   : > { %821 = vmatprep.mubr.f32.mxu1 %v1244_v53 }
  0x2e   : > { %670 = vmatpush1.msra.mxu0 %v647_v51 }
  0x2f   : > { %1208 = vmatprep.subr.bf16.mxu0 %v1207_v52 }
  0xfc   : > { %v1101_v54 = vpop.f32.mrb[0].mxu0 }
  0xfd   : > { %v1136_v55 = vpop.f32.mrb[0].mxu1  ;;  %v1102_v56 = vpop.f32.mrb[1].mxu0 }
  0xfe   : > { %v1103_v57 = vadd.f32 %v1102_v56, %v1101_v54  ;;  %v1137_v58 = vpop.f32.mrb[1].mxu1 }
  0xff   : > { %v1138_v59 = vadd.f32 %v1137_v58, %v1136_v55 }
 0x101   : > { %v631_v61 = vadd.f32 %v1138_v59, %v1103_v57 }
 0x103   : > { %v641_v0 = vadd.f32 %v1054_v60, %v631_v61 }
 0x105   : > { %v642_v2 = vmax.f32 %v641_v0, 0.0 }
 0x107   : > { %1055 = vmatmul.mubr.msk.f32.vlgmr.msra.gmra.mrb[2].mxu0 %vm661_vm0, %v642_v2 }
 0x108   : > { %1210 = vmatpush1.bf16.msra.mxu0 %v1209_v1  ;;  %916 = vmatprep.mubr.f32.mxu0 %v1244_v53 }
 0x109   : > { %856 = vmatprep.subr.mxu0 %v839_v3 }
 0x10c   : > { %857 = vmatpush1.msra.mxu0 %v838_v4 }
 0x10d   : > { %1060 = vmatmul.mubr.msk.f32.vlgmr.msra.gmra.mrb[4].mxu0 %vm661_vm0, %v642_v2 }
 0x1da   : > { %v731_v12 = vpop.f32.mrb[2].mxu0 }
 0x1db   : > { %v732_v14 = vadd.f32 %v731_v12, %v654_v10  ;;  %v733_v15 = vpop.f32.mrb[3].mxu0 }
 0x1dc   : > { %v734_v16 = vadd.f32 %v733_v15, %v658_v11 }
 0x1dd   : > { %v1056_v17 = vmul.f32 -1.442695, %v732_v14 }
 0x1de   : > { %v1057_v19 = vmul.f32 -1.442695, %v734_v16 }
 0x1df   : > { %1220 = vpow2.f32 %v1056_v17 }
 0x1e0   : > { %1222 = vpow2.f32 %v1057_v19  ;;  %v918_v21 = vpop.f32.mrb[4].mxu0 }
 0x1e1   : > { %v919_v22 = vadd.f32 %v918_v21, %v845_v18  ;;  %v920_v23 = vpop.f32.mrb[5].mxu0 }
 0x1e2   : > { %v921_v24 = vadd.f32 %v920_v23, %v849_v20 }
 0x1e3   : > { %v1061_v25 = vmul.f32 -1.442695, %v919_v22 }
 0x1e4   : > { %v1062_v26 = vmul.f32 -1.442695, %v921_v24 }
 0x1e5   : > { %1224 = vpow2.f32 %v1061_v25 }
 0x1e6   : > { %1226 = vpow2.f32 %v1062_v26 }
 0x1e9   : > { %v1221_v27 = vpop.eup %1220 }
 0x1ea   : > { %v1223_v28 = vpop.eup %1222  ;;  %v742_v29 = vadd.f32 1.0, %v1221_v27 }
 0x1eb   : > { %v743_v30 = vadd.f32 1.0, %v1223_v28 }
 0x1ed   : > { %1228 = vrcp.f32 %v743_v30 }
 0x1ee   : > { %1230 = vrcp.f32 %v742_v29 }
 0x1ef   : > { %v1225_v31 = vpop.eup %1224 }
 0x1f0   : > { %v1227_v32 = vpop.eup %1226  ;;  %v929_v33 = vadd.f32 1.0, %v1225_v31 }
 0x1f1   : > { %v930_v34 = vadd.f32 1.0, %v1227_v32 }
 0x1f2   : > { %1232 = vrcp.f32 %v929_v33 }
 0x1f3   : > { %1234 = vrcp.f32 %v930_v34 }
 0x1f7   : > { %v1229_v35 = vpop.eup %1228 }
 0x1f8   : > { %v1231_v37 = vpop.eup %1230  ;;  %757 = vmatprep.subr.mxu1 %v1229_v35 }
 0x1f9   : > { %758 = vmatpush1.msra.mxu1 %v1231_v37 }
 0x1fa   : > { %1058 = vmatmul.mubr.msk.f32.vlgmr.msra.gmra.mrb[2].mxu1 %vm750_vm1, %v748_v36 }
 0x1fb   : > { %827 = vmatprep.mubr.f32.mxu1 %v1244_v53 }
 0x1fc   : > { %v1233_v39 = vpop.eup %1232 }
 0x1fd   : > { %v1235_v40 = vpop.eup %1234  ;;  %939 = vst [vmem:[%s419_s15] sm:$0xff] %v1233_v39 }
 0x1fe   : > { %940 = vst [vmem:[%s419_s15 + $0x8] sm:$0xff] %v1235_v40  ;;  %1059 = vmatmul.mubr.msk.f32.gmra.mrb[4].mxu1 %vm750_vm1, %v749_v38 }
 0x2cd   : > { %v823_v41 = vpop.f32.mrb[2].mxu1 }
 0x2ce   : > { %935 = vst [vmem:[%s414_s21] sm:$0xff] %v823_v41  ;;  %v825_v42 = vpop.f32.mrb[3].mxu1 }
 0x2cf   : > { %936 = vst [vmem:[%s414_s21 + $0x8] sm:$0xff] %v825_v42 }
 0x2d1   : > { %v829_v43 = vpop.f32.mrb[4].mxu1 }
 0x2d2   : > { %937 = vst [vmem:[%s414_s21 + $0x10] sm:$0xff] %v829_v43  ;;  %v831_v44 = vpop.f32.mrb[5].mxu1 }
 0x2d3   : > { %938 = vst [vmem:[%s414_s21 + $0x18] sm:$0xff] %v831_v44 }
 0x2d4 PF: > { %s22_s17 = sadd.s32 1, %s1242_s17  }
 0x2d5   : > { %p19_p4 = scmp.ge.s32.totalorder %s22_s17, 4  }
 0x2d7   :  { %21 = sbr.rel (!%p19_p4) target bundleno = 1 (0x1), region = 105 }

// kernel: run.11
= control target key start
LH: loop header
LB: loop body
LE: loop exit
PB: predicated region body
PF: predicated region fallthrough
CT: control target
= control target key end

     0   :  { %s821_s21 = smov 0   ;;  %s1050_s0 = inlined_call_operand.vmem [shape: f32[2,8,256], index: 0, kind: input, shape index: {}]   ;;  %s1051_s1 = inlined_call_operand.vmem [shape: f32[256,128], index: 1, kind: input, shape index: {}]   ;;  %s1052_s2 = inlined_call_operand.vmem [shape: f32[1,128], index: 2, kind: input, shape index: {}]   ;;  %s1053_s3 = inlined_call_operand.vmem [shape: f32[128,256], index: 3, kind: input, shape index: {}]   ;;  %s1054_s4 = inlined_call_operand.vmem [shape: f32[16,8], index: 4, kind: input, shape index: {}]   ;;  %s1055_s5 = inlined_call_operand.vmem [shape: f32[2,16,256], index: 5, kind: input, shape index: {}]   ;;  %s1056_s6 = inlined_call_operand.vmem [shape: f32[2,16,256], index: 6, kind: output, shape index: {}]  }
   0x1 LB: > { %s648_s22 = sadd.s32 4294967295, %s783_s21   ;;  %p652_p0 = scmp.ge.s32.totalorder %s783_s21, 1  ;;  %s783_s21 = sphi %s821_s21, %s16_s21  }
   0x2   : > { %p222_p1 = scmp.lt.s32.totalorder %s783_s21, 3 }
   0x4   : > { %p223_p2 = pnand %p652_p0, %p222_p1 }
   0x5   : > { %v290_v0 = vld [vmem:[%s1051_s1 + $0x80] sm:$0xff] (!%p223_p2)  ;;  %v291_v1 = vld [vmem:[%s1051_s1 + $0x88] sm:$0xff] (!%p223_p2)  ;;  %p257_p3 = scmp.lt.s32.totalorder (!%p223_p2), %s648_s22, 1  ;;  %v292_v5 = vld [vmem:[%s1051_s1 + $0x90] sm:$0xff] (!%p223_p2)  ;;  %vm493_vm0 = vcmask (!%p223_p2), 64512  }
   0x6   : > { %226 = sbr.rel (%p223_p2) target bundleno = 690 (0x2b2), region = 44  ;;  %v274_v2 = vld [vmem:[%s1051_s1] sm:$0xff] (!%p223_p2)  ;;  %v702_v3 = vpack.c.bf16 (!%p223_p2), %v291_v1, %v290_v0  ;;  %v275_v4 = vld [vmem:[%s1051_s1 + $0x8] sm:$0xff] (!%p223_p2)  ;;  %v293_v6 = vld [vmem:[%s1051_s1 + $0x98] sm:$0xff] (!%p223_p2) }
   0x7   : > { %v704_v7 = vpack.c.bf16 (!%p223_p2), %v275_v4, %v274_v2  ;;  %v706_v8 = vpack.c.bf16 (!%p223_p2), %v293_v6, %v292_v5  ;;  %v276_v9 = vld [vmem:[%s1051_s1 + $0x10] sm:$0xff] (!%p223_p2)  ;;  %v277_v10 = vld [vmem:[%s1051_s1 + $0x18] sm:$0xff] (!%p223_p2)  ;;  %v294_v11 = vld [vmem:[%s1051_s1 + $0xa0] sm:$0xff] (!%p223_p2) }
   0x8   : > { %703 = vmatprep.subr.bf16.mxu0 (!%p223_p2), %v702_v3  ;;  %v295_v12 = vld [vmem:[%s1051_s1 + $0xa8] sm:$0xff] (!%p223_p2)  ;;  %v708_v13 = vpack.c.bf16 (!%p223_p2), %v277_v10, %v276_v9  ;;  %v278_v15 = vld [vmem:[%s1051_s1 + $0x20] sm:$0xff] (!%p223_p2)  ;;  %v296_v17 = vld [vmem:[%s1051_s1 + $0xb0] sm:$0xff] (!%p223_p2) }
   0x9   : > { %705 = vmatpush3.bf16.msra.mxu0 (!%p223_p2), %v704_v7  ;;  %v710_v14 = vpack.c.bf16 (!%p223_p2), %v295_v12, %v294_v11  ;;  %v279_v16 = vld [vmem:[%s1051_s1 + $0x28] sm:$0xff] (!%p223_p2)  ;;  %v297_v18 = vld [vmem:[%s1051_s1 + $0xb8] sm:$0xff] (!%p223_p2)  ;;  %v280_v21 = vld [vmem:[%s1051_s1 + $0x30] sm:$0xff] (!%p223_p2) }
   0xa   : > { %707 = vmatprep.subr.bf16.mxu0 (!%p223_p2), %v706_v8  ;;  %v712_v19 = vpack.c.bf16 (!%p223_p2), %v279_v16, %v278_v15  ;;  %v714_v20 = vpack.c.bf16 (!%p223_p2), %v297_v18, %v296_v17  ;;  %v281_v22 = vld [vmem:[%s1051_s1 + $0x38] sm:$0xff] (!%p223_p2)  ;;  %v298_v23 = vld [vmem:[%s1051_s1 + $0xc0] sm:$0xff] (!%p223_p2)  ;;  %v299_v24 = vld [vmem:[%s1051_s1 + $0xc8] sm:$0xff] (!%p223_p2) }
   0xb   : > { %v282_v26 = vld [vmem:[%s1051_s1 + $0x40] sm:$0xff] (!%p223_p2)  ;;  %v283_v27 = vld [vmem:[%s1051_s1 + $0x48] sm:$0xff] (!%p223_p2)  ;;  %v387_v29 = vld [vmem:[%s1053_s3 + $0x18] sm:$0xff] (!%p223_p2)  ;;  %v716_v30 = vpack.c.bf16 (!%p223_p2), %v281_v22, %v280_v21  ;;  %v718_v36 = vpack.c.bf16 (!%p223_p2), %v299_v24, %v298_v23 }
   0xc   : > { %v385_v28 = vld [vmem:[%s1053_s3 + $0x8] sm:$0xff] (!%p223_p2)  ;;  %v300_v31 = vld [vmem:[%s1051_s1 + $0xd0] sm:$0xff] (!%p223_p2)  ;;  %v384_v33 = vld [vmem:[%s1053_s3] sm:$0xff] (!%p223_p2)  ;;  %v720_v46 = vpack.c.bf16 (!%p223_p2), %v283_v27, %v282_v26 }
   0xd   : > { %s1058_s22 = smov (!%p257_p3, %s648_s22), 1  ;;  %709 = vmatpush3.bf16.msra.mxu0 %v708_v13  ;;  %v734_v32 = vpack.c.bf16 %v387_v29, %v385_v28  ;;  %v386_v34 = vld [vmem:[%s1053_s3 + $0x10] sm:$0xff]  ;;  %v389_v35 = vld [vmem:[%s1053_s3 + $0x28] sm:$0xff]  ;;  %v391_v38 = vld [vmem:[%s1053_s3 + $0x38] sm:$0xff] }
   0xe   : > { %s664_s19 = sshll.u32 %s1058_s22, 4  ;;  %711 = vmatprep.subr.bf16.mxu0 %v710_v14  ;;  %v736_v37 = vpack.c.bf16 %v386_v34, %v384_v33  ;;  %v388_v39 = vld [vmem:[%s1053_s3 + $0x20] sm:$0xff]  ;;  %v390_v40 = vld [vmem:[%s1053_s3 + $0x30] sm:$0xff]  ;;  %v301_v41 = vld [vmem:[%s1051_s1 + $0xd8] sm:$0xff]  ;;  %v738_v42 = vpack.c.bf16 %v391_v38, %v389_v35  ;;  %v785_v34 = vmov 0.0   ;;  %s665_s9 = sshll.u32 %s1058_s22, 5 }
   0xf   : > { %s877_s8 = scalar_lea.vmem %s1050_s0, %s664_s19  ;;  %735 = vmatprep.subr.bf16.mxu1 %v734_v32  ;;  %v393_v43 = vld [vmem:[%s1053_s3 + $0x48] sm:$0xff]  ;;  %v395_v44 = vld [vmem:[%s1053_s3 + $0x58] sm:$0xff]  ;;  %v740_v45 = vpack.c.bf16 %v390_v40, %v388_v39  ;;  %v284_v47 = vld [vmem:[%s1051_s1 + $0x50] sm:$0xff]  ;;  %v722_v51 = vpack.c.bf16 %v301_v41, %v300_v31  ;;  %480 = vmatprep.mubr.f32.mxu1 %v785_v34  ;;  %s266_s12 = scalar_lea.vmem %s1055_s5, %s665_s9 }
  0x10   : > { %v273_v25 = vld [vmem:[%s877_s8 + $0x8] sm:$0xff]  ;;  %737 = vmatpush1.bf16.msra.mxu1 %v736_v37  ;;  %v742_v48 = vpack.c.bf16 %v395_v44, %v393_v43  ;;  %v392_v49 = vld [vmem:[%s1053_s3 + $0x40] sm:$0xff]  ;;  %v394_v50 = vld [vmem:[%s1053_s3 + $0x50] sm:$0xff]  ;;  %s271_s15 = scalar_lea.vmem %s1056_s6, %s665_s9 }
  0x11   : > { %377 = vmatprep.mubr.f32.mxu0 %v273_v25  ;;  %713 = vmatpush3.bf16.msra.mxu0 %v712_v19  ;;  %v285_v52 = vld [vmem:[%s1051_s1 + $0x58] sm:$0xff]  ;;  %v397_v53 = vld [vmem:[%s1053_s3 + $0x68] sm:$0xff]  ;;  %v302_v55 = vld [vmem:[%s1051_s1 + $0xe0] sm:$0xff]  ;;  %v744_v57 = vpack.c.bf16 %v394_v50, %v392_v49 }
  0x12   : > { %715 = vmatprep.subr.bf16.mxu0 %v714_v20  ;;  %739 = vmatprep.subr.bf16.mxu1 %v738_v42  ;;  %v399_v54 = vld [vmem:[%s1053_s3 + $0x78] sm:$0xff]  ;;  %v303_v56 = vld [vmem:[%s1051_s1 + $0xe8] sm:$0xff]  ;;  %v724_v58 = vpack.c.bf16 %v285_v52, %v284_v47  ;;  %v286_v59 = vld [vmem:[%s1051_s1 + $0x60] sm:$0xff] }
  0x13   : > { %v746_v60 = vpack.c.bf16 %v399_v54, %v397_v53  ;;  %v396_v61 = vld [vmem:[%s1053_s3 + $0x60] sm:$0xff]  ;;  %v398_v62 = vld [vmem:[%s1053_s3 + $0x70] sm:$0xff]  ;;  %v726_v63 = vpack.c.bf16 %v303_v56, %v302_v55  ;;  %v287_v0 = vld [vmem:[%s1051_s1 + $0x68] sm:$0xff] }
  0x14   : > { %741 = vmatpush1.bf16.msra.mxu1 %v740_v45  ;;  %v401_v1 = vld [vmem:[%s1053_s3 + $0x88] sm:$0xff]  ;;  %v403_v2 = vld [vmem:[%s1053_s3 + $0x98] sm:$0xff]  ;;  %v304_v3 = vld [vmem:[%s1051_s1 + $0xf0] sm:$0xff]  ;;  %v748_v5 = vpack.c.bf16 %v398_v62, %v396_v61  ;;  %v728_v6 = vpack.c.bf16 %v287_v0, %v286_v59 }
  0x15   : > { %717 = vmatpush3.bf16.msra.mxu0 %v716_v30  ;;  %743 = vmatprep.subr.bf16.mxu1 %v742_v48  ;;  %v305_v4 = vld [vmem:[%s1051_s1 + $0xf8] sm:$0xff]  ;;  %v288_v7 = vld [vmem:[%s1051_s1 + $0x70] sm:$0xff]  ;;  %v750_v8 = vpack.c.bf16 %v403_v2, %v401_v1  ;;  %v400_v9 = vld [vmem:[%s1053_s3 + $0x80] sm:$0xff] }
  0x16   : > { %719 = vmatprep.subr.bf16.mxu0 %v718_v36  ;;  %v402_v10 = vld [vmem:[%s1053_s3 + $0x90] sm:$0xff]  ;;  %v730_v11 = vpack.c.bf16 %v305_v4, %v304_v3  ;;  %v289_v12 = vld [vmem:[%s1051_s1 + $0x78] sm:$0xff]  ;;  %v405_v13 = vld [vmem:[%s1053_s3 + $0xa8] sm:$0xff] }
  0x17   : > { %v407_v14 = vld [vmem:[%s1053_s3 + $0xb8] sm:$0xff]  ;;  %v752_v15 = vpack.c.bf16 %v402_v10, %v400_v9  ;;  %v732_v16 = vpack.c.bf16 %v289_v12, %v288_v7  ;;  %v404_v18 = vld [vmem:[%s1053_s3 + $0xa0] sm:$0xff]  ;;  %v406_v19 = vld [vmem:[%s1053_s3 + $0xb0] sm:$0xff] }
  0x18   : > { %745 = vmatpush1.bf16.msra.mxu1 %v744_v57  ;;  %v754_v17 = vpack.c.bf16 %v407_v14, %v405_v13  ;;  %v756_v20 = vpack.c.bf16 %v406_v19, %v404_v18  ;;  %v272_v21 = vld [vmem:[%s877_s8] sm:$0xff]  ;;  %v409_v22 = vld [vmem:[%s1053_s3 + $0xc8] sm:$0xff]  ;;  %v411_v23 = vld [vmem:[%s1053_s3 + $0xd8] sm:$0xff] }
  0x19   : > { %721 = vmatpush3.bf16.msra.mxu0 %v720_v46  ;;  %747 = vmatprep.subr.bf16.mxu1 %v746_v60  ;;  %v758_v24 = vpack.c.bf16 %v411_v23, %v409_v22  ;;  %v408_v25 = vld [vmem:[%s1053_s3 + $0xc0] sm:$0xff]  ;;  %v410_v26 = vld [vmem:[%s1053_s3 + $0xd0] sm:$0xff]  ;;  %v413_v28 = vld [vmem:[%s1053_s3 + $0xe8] sm:$0xff] }
  0x1a   : > { %723 = vmatprep.subr.bf16.mxu0 %v722_v51  ;;  %v760_v27 = vpack.c.bf16 %v410_v26, %v408_v25  ;;  %v415_v29 = vld [vmem:[%s1053_s3 + $0xf8] sm:$0xff]  ;;  %v412_v31 = vld [vmem:[%s1053_s3 + $0xe0] sm:$0xff]  ;;  %v414_v32 = vld [vmem:[%s1053_s3 + $0xf0] sm:$0xff] }
  0x1b   : > { %v762_v30 = vpack.c.bf16 %v415_v29, %v413_v28  ;;  %v764_v33 = vpack.c.bf16 %v414_v32, %v412_v31  ;;  %v659_v36 = vld [vmem:[%s1052_s2] ss:$0 sm:$0xff]  ;;  %v488_v44 = vld [vmem:[%s1054_s4 + $0x8] sm:$0xff]  ;;  %v491_v46 = vld [vmem:[%s266_s12 + $0x10] sm:$0xff] }
  0x1c   : > { %749 = vmatpush1.bf16.msra.mxu1 %v748_v5  ;;  %v487_v43 = vld [vmem:[%s1054_s4] sm:$0xff]  ;;  %v490_v47 = vld [vmem:[%s266_s12 + $0x8] sm:$0xff]  ;;  %v492_v48 = vld [vmem:[%s266_s12 + $0x18] sm:$0xff] }
  0x1d   : > { %725 = vmatpush3.bf16.msra.mxu0 %v724_v58  ;;  %751 = vmatprep.subr.bf16.mxu1 %v750_v8  ;;  %v489_v45 = vld [vmem:[%s266_s12] sm:$0xff] }
  0x1e   : > { %727 = vmatprep.subr.bf16.mxu0 %v726_v63 }
  0x20   : > { %753 = vmatpush1.bf16.msra.mxu1 %v752_v15 }
  0x21   : > { %729 = vmatpush3.bf16.msra.mxu0 %v728_v6  ;;  %755 = vmatprep.subr.bf16.mxu1 %v754_v17 }
  0x22   : > { %731 = vmatprep.subr.bf16.mxu0 %v730_v11 }
  0x24   : > { %757 = vmatpush1.bf16.msra.mxu1 %v756_v20 }
  0x25   : > { %733 = vmatpush3.bf16.msra.mxu0 %v732_v16  ;;  %759 = vmatprep.subr.bf16.mxu1 %v758_v24 }
  0x28   : > { %378 = vmatmul.mubr.f32.vlgmr.msra.gmra.mrb[0].mxu0 %v272_v21  ;;  %761 = vmatpush1.bf16.msra.mxu1 %v760_v27 }
  0x29   : > { %763 = vmatprep.subr.bf16.mxu1 %v762_v30  ;;  %564 = vmatprep.mubr.f32.mxu0 %v785_v34 }
  0x2c   : > { %765 = vmatpush1.bf16.msra.mxu1 %v764_v33 }
  0xfb   : > { %v699_v35 = vpop.f32.mrb[0].mxu0 }
  0xfc   : > { %v700_v37 = vpop.f32.mrb[1].mxu0 }
  0xfd   : > { %v701_v38 = vadd.f32 %v700_v37, %v699_v35 }
  0xff   : > { %v380_v39 = vadd.f32 %v701_v38, %v659_v36 }
 0x101   : > { %v383_v40 = vmax.f32 %v380_v39, 0.0 }
 0x103   : > { %481 = vmatmul.mubr.f32.vlgmr.msra.gmra.mrb[0].mxu1 %v383_v40 }
 0x104   : > { %570 = vmatprep.mubr.f32.mxu1 %v785_v34 }
 0x1d6   : > { %v482_v41 = vpop.f32.mrb[0].mxu1 }
 0x1d7   : > { %v484_v42 = vpop.f32.mrb[1].mxu1 }
 0x1d8   : > { %500 = vmatprep.subr.mxu0 %v484_v42  ;;  %766 = vmatprep.subr.mxu1 %v484_v42 }
 0x1d9   : > { %501 = vmatpush1.msra.mxu0 %v482_v41  ;;  %767 = vmatpush1.msra.mxu1 %v482_v41 }
 0x1da   : > { %660 = vmatmul.mubr.msk.f32.vlgmr.msra.gmra.mrb[2].mxu0 %vm493_vm0, %v487_v43  ;;  %661 = vmatmul.mubr.msk.f32.vlgmr.msra.gmra.mrb[2].mxu1 %vm493_vm0, %v488_v44 }
 0x2ad   : > { %v566_v49 = vpop.f32.mrb[2].mxu0  ;;  %v572_v50 = vpop.f32.mrb[2].mxu1 }
 0x2ae   : > { %v567_v51 = vadd.f32 %v566_v49, %v489_v45  ;;  %v573_v52 = vadd.f32 %v572_v50, %v491_v46  ;;  %v568_v53 = vpop.f32.mrb[3].mxu0  ;;  %v574_v54 = vpop.f32.mrb[3].mxu1 }
 0x2af   : > { %v569_v55 = vadd.f32 %v568_v53, %v490_v47  ;;  %v575_v56 = vadd.f32 %v574_v54, %v492_v48 }
 0x2b0   : > { %577 = vst [vmem:[%s271_s15] sm:$0xff] %v567_v51  ;;  %579 = vst [vmem:[%s271_s15 + $0x10] sm:$0xff] %v573_v52 }
 0x2b1   : > { %578 = vst [vmem:[%s271_s15 + $0x8] sm:$0xff] %v569_v55  ;;  %580 = vst [vmem:[%s271_s15 + $0x18] sm:$0xff] %v575_v56 }
 0x2b2 PF: > { %s16_s21 = sadd.s32 1, %s783_s21  }
 0x2b3   : > { %p13_p4 = scmp.ge.s32.totalorder %s16_s21, 4  }
 0x2b5   :  { %15 = sbr.rel (!%p13_p4) target bundleno = 1 (0x1), region = 77 }

// kernel: run.10
= control target key start
LH: loop header
LB: loop body
LE: loop exit
PB: predicated region body
PF: predicated region fallthrough
CT: control target
= control target key end

     0   :  { %s1265_s13 = smov 0   ;;  %s1769_s0 = inlined_call_operand.vmem [shape: f32[2,8,256], index: 0, kind: input, shape index: {}]   ;;  %s1770_s1 = inlined_call_operand.vmem [shape: f32[2,8,256], index: 1, kind: input, shape index: {}]   ;;  %s1771_s2 = inlined_call_operand.vmem [shape: f32[9,256], index: 2, kind: input, shape index: {}]   ;;  %s1772_s3 = inlined_call_operand.vmem [shape: f32[1,256], index: 3, kind: input, shape index: {}]   ;;  %s1773_s4 = inlined_call_operand.vmem [shape: f32[2,256], index: 4, kind: input, shape index: {}]   ;;  %s1774_s5 = inlined_call_operand.vmem [shape: f32[2,1], index: 5, kind: input, shape index: {}]   ;;  %s1775_s6 = inlined_call_operand.vmem [shape: f32[2,256], index: 6, kind: input, shape index: {}]   ;;  %s1776_s7 = inlined_call_operand.vmem [shape: f32[1,256], index: 7, kind: input, shape index: {}]   ;;  %s1777_s8 = inlined_call_operand.vmem [shape: f32[256,256], index: 8, kind: input, shape index: {}]   ;;  %s1778_s9 = inlined_call_operand.vmem [shape: f32[256,256], index: 9, kind: input, shape index: {}]   ;;  %s1779_s10 = inlined_call_operand.vmem [shape: f32[2,8,256], index: 10, kind: output, shape index: {}]  }
   0x1 LB: > { %s1026_s14 = sadd.s32 4294967295, %s1205_s13   ;;  %p1030_p0 = scmp.ge.s32.totalorder %s1205_s13, 1  ;;  %s1205_s13 = sphi %s1265_s13, %s20_s13  }
   0x2   : > { %p322_p1 = scmp.lt.s32.totalorder %s1205_s13, 3 }
   0x4   : > { %p323_p2 = pnand %p1030_p0, %p322_p1 }
   0x5   : > { %p365_p3 = scmp.lt.s32.totalorder (!%p323_p2), %s1026_s14, 1  ;;  %s1207_s22 = smov (!%p323_p2), 32   ;;  %vm392_vm0 = vcmask (!%p323_p2), 1040384   ;;  %vm399_vm1 = vcmask (!%p323_p2), 1046528   ;;  %v418_v14 = vlaneseq (!%p323_p2)  ;;  %v402_v18 = vld [vmem:[%s1771_s2] sm:$0xff] (!%p323_p2)  ;;  %v403_v20 = vld [vmem:[%s1771_s2 + $0x8] sm:$0xff] (!%p323_p2) }
   0x6   : > { %326 = sbr.rel (%p323_p2) target bundleno = 725 (0x2d5), region = 60  ;;  %s1208_s23 = smov (!%p323_p2), 96   ;;  %vm413_vm2 = vcmask (!%p323_p2), 261120   ;;  %vm444_vm3 = vcmask (!%p323_p2), 785408   ;;  %vm608_vm4 = vcmask (!%p323_p2), 1041408  }
   0x7   : > { %v419_v15 = vshrl.u32 (!%p323_p2), %v418_v14, 7 }
   0x9   : > { %v1306_v16 = vsub.s32 (!%p323_p2), 1, %v419_v15  ;;  %v1308_v17 = vsub.s32 (!%p323_p2), 0, %v419_v15  ;;  %v451_v23 = vsub.s32 (!%p323_p2), 2, %v419_v15  ;;  %v471_v24 = vsub.s32 (!%p323_p2), 3, %v419_v15 }
   0xa   : > { %v483_v28 = vsub.s32 (!%p323_p2), 4, %v419_v15  ;;  %v503_v41 = vsub.s32 (!%p323_p2), 5, %v419_v15  ;;  %v537_v50 = vsub.s32 (!%p323_p2), 7, %v419_v15  ;;  %v525_v60 = vsub.s32 (!%p323_p2), 6, %v419_v15 }
   0xb   : > { %v431_v21 = vrot.slane (!%p323_p2), %v402_v18, %v1306_v16  ;;  %v421_v22 = vrot.slane (!%p323_p2), %v402_v18, %v1308_v17  ;;  %v435_v25 = vrot.slane (!%p323_p2), %v403_v20, %v1306_v16  ;;  %v425_v30 = vrot.slane (!%p323_p2), %v403_v20, %v1308_v17 }
   0xc   : > { %v452_v33 = vrot.slane (!%p323_p2), %v402_v18, %v451_v23  ;;  %v456_v34 = vrot.slane (!%p323_p2), %v403_v20, %v451_v23  ;;  %v472_v35 = vrot.slane (!%p323_p2), %v402_v18, %v471_v24  ;;  %v476_v39 = vrot.slane (!%p323_p2), %v403_v20, %v471_v24 }
   0xd   : > { %s1781_s14 = smov (!%p365_p3, %s1026_s14), 1  ;;  %v488_v40 = vrot.slane %v403_v20, %v483_v28  ;;  %v484_v45 = vrot.slane %v402_v18, %v483_v28  ;;  %v508_v55 = vrot.slane %v403_v20, %v503_v41  ;;  %v504_v59 = vrot.slane %v402_v18, %v503_v41  ;;  %v1038_v28 = vld [vmem:[%s1771_s2 + $0x18] ss:$0 sm:$0xff] }
   0xe   : > { %s1273_s15 = sshll.u32 %s1781_s14, 4  ;;  %v530_v14 = vrot.slane %v403_v20, %v525_v60 }
   0xf   : > { %s369_s18 = scalar_lea.vmem %s1769_s0, %s1273_s15  ;;  %s374_s21 = scalar_lea.vmem %s1770_s1, %s1273_s15 }
  0x10   : > { %v381_v0 = vld [vmem:[%s369_s18 + $0x8] sm:$0xff]  ;;  %v382_v1 = vld [vmem:[%s374_s21] sm:$0xff]  ;;  %s379_s30 = scalar_lea.vmem %s1779_s10, %s1273_s15 }
  0x11   : > { %v383_v2 = vld [vmem:[%s374_s21 + $0x8] sm:$0xff]  ;;  %v1285_v4 = vld [vmem:[%s369_s18] sm:$0xff]  ;;  %950 = vmatprep.mubr.f32.mxu0 %v381_v0 }
  0x12   : > { %v1283_v3 = vmul.f32 %v383_v2, %v381_v0  ;;  %v1288_v5 = vmul.f32 %v382_v1, %v1285_v4  ;;  %v542_v2 = vrot.slane %v403_v20, %v537_v50 }
  0x14   : > { %463 = vrot.lane.b32.xlu1 %v1283_v3, %s1207_s22  ;;  %v388_v6 = vrot.slane %v1288_v5, 7  ;;  %v389_v7 = vrot.slane %v1283_v3, 7  ;;  %v396_v10 = vrot.slane %v1283_v3, 1  ;;  %v395_v12 = vrot.slane %v1288_v5, 1 }
  0x15   : > { %v490_v54 = vmul.f32 %v488_v40, %v1283_v3  ;;  %v489_v0 = vmul.f32 %v484_v45, %v1288_v5 }
  0x16   : > { %v393_v8 = vsel %vm392_vm0, 0.0, %v388_v6  ;;  %v394_v9 = vsel %vm392_vm0, 0.0, %v389_v7  ;;  %v1296_v11 = vsel %vm399_vm1, %v396_v10, 0.0  ;;  %v1301_v13 = vsel %vm399_vm1, %v395_v12, 0.0 }
  0x17   : > { %409 = vrot.lane.b32.xlu0 %v393_v8, %s1207_s22  ;;  %v436_v31 = vmul.f32 %v431_v21, %v393_v8  ;;  %v437_v36 = vmul.f32 %v435_v25, %v394_v9  ;;  %v526_v12 = vrot.slane %v402_v18, %v525_v60  ;;  %v544_v23 = vmul.f32 %v542_v2, %v1296_v11 }
  0x18   : > { %440 = vrot.lane.b32.xlu1 %v393_v8, %s1208_s23 }
  0x1b   : > { %411 = vrot.lane.b32.xlu0 %v394_v9, %s1207_s22 }
  0x1c   : > { %442 = vrot.lane.b32.xlu1 %v394_v9, %s1208_s23  ;;  %v538_v9 = vrot.slane %v402_v18, %v537_v50 }
  0x1e   : > { %v543_v25 = vmul.f32 %v538_v9, %v1301_v13 }
  0x1f   : > { %461 = vrot.lane.b32.xlu0 %v1288_v5, %s1207_s22 }
  0x20   : > { %495 = vrot.lane.b32.xlu1 %v1283_v3, %s1208_s23 }
  0x23   : > { %493 = vrot.lane.b32.xlu0 %v1288_v5, %s1208_s23 }
  0x24   : > { %517 = vrot.lane.b32.xlu1 %v1296_v11, %s1207_s22 }
  0x27   : > { %515 = vrot.lane.b32.xlu0 %v1301_v13, %s1207_s22 }
  0x28   : > { %549 = vrot.lane.b32.xlu1 %v1296_v11, %s1208_s23  ;;  %v406_v11 = vld [vmem:[%s1772_s3] sm:$0x3] }
  0x2b   : > { %547 = vrot.lane.b32.xlu0 %v1301_v13, %s1208_s23  ;;  %v1037_v13 = vld [vmem:[%s1771_s2 + $0x10] ss:$0 sm:$0xff] }
  0x86   : > { %v464_v19 = vpop.permute.xlu1 %463 }
  0x89   : > { %v410_v26 = vpop.permute.xlu0 %409 }
  0x8a   : > { %v441_v27 = vpop.permute.xlu1 %440  ;;  %v417_v29 = vsel %vm413_vm2, 0.0, %v410_v26 }
  0x8b   : > { %v426_v32 = vmul.f32 %v421_v22, %v417_v29 }
  0x8d   : > { %v412_v37 = vpop.permute.xlu0 %411  ;;  %v438_v46 = vadd.f32 %v436_v31, %v426_v32 }
  0x8e   : > { %v443_v38 = vpop.permute.xlu1 %442  ;;  %v414_v42 = vsel %vm413_vm2, %v410_v26, %v412_v37 }
  0x8f   : > { %v445_v43 = vsel %vm444_vm3, %v441_v27, %v443_v38  ;;  %v448_v44 = vsel %vm444_vm3, %v443_v38, 0.0  ;;  %v427_v47 = vmul.f32 %v425_v30, %v414_v42 }
  0x90   : > { %v457_v48 = vmul.f32 %v452_v33, %v445_v43  ;;  %v458_v49 = vmul.f32 %v456_v34, %v448_v44 }
  0x91   : > { %v439_v51 = vadd.f32 %v437_v36, %v427_v47  ;;  %v462_v53 = vpop.permute.xlu0 %461  ;;  %v575_v36 = vrot.slane %v406_v11, %v1306_v16 }
  0x92   : > { %v459_v52 = vadd.f32 %v457_v48, %v438_v46  ;;  %v496_v56 = vpop.permute.xlu1 %495  ;;  %v465_v57 = vsel %vm413_vm2, %v462_v53, %v464_v19  ;;  %v468_v58 = vsel %vm413_vm2, 0.0, %v462_v53 }
  0x93   : > { %v460_v61 = vadd.f32 %v458_v49, %v439_v51  ;;  %v477_v62 = vmul.f32 %v472_v35, %v468_v58  ;;  %v478_v63 = vmul.f32 %v476_v39, %v465_v57  ;;  %v500_v1 = vsel %vm444_vm3, %v496_v56, 0.0 }
  0x94   : > { %v510_v21 = vmul.f32 %v508_v55, %v500_v1  ;;  %v571_v39 = vrot.slane %v406_v11, %v1308_v17  ;;  %v696_v11 = vld [vmem:[%s1777_s8 + $0x48] sm:$0xff] }
  0x95   : > { %v479_v6 = vadd.f32 %v477_v62, %v459_v52  ;;  %v480_v7 = vadd.f32 %v478_v63, %v460_v61  ;;  %v494_v8 = vpop.permute.xlu0 %493 }
  0x96   : > { %v518_v3 = vpop.permute.xlu1 %517  ;;  %v497_v10 = vsel %vm444_vm3, %v494_v8, %v496_v56  ;;  %v690_v8 = vld [vmem:[%s1777_s8 + $0x18] sm:$0xff] }
  0x97   : > { %v492_v19 = vadd.f32 %v490_v54, %v480_v7  ;;  %v491_v15 = vadd.f32 %v489_v0, %v479_v6  ;;  %v509_v22 = vmul.f32 %v504_v59, %v497_v10  ;;  %v1039_v54 = vld.sshfl [vmem:[%s1773_s4] sm:$0x33 pattern:$0x76325410]  ;;  %v1209_v6 = vmov 0   ;;  %v688_v7 = vld [vmem:[%s1777_s8 + $0x8] sm:$0xff] }
  0x98   : > { %v603_v59 = vcombine.high %v1039_v54, %v1039_v54  ;;  %1189 = vset.pattern.permute.xlu1 %v1209_v6  ;;  %1190 = vset.pattern.permute.xlu0 %v1209_v6  ;;  %v1112_v9 = vpack.c.bf16 %v690_v8, %v688_v7  ;;  %v754_v10 = vld [vmem:[%s1778_s9 + $0x18] sm:$0xff]  ;;  %v703_v6 = vld [vmem:[%s1777_s8 + $0x80] sm:$0xff]  ;;  %v705_v8 = vld [vmem:[%s1777_s8 + $0x90] sm:$0xff] }
  0x99   : > { %v516_v24 = vpop.permute.xlu0 %515  ;;  %v512_v20 = vadd.f32 %v510_v21, %v492_v19  ;;  %v511_v29 = vadd.f32 %v509_v22, %v491_v15  ;;  %v751_v15 = vld [vmem:[%s1778_s9] sm:$0xff]  ;;  %v753_v22 = vld [vmem:[%s1778_s9 + $0x10] sm:$0xff] }
  0x9a   : > { %v550_v5 = vpop.permute.xlu1 %549  ;;  %v519_v26 = vsel %vm413_vm2, %v516_v24, %v518_v3  ;;  %v522_v27 = vsel %vm413_vm2, 0.0, %v516_v24  ;;  %v752_v3 = vld [vmem:[%s1778_s9 + $0x8] sm:$0xff]  ;;  %1113 = vmatprep.subr.bf16.mxu0 %v1112_v9  ;;  %v1050_v24 = vpack.c.bf16 %v753_v22, %v751_v15  ;;  %v769_v9 = vld [vmem:[%s1778_s9 + $0x90] sm:$0xff]  ;;  %v774_v22 = vld [vmem:[%s1778_s9 + $0xb8] sm:$0xff] }
  0x9b   : > { %v554_v18 = vsel %vm444_vm3, %v550_v5, 0.0  ;;  %v531_v30 = vmul.f32 %v526_v12, %v522_v27  ;;  %v532_v31 = vmul.f32 %v530_v14, %v519_v26  ;;  %v687_v12 = vld [vmem:[%s1777_s8] sm:$0xff]  ;;  %v689_v14 = vld [vmem:[%s1777_s8 + $0x10] sm:$0xff]  ;;  %v1048_v19 = vpack.c.bf16 %v754_v10, %v752_v3  ;;  %v758_v26 = vld [vmem:[%s1778_s9 + $0x38] sm:$0xff] }
  0x9c   : > { %v564_v34 = vmul.f32 %v1038_v28, %v554_v18  ;;  %v1114_v21 = vpack.c.bf16 %v689_v14, %v687_v12  ;;  %v691_v18 = vld [vmem:[%s1777_s8 + $0x20] sm:$0xff]  ;;  %v1130_v10 = vpack.c.bf16 %v705_v8, %v703_v6  ;;  %v708_v14 = vld [vmem:[%s1777_s8 + $0xa8] sm:$0xff]  ;;  %v790_v6 = vld [vmem:[%s1778_s9 + $0x138] sm:$0xff] }
  0x9d   : > { %v533_v32 = vadd.f32 %v531_v30, %v511_v29  ;;  %v534_v33 = vadd.f32 %v532_v31, %v512_v20  ;;  %v548_v35 = vpop.permute.xlu0 %547  ;;  %1049 = vmatprep.subr.bf16.mxu1 %v1048_v19  ;;  %v693_v20 = vld [vmem:[%s1777_s8 + $0x30] sm:$0xff]  ;;  %v755_v29 = vld [vmem:[%s1778_s9 + $0x20] sm:$0xff]  ;;  %v710_v19 = vld [vmem:[%s1777_s8 + $0xb8] sm:$0xff] }
  0x9e   : > { %v551_v37 = vsel %vm444_vm3, %v548_v35, %v550_v5  ;;  %v694_v5 = vld [vmem:[%s1777_s8 + $0x38] sm:$0xff]  ;;  %1115 = vmatpush1.bf16.msra.mxu0 %v1114_v21  ;;  %1051 = vmatpush1.bf16.msra.mxu1 %v1050_v24  ;;  %v1118_v30 = vpack.c.bf16 %v693_v20, %v691_v18  ;;  %v757_v31 = vld [vmem:[%s1778_s9 + $0x30] sm:$0xff]  ;;  %v767_v3 = vld [vmem:[%s1778_s9 + $0x80] sm:$0xff]  ;;  %v1132_v21 = vpack.c.bf16 %v710_v19, %v708_v14 }
  0x9f   : > { %v546_v38 = vadd.f32 %v544_v23, %v534_v33  ;;  %v545_v40 = vadd.f32 %v543_v25, %v533_v32  ;;  %v563_v41 = vmul.f32 %v1037_v13, %v551_v37  ;;  %v692_v23 = vld [vmem:[%s1777_s8 + $0x28] sm:$0xff]  ;;  %v698_v13 = vld [vmem:[%s1777_s8 + $0x58] sm:$0xff]  ;;  %v1054_v32 = vpack.c.bf16 %v757_v31, %v755_v29 }
  0xa0   : > { %v756_v25 = vld [vmem:[%s1778_s9 + $0x28] sm:$0xff]  ;;  %v1116_v27 = vpack.c.bf16 %v694_v5, %v692_v23  ;;  %v1120_v33 = vpack.c.bf16 %v698_v13, %v696_v11  ;;  %v762_v35 = vld [vmem:[%s1778_s9 + $0x58] sm:$0xff]  ;;  %v1066_v12 = vpack.c.bf16 %v769_v9, %v767_v3  ;;  %v707_v23 = vld [vmem:[%s1777_s8 + $0xa0] sm:$0xff] }
  0xa1   : > { %v566_v42 = vadd.f32 %v564_v34, %v546_v38  ;;  %v565_v43 = vadd.f32 %v563_v41, %v545_v40  ;;  %v1052_v28 = vpack.c.bf16 %v758_v26, %v756_v25  ;;  %v760_v34 = vld [vmem:[%s1778_s9 + $0x48] sm:$0xff]  ;;  %v697_v38 = vld [vmem:[%s1777_s8 + $0x50] sm:$0xff]  ;;  %v771_v25 = vld [vmem:[%s1778_s9 + $0xa0] sm:$0xff] }
  0xa2   : > { %1117 = vmatprep.subr.bf16.mxu0 %v1116_v27  ;;  %v1056_v37 = vpack.c.bf16 %v762_v35, %v760_v34  ;;  %v761_v40 = vld [vmem:[%s1778_s9 + $0x50] sm:$0xff]  ;;  %v772_v15 = vld [vmem:[%s1778_s9 + $0xa8] sm:$0xff]  ;;  %v714_v20 = vld [vmem:[%s1777_s8 + $0xd8] sm:$0xff] }
  0xa3   : > { %v579_v44 = vadd.f32 %v575_v36, %v566_v42  ;;  %v578_v45 = vadd.f32 %v571_v39, %v565_v43  ;;  %1053 = vmatprep.subr.bf16.mxu1 %v1052_v28  ;;  %v695_v36 = vld [vmem:[%s1777_s8 + $0x40] sm:$0xff]  ;;  %1119 = vmatpush1.bf16.msra.mxu0 %v1118_v30  ;;  %v700_v42 = vld [vmem:[%s1777_s8 + $0x68] sm:$0xff]  ;;  %v702_v43 = vld [vmem:[%s1777_s8 + $0x78] sm:$0xff]  ;;  %v1068_v24 = vpack.c.bf16 %v774_v22, %v772_v15 }
  0xa4   : > { %v759_v39 = vld [vmem:[%s1778_s9 + $0x40] sm:$0xff]  ;;  %v1122_v41 = vpack.c.bf16 %v697_v38, %v695_v36  ;;  %1055 = vmatpush1.bf16.msra.mxu1 %v1054_v32  ;;  %1121 = vmatprep.subr.bf16.mxu0 %v1120_v33  ;;  %v709_v5 = vld [vmem:[%s1777_s8 + $0xb0] sm:$0xff]  ;;  %v712_v18 = vld [vmem:[%s1777_s8 + $0xc8] sm:$0xff] }
  0xa5   : > { %v1347_v46 = vmax.f32 %v579_v44, 0.0  ;;  %v1349_v47 = vmax.f32 %v578_v45, 0.0  ;;  %v764_v44 = vld [vmem:[%s1778_s9 + $0x68] sm:$0xff]  ;;  %v1058_v45 = vpack.c.bf16 %v761_v40, %v759_v39  ;;  %1057 = vmatprep.subr.bf16.mxu1 %v1056_v37  ;;  %v773_v26 = vld [vmem:[%s1778_s9 + $0xb0] sm:$0xff]  ;;  %v1134_v27 = vpack.c.bf16 %v709_v5, %v707_v23  ;;  %v778_v31 = vld [vmem:[%s1778_s9 + $0xd8] sm:$0xff] }
  0xa6   : > { %v1070_v28 = vpack.c.bf16 %v773_v26, %v771_v25  ;;  %v1136_v29 = vpack.c.bf16 %v714_v20, %v712_v18  ;;  %v776_v30 = vld [vmem:[%s1778_s9 + $0xc8] sm:$0xff]  ;;  %v711_v11 = vld [vmem:[%s1777_s8 + $0xc0] sm:$0xff]  ;;  %v713_v32 = vld [vmem:[%s1777_s8 + $0xd0] sm:$0xff] }
  0xa7   : > { %v588_v48 = vrot.slane %v1347_v46, 4  ;;  %v582_v49 = vrot.slane %v1349_v47, 4  ;;  %1123 = vmatpush1.bf16.msra.mxu0 %v1122_v41  ;;  %v1072_v13 = vpack.c.bf16 %v778_v31, %v776_v30  ;;  %v775_v33 = vld [vmem:[%s1778_s9 + $0xc0] sm:$0xff]  ;;  %v777_v34 = vld [vmem:[%s1778_s9 + $0xd0] sm:$0xff]  ;;  %v1138_v35 = vpack.c.bf16 %v713_v32, %v711_v11  ;;  %v716_v37 = vld [vmem:[%s1777_s8 + $0xe8] sm:$0xff] }
  0xa8   : > { %1059 = vmatpush1.bf16.msra.mxu1 %v1058_v45  ;;  %v1074_v36 = vpack.c.bf16 %v777_v34, %v775_v33  ;;  %v718_v38 = vld [vmem:[%s1777_s8 + $0xf8] sm:$0xff]  ;;  %v780_v40 = vld [vmem:[%s1778_s9 + $0xe8] sm:$0xff]  ;;  %v779_v45 = vld [vmem:[%s1778_s9 + $0xe0] sm:$0xff] }
  0xa9   : > { %v583_v50 = vadd.f32 %v582_v49, %v1349_v47  ;;  %v589_v51 = vadd.f32 %v588_v48, %v1347_v46  ;;  %v1124_v48 = vpack.c.bf16 %v702_v43, %v700_v42  ;;  %v766_v49 = vld [vmem:[%s1778_s9 + $0x78] sm:$0xff]  ;;  %v1140_v39 = vpack.c.bf16 %v718_v38, %v716_v37  ;;  %v715_v42 = vld [vmem:[%s1777_s8 + $0xe0] sm:$0xff]  ;;  %v725_v3 = vld [vmem:[%s1777_s8 + $0x130] sm:$0xff] }
  0xaa   : > { %v782_v41 = vld [vmem:[%s1778_s9 + $0xf8] sm:$0xff]  ;;  %v787_v9 = vld [vmem:[%s1778_s9 + $0x120] sm:$0xff]  ;;  %v728_v19 = vld [vmem:[%s1777_s8 + $0x148] sm:$0xff] }
  0xab   : > { %v584_v52 = vrot.slane %v583_v50, 2  ;;  %v590_v53 = vrot.slane %v589_v51, 2  ;;  %1125 = vmatprep.subr.bf16.mxu0 %v1124_v48  ;;  %v1076_v43 = vpack.c.bf16 %v782_v41, %v780_v40  ;;  %v781_v48 = vld [vmem:[%s1778_s9 + $0xf0] sm:$0xff]  ;;  %v792_v22 = vld [vmem:[%s1778_s9 + $0x148] sm:$0xff]  ;;  %v794_v23 = vld [vmem:[%s1778_s9 + $0x158] sm:$0xff] }
  0xac   : > { %v1088_v5 = vpack.c.bf16 %v794_v23, %v792_v22  ;;  %v729_v25 = vld [vmem:[%s1777_s8 + $0x150] sm:$0xff]  ;;  %v791_v26 = vld [vmem:[%s1778_s9 + $0x140] sm:$0xff]  ;;  %v732_v20 = vld [vmem:[%s1777_s8 + $0x168] sm:$0xff] }
  0xad   : > { %v585_v55 = vadd.f32 %v584_v52, %v583_v50  ;;  %v591_v56 = vadd.f32 %v590_v53, %v589_v51  ;;  %v699_v50 = vld [vmem:[%s1777_s8 + $0x60] sm:$0xff]  ;;  %v701_v51 = vld [vmem:[%s1777_s8 + $0x70] sm:$0xff]  ;;  %v1060_v52 = vpack.c.bf16 %v766_v49, %v764_v44  ;;  %v796_v31 = vld [vmem:[%s1778_s9 + $0x168] sm:$0xff] }
  0xae   : > { %v763_v53 = vld [vmem:[%s1778_s9 + $0x60] sm:$0xff]  ;;  %v717_v44 = vld [vmem:[%s1777_s8 + $0xf0] sm:$0xff]  ;;  %v798_v11 = vld [vmem:[%s1778_s9 + $0x178] sm:$0xff] }
  0xaf   : > { %v586_v57 = vrot.slane %v585_v55, 1  ;;  %v592_v58 = vrot.slane %v591_v56, 1  ;;  %1061 = vmatprep.subr.bf16.mxu1 %v1060_v52  ;;  %v1142_v49 = vpack.c.bf16 %v717_v44, %v715_v42  ;;  %v722_v52 = vld [vmem:[%s1777_s8 + $0x118] sm:$0xff]  ;;  %v1092_v32 = vpack.c.bf16 %v798_v11, %v796_v31  ;;  %v733_v33 = vld [vmem:[%s1777_s8 + $0x170] sm:$0xff]  ;;  %v795_v34 = vld [vmem:[%s1778_s9 + $0x160] sm:$0xff] }
  0xb0   : > { %v736_v38 = vld [vmem:[%s1777_s8 + $0x188] sm:$0xff]  ;;  %v802_v42 = vld [vmem:[%s1778_s9 + $0x198] sm:$0xff] }
  0xb1   : > { %v587_v60 = vadd.f32 %v586_v57, %v585_v55  ;;  %v593_v61 = vadd.f32 %v592_v58, %v591_v56  ;;  %v704_v55 = vld [vmem:[%s1777_s8 + $0x88] sm:$0xff]  ;;  %v706_v56 = vld [vmem:[%s1777_s8 + $0x98] sm:$0xff]  ;;  %v1126_v57 = vpack.c.bf16 %v701_v51, %v699_v50  ;;  %v1078_v50 = vpack.c.bf16 %v781_v48, %v779_v45  ;;  %v737_v45 = vld [vmem:[%s1777_s8 + $0x190] sm:$0xff] }
  0xb2   : > { %v720_v51 = vld [vmem:[%s1777_s8 + $0x108] sm:$0xff]  ;;  %v799_v48 = vld [vmem:[%s1778_s9 + $0x180] sm:$0xff]  ;;  %v814_v23 = vld [vmem:[%s1778_s9 + $0x1f8] sm:$0xff] }
  0xb3   : > { %v606_v62 = vmul.f32 %v1039_v54, %v587_v60  ;;  %v607_v63 = vmul.f32 %v603_v59, %v593_v61  ;;  %v765_v54 = vld [vmem:[%s1778_s9 + $0x70] sm:$0xff]  ;;  %v1128_v59 = vpack.c.bf16 %v706_v56, %v704_v55  ;;  %1127 = vmatpush1.bf16.msra.mxu0 %v1126_v57  ;;  %v615_v60 = vld [vmem:[%s1774_s5] sm:$0x3]  ;;  %v786_v55 = vld [vmem:[%s1778_s9 + $0x118] sm:$0xff] }
  0xb4   : > { %v1062_v58 = vpack.c.bf16 %v765_v54, %v763_v53  ;;  %v1144_v53 = vpack.c.bf16 %v722_v52, %v720_v51  ;;  %v784_v54 = vld [vmem:[%s1778_s9 + $0x108] sm:$0xff]  ;;  %v719_v56 = vld [vmem:[%s1777_s8 + $0x100] sm:$0xff] }
  0xb5   : > { %v609_v0 = vsel %vm608_vm4, %v606_v62, 0.0  ;;  %v610_v1 = vsel %vm608_vm4, %v607_v63, 0.0  ;;  %1129 = vmatprep.subr.bf16.mxu0 %v1128_v59  ;;  %v1080_v57 = vpack.c.bf16 %v786_v55, %v784_v54  ;;  %v783_v59 = vld [vmem:[%s1778_s9 + $0x100] sm:$0xff]  ;;  %v800_v41 = vld [vmem:[%s1778_s9 + $0x188] sm:$0xff] }
  0xb6   : > { %v611_v2 = vadd.f32 %v610_v1, %v609_v0  ;;  %1063 = vmatpush1.bf16.msra.mxu1 %v1062_v58  ;;  %v768_v1 = vld [vmem:[%s1778_s9 + $0x88] sm:$0xff]  ;;  %v721_v58 = vld [vmem:[%s1777_s8 + $0x110] sm:$0xff]  ;;  %v1096_v44 = vpack.c.bf16 %v802_v42, %v800_v41 }
  0xb7   : > { %1131 = vmatpush1.bf16.msra.mxu0 %v1130_v10  ;;  %v789_v10 = vld [vmem:[%s1778_s9 + $0x130] sm:$0xff]  ;;  %v740_v52 = vld [vmem:[%s1777_s8 + $0x1a8] sm:$0xff] }
  0xb8   : > { %612 = vadd.xlane.f32.xlu0 %v611_v2  ;;  %v770_v2 = vld [vmem:[%s1778_s9 + $0x98] sm:$0xff]  ;;  %1133 = vmatprep.subr.bf16.mxu0 %v1132_v21  ;;  %v1086_v14 = vpack.c.bf16 %v789_v10, %v787_v9  ;;  %v804_v54 = vld [vmem:[%s1778_s9 + $0x1a8] sm:$0xff]  ;;  %v745_v9 = vld [vmem:[%s1777_s8 + $0x1d0] sm:$0xff] }
  0xb9   : > { %v1064_v7 = vpack.c.bf16 %v770_v2, %v768_v1  ;;  %v788_v2 = vld [vmem:[%s1778_s9 + $0x128] sm:$0xff]  ;;  %v730_v21 = vld [vmem:[%s1777_s8 + $0x158] sm:$0xff]  ;;  %v807_v10 = vld [vmem:[%s1778_s9 + $0x1c0] sm:$0xff] }
  0xba   : > { %v1084_v8 = vpack.c.bf16 %v790_v6, %v788_v2  ;;  %v1152_v15 = vpack.c.bf16 %v730_v21, %v728_v19  ;;  %v808_v2 = vld [vmem:[%s1778_s9 + $0x1c8] sm:$0xff]  ;;  %v810_v6 = vld [vmem:[%s1778_s9 + $0x1d8] sm:$0xff] }
  0xbb   : > { %1065 = vmatprep.subr.bf16.mxu1 %v1064_v7  ;;  %1135 = vmatpush1.bf16.msra.mxu0 %v1134_v27  ;;  %v723_v7 = vld [vmem:[%s1777_s8 + $0x120] sm:$0xff]  ;;  %v793_v27 = vld [vmem:[%s1778_s9 + $0x150] sm:$0xff]  ;;  %v750_v19 = vld [vmem:[%s1777_s8 + $0x1f8] sm:$0xff] }
  0xbc   : > { %1067 = vmatpush1.bf16.msra.mxu1 %v1066_v12  ;;  %1137 = vmatprep.subr.bf16.mxu0 %v1136_v29  ;;  %v1150_v12 = vpack.c.bf16 %v725_v3, %v723_v7  ;;  %v1090_v18 = vpack.c.bf16 %v793_v27, %v791_v26  ;;  %v734_v29 = vld [vmem:[%s1777_s8 + $0x178] sm:$0xff]  ;;  %v743_v3 = vld [vmem:[%s1777_s8 + $0x1c0] sm:$0xff]  ;;  %v812_v22 = vld [vmem:[%s1778_s9 + $0x1e8] sm:$0xff] }
  0xbd   : > { %1069 = vmatprep.subr.bf16.mxu1 %v1068_v24  ;;  %v727_v24 = vld [vmem:[%s1777_s8 + $0x140] sm:$0xff]  ;;  %v1156_v30 = vpack.c.bf16 %v734_v29, %v732_v20  ;;  %v1170_v21 = vpack.c.bf16 %v745_v9, %v743_v3  ;;  %v749_v26 = vld [vmem:[%s1777_s8 + $0x1f0] sm:$0xff] }
  0xbe   : > { %v811_v27 = vld [vmem:[%s1778_s9 + $0x1e0] sm:$0xff] }
  0xbf   : > { %1139 = vmatpush1.bf16.msra.mxu0 %v1138_v35  ;;  %v797_v35 = vld [vmem:[%s1778_s9 + $0x170] sm:$0xff]  ;;  %v1040_v29 = vld.sshfl [vmem:[%s1775_s6] sm:$0x33 pattern:$0x76325410] }
  0xc0   : > { %1071 = vmatpush1.bf16.msra.mxu1 %v1070_v28  ;;  %1141 = vmatprep.subr.bf16.mxu0 %v1140_v39  ;;  %v1154_v28 = vpack.c.bf16 %v729_v25, %v727_v24  ;;  %v1094_v37 = vpack.c.bf16 %v797_v35, %v795_v34  ;;  %v738_v39 = vld [vmem:[%s1777_s8 + $0x198] sm:$0xff]  ;;  %v747_v24 = vld [vmem:[%s1777_s8 + $0x1e0] sm:$0xff]  ;;  %v1108_v25 = vpack.c.bf16 %v814_v23, %v812_v22 }
  0xc1   : > { %1073 = vmatprep.subr.bf16.mxu1 %v1072_v13  ;;  %v731_v13 = vld [vmem:[%s1777_s8 + $0x160] sm:$0xff]  ;;  %v1160_v40 = vpack.c.bf16 %v738_v39, %v736_v38 }
  0xc3   : > { %1143 = vmatpush1.bf16.msra.mxu0 %v1142_v49  ;;  %v801_v49 = vld [vmem:[%s1778_s9 + $0x190] sm:$0xff] }
  0xc4   : > { %1075 = vmatpush1.bf16.msra.mxu1 %v1074_v36  ;;  %1145 = vmatprep.subr.bf16.mxu0 %v1144_v53  ;;  %v1158_v36 = vpack.c.bf16 %v733_v33, %v731_v13  ;;  %v1098_v51 = vpack.c.bf16 %v801_v49, %v799_v48  ;;  %v742_v53 = vld [vmem:[%s1777_s8 + $0x1b8] sm:$0xff] }
  0xc5   : > { %1077 = vmatprep.subr.bf16.mxu1 %v1076_v43  ;;  %v735_v43 = vld [vmem:[%s1777_s8 + $0x180] sm:$0xff]  ;;  %v1164_v55 = vpack.c.bf16 %v742_v53, %v740_v52 }
  0xc8   : > { %1079 = vmatpush1.bf16.msra.mxu1 %v1078_v50  ;;  %v1162_v50 = vpack.c.bf16 %v737_v45, %v735_v43 }
  0xc9   : > { %1081 = vmatprep.subr.bf16.mxu1 %v1080_v57  ;;  %v739_v57 = vld [vmem:[%s1777_s8 + $0x1a0] sm:$0xff] }
 0x145   : > { %v613_v61 = vpop.xlane.xlu0 %612 }
 0x146   : > { %v614_v62 = vmul.f32 0.015625, %v613_v61  ;;  %v1146_v61 = vpack.c.bf16 %v721_v58, %v719_v56  ;;  %v806_v56 = vld [vmem:[%s1778_s9 + $0x1b8] sm:$0xff]  ;;  %v741_v58 = vld [vmem:[%s1777_s8 + $0x1b0] sm:$0xff] }
 0x148   : > { %v616_v63 = vadd.f32 %v615_v60, %v614_v62  ;;  %v785_v60 = vld [vmem:[%s1778_s9 + $0x110] sm:$0xff]  ;;  %1147 = vmatpush1.bf16.msra.mxu0 %v1146_v61  ;;  %v803_v61 = vld [vmem:[%s1778_s9 + $0x1a0] sm:$0xff] }
 0x149   : > { %v1082_v62 = vpack.c.bf16 %v785_v60, %v783_v59  ;;  %v1100_v59 = vpack.c.bf16 %v806_v56, %v804_v54  ;;  %v1166_v60 = vpack.c.bf16 %v741_v58, %v739_v57 }
 0x14a   : > { %v617_v0 = vmax.f32 %v616_v63, 0.0  ;;  %v724_v63 = vld [vmem:[%s1777_s8 + $0x128] sm:$0xff] }
 0x14b   : > { %1083 = vmatpush1.bf16.msra.mxu1 %v1082_v62  ;;  %v805_v62 = vld [vmem:[%s1778_s9 + $0x1b0] sm:$0xff] }
 0x14c   : > { %621 = vperm.xlu1 %1189, %v617_v0   ;;  %v726_v0 = vld [vmem:[%s1777_s8 + $0x138] sm:$0xff]  ;;  %1085 = vmatprep.subr.bf16.mxu1 %v1084_v8  ;;  %v1104_v8 = vpack.c.bf16 %v810_v6, %v808_v2 }
 0x14d   : > { %v1148_v1 = vpack.c.bf16 %v726_v0, %v724_v63  ;;  %v744_v63 = vld [vmem:[%s1777_s8 + $0x1c8] sm:$0xff]  ;;  %v1102_v0 = vpack.c.bf16 %v805_v62, %v803_v61 }
 0x14f   : > { %1149 = vmatprep.subr.bf16.mxu0 %v1148_v1  ;;  %1087 = vmatpush1.bf16.msra.mxu1 %v1086_v14  ;;  %v746_v1 = vld [vmem:[%s1777_s8 + $0x1d8] sm:$0xff]  ;;  %v748_v14 = vld [vmem:[%s1777_s8 + $0x1e8] sm:$0xff] }
 0x150   : > { %1151 = vmatpush1.bf16.msra.mxu0 %v1150_v12  ;;  %1089 = vmatprep.subr.bf16.mxu1 %v1088_v5  ;;  %v1168_v7 = vpack.c.bf16 %v746_v1, %v744_v63  ;;  %v809_v12 = vld [vmem:[%s1778_s9 + $0x1d0] sm:$0xff]  ;;  %v1172_v5 = vpack.c.bf16 %v750_v19, %v748_v14 }
 0x151   : > { %1153 = vmatprep.subr.bf16.mxu0 %v1152_v15  ;;  %v1106_v15 = vpack.c.bf16 %v809_v12, %v807_v10 }
 0x153   : > { %1091 = vmatpush1.bf16.msra.mxu1 %v1090_v18  ;;  %v1174_v18 = vpack.c.bf16 %v749_v26, %v747_v24 }
 0x154   : > { %1155 = vmatpush1.bf16.msra.mxu0 %v1154_v28  ;;  %1093 = vmatprep.subr.bf16.mxu1 %v1092_v32  ;;  %v813_v28 = vld [vmem:[%s1778_s9 + $0x1f0] sm:$0xff] }
 0x155   : > { %1157 = vmatprep.subr.bf16.mxu0 %v1156_v30  ;;  %v1110_v20 = vpack.c.bf16 %v813_v28, %v811_v27  ;;  %v632_v30 = vcombine.high %v1040_v29, %v1040_v29 }
 0x157   : > { %1095 = vmatpush1.bf16.msra.mxu1 %v1094_v37 }
 0x158   : > { %1159 = vmatpush1.bf16.msra.mxu0 %v1158_v36  ;;  %1097 = vmatprep.subr.bf16.mxu1 %v1096_v44 }
 0x159   : > { %1161 = vmatprep.subr.bf16.mxu0 %v1160_v40 }
 0x15b   : > { %1099 = vmatpush1.bf16.msra.mxu1 %v1098_v51 }
 0x15c   : > { %1163 = vmatpush1.bf16.msra.mxu0 %v1162_v50  ;;  %1101 = vmatprep.subr.bf16.mxu1 %v1100_v59 }
 0x15d   : > { %1165 = vmatprep.subr.bf16.mxu0 %v1164_v55 }
 0x15f   : > { %1103 = vmatpush1.bf16.msra.mxu1 %v1102_v0 }
 0x160   : > { %1167 = vmatpush1.bf16.msra.mxu0 %v1166_v60  ;;  %1105 = vmatprep.subr.bf16.mxu1 %v1104_v8 }
 0x161   : > { %1169 = vmatprep.subr.bf16.mxu0 %v1168_v7 }
 0x163   : > { %1107 = vmatpush1.bf16.msra.mxu1 %v1106_v15 }
 0x164   : > { %1171 = vmatpush1.bf16.msra.mxu0 %v1170_v21  ;;  %1109 = vmatprep.subr.bf16.mxu1 %v1108_v25 }
 0x165   : > { %1173 = vmatprep.subr.bf16.mxu0 %v1172_v5 }
 0x167   : > { %1111 = vmatpush1.bf16.msra.mxu1 %v1110_v20 }
 0x168   : > { %1175 = vmatpush1.bf16.msra.mxu0 %v1174_v18 }
 0x16b   : > { %951 = vmatmul.mubr.f32.vlgmr.msra.gmra.mrb[0].mxu0 %v1285_v4  ;;  %v651_v4 = vld [vmem:[%s1776_s7] sm:$0x3] }
 0x16c   : > { %v656_v42 = vrot.slane %v651_v4, %v1308_v17  ;;  %v660_v43 = vrot.slane %v651_v4, %v1306_v16 }
 0x1cb   : > { %v622_v31 = vpop.permute.xlu1 %621 }
 0x1cc   : > { %v635_v11 = vmul.f32 %v1040_v29, %v622_v31  ;;  %v636_v13 = vmul.f32 %v632_v30, %v622_v31 }
 0x1ce   : > { %v637_v32 = vsel %vm608_vm4, %v635_v11, 0.0  ;;  %v644_v33 = vsel %vm608_vm4, %v636_v13, 0.0 }
 0x1cf   : > { %v638_v34 = vrot.slane %v637_v32, 4  ;;  %v645_v35 = vrot.slane %v644_v33, 4 }
 0x1d1   : > { %v639_v36 = vadd.f32 %v638_v34, %v637_v32  ;;  %v646_v37 = vadd.f32 %v645_v35, %v644_v33 }
 0x1d3   : > { %v640_v38 = vrot.slane %v639_v36, 2  ;;  %v647_v39 = vrot.slane %v646_v37, 2 }
 0x1d5   : > { %v641_v40 = vadd.f32 %v640_v38, %v639_v36  ;;  %v648_v41 = vadd.f32 %v647_v39, %v646_v37 }
 0x1d7   : > { %v642_v44 = vrot.slane %v641_v40, 1  ;;  %v649_v45 = vrot.slane %v648_v41, 1 }
 0x1d9   : > { %v643_v48 = vadd.f32 %v642_v44, %v641_v40  ;;  %v650_v49 = vadd.f32 %v649_v45, %v648_v41 }
 0x1db   : > { %v663_v50 = vadd.f32 %v656_v42, %v643_v48  ;;  %v664_v51 = vadd.f32 %v660_v43, %v650_v49 }
 0x1dd   : > { %v1041_v52 = vmul.f32 -1.442695, %v663_v50  ;;  %v1042_v53 = vmul.f32 -1.442695, %v664_v51 }
 0x1df   : > { %1191 = vpow2.f32 %v1041_v52 }
 0x1e0   : > { %1193 = vpow2.f32 %v1042_v53 }
 0x1e9   : > { %v1192_v54 = vpop.eup %1191 }
 0x1ea   : > { %v1194_v55 = vpop.eup %1193  ;;  %v671_v56 = vadd.f32 1.0, %v1192_v54 }
 0x1eb   : > { %v672_v57 = vadd.f32 1.0, %v1194_v55 }
 0x1ec   : > { %1195 = vrcp.f32 %v671_v56 }
 0x1ed   : > { %1197 = vrcp.f32 %v672_v57 }
 0x1f6   : > { %v1196_v58 = vpop.eup %1195 }
 0x1f7   : > { %v1198_v59 = vpop.eup %1197  ;;  %v680_v16 = vrot.slane %v1196_v58, %v1308_v17 }
 0x1f8   : > { %v684_v60 = vrot.slane %v1198_v59, %v1308_v17 }
 0x1f9   : > { %v685_v61 = vmul.f32 %v680_v16, %v1349_v47 }
 0x1fa   : > { %v686_v62 = vmul.f32 %v684_v60, %v1347_v46 }
 0x1fc   : > { %879 = vmatprep.mubr.f32.mxu1 %v686_v62 }
 0x1fd   : > { %880 = vmatmul.mubr.f32.vlgmr.msra.gmra.mrb[0].mxu1 %v685_v61 }
 0x23e   : > { %v952_v63 = vpop.f32.mrb[0].mxu0 }
 0x23f   : > { %v954_v0 = vpop.f32.mrb[1].mxu0 }
 0x2d0   : > { %v881_v1 = vpop.f32.mrb[0].mxu1 }
 0x2d1   : > { %v953_v2 = vadd.f32 %v952_v63, %v881_v1  ;;  %v883_v6 = vpop.f32.mrb[1].mxu1 }
 0x2d2   : > { %v955_v7 = vadd.f32 %v954_v0, %v883_v6 }
 0x2d3   : > { %957 = vst [vmem:[%s379_s30] sm:$0xff] %v953_v2 }
 0x2d4   : > { %958 = vst [vmem:[%s379_s30 + $0x8] sm:$0xff] %v955_v7 }
 0x2d5 PF: > { %s20_s13 = sadd.s32 1, %s1205_s13  }
 0x2d6   : > { %p17_p4 = scmp.ge.s32.totalorder %s20_s13, 4  }
 0x2d8   :  { %19 = sbr.rel (!%p17_p4) target bundleno = 1 (0x1), region = 93 }

// kernel: run.9
= control target key start
LH: loop header
LB: loop body
LE: loop exit
PB: predicated region body
PF: predicated region fallthrough
CT: control target
= control target key end

     0   :  { %s1381_s15 = smov 0   ;;  %s2012_s0 = inlined_call_operand.vmem [shape: f32[2,16,256], index: 0, kind: input, shape index: {}]   ;;  %s2013_s1 = inlined_call_operand.vmem [shape: f32[2,16,256], index: 1, kind: input, shape index: {}]   ;;  %s2014_s2 = inlined_call_operand.vmem [shape: f32[9,256], index: 2, kind: input, shape index: {}]   ;;  %s2015_s3 = inlined_call_operand.vmem [shape: f32[1,256], index: 3, kind: input, shape index: {}]   ;;  %s2016_s4 = inlined_call_operand.vmem [shape: f32[1,256], index: 4, kind: input, shape index: {}]   ;;  %s2017_s5 = inlined_call_operand.<no memory space> [shape: f32[1,1], index: 5, kind: input, shape index: {}]   ;;  %s2018_s6 = inlined_call_operand.vmem [shape: f32[1,256], index: 6, kind: input, shape index: {}]   ;;  %s2019_s7 = inlined_call_operand.vmem [shape: f32[1,256], index: 7, kind: input, shape index: {}]   ;;  %s2020_s8 = inlined_call_operand.vmem [shape: f32[256,256], index: 8, kind: input, shape index: {}]   ;;  %s2021_s9 = inlined_call_operand.vmem [shape: f32[256,256], index: 9, kind: input, shape index: {}]   ;;  %s2022_s10 = inlined_call_operand.vmem [shape: f32[2,16,256], index: 10, kind: output, shape index: {}]  }
   0x1   :  { %v15_v0 = vstv %s2017_s5 }
   0x2   :  { %16 = vst [vmem:[#allocation2] sm:$0x1] %v15_v0 }
   0x3 LB: > { %s1139_s16 = sadd.s32 4294967295, %s1318_s15   ;;  %p1143_p0 = scmp.ge.s32.totalorder %s1318_s15, 1  ;;  %s1318_s15 = sphi %s1381_s15, %s22_s15  }
   0x4   : > { %p324_p1 = scmp.lt.s32.totalorder %s1318_s15, 3 }
   0x6   : > { %p325_p2 = pnand %p1143_p0, %p324_p1 }
   0x7   : > { %p367_p3 = scmp.lt.s32.totalorder (!%p325_p2), %s1139_s16, 1  ;;  %vm398_vm0 = vcmask (!%p325_p2), 1040384   ;;  %s1320_s23 = smov (!%p325_p2), 16   ;;  %vm411_vm1 = vcmask (!%p325_p2), 1046528   ;;  %v448_v29 = vlaneseq (!%p325_p2)  ;;  %v1491_v36 = vld [vmem:[%s2014_s2] sm:$0xff] (!%p325_p2)  ;;  %v1496_v38 = vld [vmem:[%s2014_s2 + $0x8] sm:$0xff] (!%p325_p2) }
   0x8   : > { %328 = sbr.rel (%p325_p2) target bundleno = 744 (0x2e8), region = 60  ;;  %s1321_s24 = smov (!%p325_p2), 112   ;;  %vm439_vm2 = vcmask (!%p325_p2), 130048   ;;  %vm484_vm3 = vcmask (!%p325_p2), 916480  }
   0x9   : > { %v1480_v30 = vshrl.u32 (!%p325_p2), %v448_v29, 7 }
   0xb   : > { %v1483_v33 = vsub.s32 (!%p325_p2), 1, %v1480_v30  ;;  %v1486_v34 = vsub.s32 (!%p325_p2), 0, %v1480_v30  ;;  %v495_v39 = vsub.s32 (!%p325_p2), 2, %v1480_v30  ;;  %v543_v47 = vsub.s32 (!%p325_p2), 4, %v1480_v30 }
   0xc   : > { %v527_v50 = vsub.s32 (!%p325_p2), 3, %v1480_v30 }
   0xd   : > { %v463_v40 = vrot.slane (!%p325_p2), %v1491_v36, %v1483_v33  ;;  %v451_v41 = vrot.slane (!%p325_p2), %v1491_v36, %v1486_v34  ;;  %v467_v43 = vrot.slane (!%p325_p2), %v1496_v38, %v1483_v33  ;;  %v455_v45 = vrot.slane (!%p325_p2), %v1496_v38, %v1486_v34 }
   0xe   : > { %v496_v49 = vrot.slane (!%p325_p2), %v1491_v36, %v495_v39  ;;  %v500_v51 = vrot.slane (!%p325_p2), %v1496_v38, %v495_v39  ;;  %v544_v61 = vrot.slane (!%p325_p2), %v1491_v36, %v543_v47 }
   0xf   : > { %s2024_s16 = smov (!%p367_p3, %s1139_s16), 1 }
  0x10   : > { %s1389_s17 = sshll.u32 %s2024_s16, 5 }
  0x11   : > { %s371_s19 = scalar_lea.vmem %s2012_s0, %s1389_s17  ;;  %s376_s22 = scalar_lea.vmem %s2013_s1, %s1389_s17 }
  0x12   : > { %v1399_v1 = vld [vmem:[%s371_s19] sm:$0xff]  ;;  %v1401_v3 = vld [vmem:[%s371_s19 + $0x10] sm:$0xff]  ;;  %v383_v6 = vld [vmem:[%s371_s19 + $0x8] sm:$0xff]  ;;  %s381_s13 = scalar_lea.vmem %s2022_s10, %s1389_s17 }
  0x13   : > { %v386_v2 = vld [vmem:[%s376_s22] sm:$0xff]  ;;  %v388_v5 = vld [vmem:[%s376_s22 + $0x10] sm:$0xff]  ;;  %v387_v7 = vld [vmem:[%s376_s22 + $0x8] sm:$0xff]  ;;  %1055 = vmatprep.mubr.f32.mxu0 %v383_v6 }
  0x14   : > { %v1404_v4 = vmul.f32 %v386_v2, %v1399_v1  ;;  %v1407_v8 = vmul.f32 %v388_v5, %v1401_v3  ;;  %v1409_v9 = vmul.f32 %v387_v7, %v383_v6  ;;  %v1411_v10 = vld [vmem:[%s371_s19 + $0x18] sm:$0xff]  ;;  %v528_v2 = vrot.slane %v1491_v36, %v527_v50 }
  0x15   : > { %v389_v11 = vld [vmem:[%s376_s22 + $0x18] sm:$0xff]  ;;  %v532_v7 = vrot.slane %v1496_v38, %v527_v50 }
  0x16   : > { %v399_v12 = vrot.slane %v1404_v4, 7  ;;  %v1415_v13 = vmul.f32 %v389_v11, %v1411_v10  ;;  %v401_v14 = vrot.slane %v1407_v8, 7  ;;  %v400_v15 = vrot.slane %v1409_v9, 7 }
  0x17   : > { %v412_v21 = vrot.slane %v1404_v4, 1  ;;  %v413_v22 = vrot.slane %v1407_v8, 1  ;;  %v415_v23 = vrot.slane %v1409_v9, 1  ;;  %v548_v11 = vrot.slane %v1496_v38, %v543_v47 }
  0x18   : > { %v1420_v16 = vsel %vm398_vm0, 0.0, %v399_v12  ;;  %v403_v17 = vrot.slane %v1415_v13, 7  ;;  %v1426_v18 = vsel %vm398_vm0, %v399_v12, %v401_v14  ;;  %v1431_v19 = vsel %vm398_vm0, 0.0, %v400_v15 }
  0x19   : > { %431 = vrot.lane.b32.xlu0 %v1420_v16, %s1320_s23  ;;  %435 = vrot.lane.b32.xlu1 %v1426_v18, %s1320_s23  ;;  %v416_v24 = vrot.slane %v1415_v13, 1  ;;  %v1460_v25 = vsel %vm411_vm1, %v412_v21, %v413_v22  ;;  %v1468_v27 = vsel %vm411_vm1, %v413_v22, 0.0  ;;  %v468_v53 = vmul.f32 %v463_v40, %v1420_v16 }
  0x1a   : > { %v1434_v20 = vsel %vm398_vm0, %v400_v15, %v403_v17  ;;  %v469_v57 = vmul.f32 %v467_v43, %v1431_v19  ;;  %v470_v62 = vmul.f32 %v463_v40, %v1426_v18  ;;  %v550_v39 = vmul.f32 %v548_v11, %v1409_v9 }
  0x1b   : > { %v1462_v26 = vsel %vm411_vm1, %v415_v23, %v416_v24  ;;  %v1470_v28 = vsel %vm411_vm1, %v416_v24, 0.0  ;;  %v471_v12 = vmul.f32 %v467_v43, %v1434_v20  ;;  %v549_v23 = vmul.f32 %v544_v61, %v1404_v4 }
  0x1c   : > { %v575_v43 = vsub.s32 5, %v1480_v30  ;;  %v551_v47 = vmul.f32 %v544_v61, %v1407_v8 }
  0x1d   : > { %433 = vrot.lane.b32.xlu0 %v1431_v19, %s1320_s23  ;;  %437 = vrot.lane.b32.xlu1 %v1434_v20, %s1320_s23 }
  0x1e   : > { %v580_v61 = vrot.slane %v1496_v38, %v575_v43 }
  0x21   : > { %476 = vrot.lane.b32.xlu0 %v1420_v16, %s1321_s24  ;;  %478 = vrot.lane.b32.xlu1 %v1431_v19, %s1321_s24 }
  0x25   : > { %480 = vrot.lane.b32.xlu0 %v1426_v18, %s1321_s24  ;;  %482 = vrot.lane.b32.xlu1 %v1434_v20, %s1321_s24 }
  0x29   : > { %509 = vrot.lane.b32.xlu0 %v1404_v4, %s1320_s23  ;;  %511 = vrot.lane.b32.xlu1 %v1409_v9, %s1320_s23 }
  0x2d   : > { %513 = vrot.lane.b32.xlu0 %v1407_v8, %s1320_s23  ;;  %515 = vrot.lane.b32.xlu1 %v1415_v13, %s1320_s23 }
  0x31   : > { %557 = vrot.lane.b32.xlu0 %v1404_v4, %s1321_s24  ;;  %559 = vrot.lane.b32.xlu1 %v1409_v9, %s1321_s24 }
  0x35   : > { %561 = vrot.lane.b32.xlu0 %v1407_v8, %s1321_s24  ;;  %563 = vrot.lane.b32.xlu1 %v1415_v13, %s1321_s24  ;;  %v609_v8 = vsub.s32 6, %v1480_v30 }
  0x39   : > { %591 = vrot.lane.b32.xlu0 %v1460_v25, %s1320_s23  ;;  %593 = vrot.lane.b32.xlu1 %v1462_v26, %s1320_s23 }
  0x3d   : > { %595 = vrot.lane.b32.xlu0 %v1468_v27, %s1320_s23  ;;  %597 = vrot.lane.b32.xlu1 %v1470_v28, %s1320_s23 }
  0x41   : > { %639 = vrot.lane.b32.xlu0 %v1460_v25, %s1321_s24  ;;  %641 = vrot.lane.b32.xlu1 %v1462_v26, %s1321_s24 }
  0x45   : > { %643 = vrot.lane.b32.xlu0 %v1468_v27, %s1321_s24  ;;  %645 = vrot.lane.b32.xlu1 %v1470_v28, %s1321_s24 }
  0x8b   : > { %v432_v31 = vpop.permute.xlu0 %431  ;;  %v436_v32 = vpop.permute.xlu1 %435 }
  0x8c   : > { %v446_v44 = vsel %vm439_vm2, 0.0, %v432_v31  ;;  %v447_v58 = vsel %vm439_vm2, 0.0, %v436_v32 }
  0x8d   : > { %v456_v54 = vmul.f32 %v451_v41, %v446_v44  ;;  %v458_v15 = vmul.f32 %v451_v41, %v447_v58 }
  0x8f   : > { %v434_v35 = vpop.permute.xlu0 %433  ;;  %v438_v37 = vpop.permute.xlu1 %437  ;;  %v472_v14 = vadd.f32 %v468_v53, %v456_v54  ;;  %v474_v40 = vadd.f32 %v470_v62, %v458_v15  ;;  %v552_v54 = vmul.f32 %v548_v11, %v1415_v13  ;;  %v610_v11 = vrot.slane %v1491_v36, %v609_v8 }
  0x90   : > { %v440_v48 = vsel %vm439_vm2, %v432_v31, %v434_v35  ;;  %v441_v63 = vsel %vm439_vm2, %v436_v32, %v438_v37 }
  0x91   : > { %v457_v59 = vmul.f32 %v455_v45, %v440_v48  ;;  %v459_v19 = vmul.f32 %v455_v45, %v441_v63 }
  0x93   : > { %v477_v42 = vpop.permute.xlu0 %476  ;;  %v479_v46 = vpop.permute.xlu1 %478  ;;  %v473_v18 = vadd.f32 %v469_v57, %v457_v59  ;;  %v475_v44 = vadd.f32 %v471_v12, %v459_v19  ;;  %v625_v57 = vsub.s32 7, %v1480_v30  ;;  %v614_v30 = vrot.slane %v1496_v38, %v609_v8 }
  0x94   : > { %v485_v52 = vsel %vm484_vm3, %v477_v42, %v479_v46  ;;  %v491_v55 = vsel %vm484_vm3, %v479_v46, 0.0 }
  0x95   : > { %v501_v0 = vmul.f32 %v496_v49, %v485_v52  ;;  %v502_v5 = vmul.f32 %v500_v51, %v491_v55  ;;  %v626_v13 = vrot.slane %v1491_v36, %v625_v57  ;;  %v630_v12 = vrot.slane %v1496_v38, %v625_v57 }
  0x97   : > { %v481_v56 = vpop.permute.xlu0 %480  ;;  %v483_v60 = vpop.permute.xlu1 %482  ;;  %v505_v24 = vadd.f32 %v501_v0, %v472_v14  ;;  %v506_v35 = vadd.f32 %v502_v5, %v473_v18  ;;  %v631_v18 = vmul.f32 %v626_v13, %v1460_v25 }
  0x98   : > { %v486_v6 = vsel %vm484_vm3, %v481_v56, %v483_v60  ;;  %v492_v16 = vsel %vm484_vm3, %v483_v60, 0.0  ;;  %v576_v60 = vrot.slane %v1491_v36, %v575_v43 }
  0x99   : > { %v503_v29 = vmul.f32 %v496_v49, %v486_v6  ;;  %v504_v37 = vmul.f32 %v500_v51, %v492_v16 }
  0x9b   : > { %v510_v17 = vpop.permute.xlu0 %509  ;;  %v512_v22 = vpop.permute.xlu1 %511  ;;  %v507_v48 = vadd.f32 %v503_v29, %v474_v40  ;;  %v508_v52 = vadd.f32 %v504_v37, %v475_v44  ;;  %v632_v29 = vmul.f32 %v630_v12, %v1462_v26 }
  0x9c   : > { %v523_v21 = vsel %vm439_vm2, 0.0, %v510_v17  ;;  %v517_v32 = vsel %vm439_vm2, %v510_v17, %v512_v22 }
  0x9d   : > { %v533_v31 = vmul.f32 %v528_v2, %v523_v21  ;;  %v534_v20 = vmul.f32 %v532_v7, %v517_v32 }
  0x9f   : > { %v537_v41 = vadd.f32 %v533_v31, %v505_v24  ;;  %v514_v42 = vpop.permute.xlu0 %513  ;;  %v538_v45 = vadd.f32 %v534_v20, %v506_v35  ;;  %v516_v4 = vpop.permute.xlu1 %515  ;;  %v633_v20 = vmul.f32 %v626_v13, %v1468_v27  ;;  %v1150_v27 = vld [vmem:[%s2014_s2 + $0x10] ss:$0 sm:$0xff] }
  0xa0   : > { %v524_v46 = vsel %vm439_vm2, 0.0, %v514_v42  ;;  %v518_v50 = vsel %vm439_vm2, %v514_v42, %v516_v4 }
  0xa1   : > { %v535_v49 = vmul.f32 %v528_v2, %v524_v46  ;;  %v553_v51 = vadd.f32 %v549_v23, %v537_v41  ;;  %v536_v53 = vmul.f32 %v532_v7, %v518_v50  ;;  %v554_v9 = vadd.f32 %v550_v39, %v538_v45 }
  0xa2   : > { %v634_v45 = vmul.f32 %v630_v12, %v1470_v28 }
  0xa3   : > { %v539_v55 = vadd.f32 %v535_v49, %v507_v48  ;;  %v558_v56 = vpop.permute.xlu0 %557  ;;  %v540_v58 = vadd.f32 %v536_v53, %v508_v52  ;;  %v560_v59 = vpop.permute.xlu1 %559  ;;  %v1151_v49 = vld [vmem:[%s2014_s2 + $0x18] ss:$0 sm:$0xff]  ;;  %v428_v52 = vld [vmem:[%s2015_s3] sm:$0x3] }
  0xa4   : > { %v565_v63 = vsel %vm484_vm3, %v558_v56, %v560_v59  ;;  %v571_v2 = vsel %vm484_vm3, %v560_v59, 0.0  ;;  %v679_v59 = vrot.slane %v428_v52, %v1483_v33 }
  0xa5   : > { %v555_v62 = vadd.f32 %v551_v47, %v539_v55  ;;  %v556_v0 = vadd.f32 %v552_v54, %v540_v58  ;;  %v581_v7 = vmul.f32 %v576_v60, %v565_v63  ;;  %v582_v14 = vmul.f32 %v580_v61, %v571_v2 }
  0xa6   : > { %v675_v58 = vrot.slane %v428_v52, %v1486_v34  ;;  %v850_v52 = vld [vmem:[%s2021_s9] sm:$0xff] }
  0xa7   : > { %v562_v5 = vpop.permute.xlu0 %561  ;;  %v564_v6 = vpop.permute.xlu1 %563  ;;  %v585_v22 = vadd.f32 %v581_v7, %v553_v51  ;;  %v586_v31 = vadd.f32 %v582_v14, %v554_v9 }
  0xa8   : > { %v566_v15 = vsel %vm484_vm3, %v562_v5, %v564_v6  ;;  %v572_v16 = vsel %vm484_vm3, %v564_v6, 0.0 }
  0xa9   : > { %v583_v23 = vmul.f32 %v576_v60, %v566_v15  ;;  %v584_v32 = vmul.f32 %v580_v61, %v572_v16 }
  0xab   : > { %v592_v17 = vpop.permute.xlu0 %591  ;;  %v594_v21 = vpop.permute.xlu1 %593  ;;  %v587_v41 = vadd.f32 %v583_v23, %v555_v62  ;;  %v588_v46 = vadd.f32 %v584_v32, %v556_v0 }
  0xac   : > { %v605_v19 = vsel %vm439_vm2, 0.0, %v592_v17  ;;  %v599_v36 = vsel %vm439_vm2, %v592_v17, %v594_v21 }
  0xad   : > { %v615_v24 = vmul.f32 %v610_v11, %v605_v19  ;;  %v616_v35 = vmul.f32 %v614_v30, %v599_v36 }
  0xaf   : > { %v619_v37 = vadd.f32 %v615_v24, %v585_v22  ;;  %v596_v38 = vpop.permute.xlu0 %595  ;;  %v620_v39 = vadd.f32 %v616_v35, %v586_v31  ;;  %v598_v40 = vpop.permute.xlu1 %597 }
  0xb0   : > { %v606_v25 = vsel %vm439_vm2, 0.0, %v596_v38  ;;  %v600_v43 = vsel %vm439_vm2, %v596_v38, %v598_v40 }
  0xb1   : > { %v617_v42 = vmul.f32 %v610_v11, %v606_v25  ;;  %v635_v44 = vadd.f32 %v631_v18, %v619_v37  ;;  %v618_v26 = vmul.f32 %v614_v30, %v600_v43  ;;  %v636_v4 = vadd.f32 %v632_v29, %v620_v39  ;;  %v704_v29 = vld [vmem:[%s2016_s4] sm:$0x3] }
  0xb2   : > { %v709_v38 = vrot.slane %v704_v29, %v1486_v34 }
  0xb3   : > { %v621_v47 = vadd.f32 %v617_v42, %v587_v41  ;;  %v640_v48 = vpop.permute.xlu0 %639  ;;  %v622_v50 = vadd.f32 %v618_v26, %v588_v46  ;;  %v642_v51 = vpop.permute.xlu1 %641  ;;  %v787_v46 = vld [vmem:[%s2020_s8 + $0x8] sm:$0xff]  ;;  %v789_v26 = vld [vmem:[%s2020_s8 + $0x18] sm:$0xff] }
  0xb4   : > { %v647_v28 = vsel %vm484_vm3, %v640_v48, %v642_v51  ;;  %v653_v53 = vsel %vm484_vm3, %v642_v51, 0.0  ;;  %v853_v48 = vld [vmem:[%s2021_s9 + $0x18] sm:$0xff] }
  0xb5   : > { %v637_v9 = vadd.f32 %v633_v20, %v621_v47  ;;  %v663_v54 = vmul.f32 %v1150_v27, %v647_v28  ;;  %v664_v55 = vmul.f32 %v1151_v49, %v653_v53  ;;  %v638_v56 = vadd.f32 %v634_v45, %v622_v50  ;;  %v852_v28 = vld [vmem:[%s2021_s9 + $0x10] sm:$0xff]  ;;  %v791_v53 = vld [vmem:[%s2020_s8 + $0x28] sm:$0xff] }
  0xb6   : > { %v713_v20 = vrot.slane %v704_v29, %v1483_v33  ;;  %v1322_v45 = vmov 0   ;;  %v1223_v47 = vpack.c.bf16 %v789_v26, %v787_v46  ;;  %v801_v29 = vld [vmem:[%s2020_s8 + $0x78] sm:$0xff] }
  0xb7   : > { %v644_v57 = vpop.permute.xlu0 %643  ;;  %v667_v60 = vadd.f32 %v663_v54, %v635_v44  ;;  %v668_v62 = vadd.f32 %v664_v55, %v636_v4  ;;  %v646_v8 = vpop.permute.xlu1 %645  ;;  %1302 = vset.pattern.permute.xlu1 %v1322_v45  ;;  %1303 = vset.pattern.permute.xlu0 %v1322_v45  ;;  %v851_v4 = vld [vmem:[%s2021_s9 + $0x8] sm:$0xff]  ;;  %v793_v54 = vld [vmem:[%s2020_s8 + $0x38] sm:$0xff] }
  0xb8   : > { %v648_v61 = vsel %vm484_vm3, %v644_v57, %v646_v8  ;;  %v654_v63 = vsel %vm484_vm3, %v646_v8, 0.0  ;;  %v1159_v50 = vpack.c.bf16 %v853_v48, %v851_v4  ;;  %1224 = vmatprep.subr.bf16.mxu0 %v1223_v47  ;;  %v855_v55 = vld [vmem:[%s2021_s9 + $0x28] sm:$0xff]  ;;  %v1227_v57 = vpack.c.bf16 %v793_v54, %v791_v53  ;;  %v802_v4 = vld [vmem:[%s2020_s8 + $0x80] sm:$0xff]  ;;  %v804_v47 = vld [vmem:[%s2020_s8 + $0x90] sm:$0xff] }
  0xb9   : > { %v665_v0 = vmul.f32 %v1150_v27, %v648_v61  ;;  %v666_v2 = vmul.f32 %v1151_v49, %v654_v63  ;;  %v1571_v5 = vadd.f32 %v675_v58, %v667_v60  ;;  %v1573_v13 = vadd.f32 %v679_v59, %v668_v62  ;;  %v786_v27 = vld [vmem:[%s2020_s8] sm:$0xff]  ;;  %v788_v49 = vld [vmem:[%s2020_s8 + $0x10] sm:$0xff]  ;;  %v795_v63 = vld [vmem:[%s2020_s8 + $0x48] sm:$0xff] }
  0xba   : > { %v1225_v51 = vpack.c.bf16 %v788_v49, %v786_v27  ;;  %1160 = vmatprep.subr.bf16.mxu1 %v1159_v50  ;;  %v792_v60 = vld [vmem:[%s2020_s8 + $0x30] sm:$0xff]  ;;  %v854_v62 = vld [vmem:[%s2021_s9 + $0x20] sm:$0xff]  ;;  %v807_v50 = vld [vmem:[%s2020_s8 + $0xa8] sm:$0xff]  ;;  %v1241_v53 = vpack.c.bf16 %v804_v47, %v802_v4 }
  0xbb   : > { %v669_v6 = vadd.f32 %v665_v0, %v637_v9  ;;  %v670_v7 = vadd.f32 %v666_v2, %v638_v56  ;;  %v686_v14 = vmax.f32 %v1571_v5, 0.0  ;;  %v687_v15 = vmax.f32 %v1573_v13, 0.0  ;;  %v857_v56 = vld [vmem:[%s2021_s9 + $0x38] sm:$0xff]  ;;  %v856_v61 = vld [vmem:[%s2021_s9 + $0x30] sm:$0xff]  ;;  %v866_v48 = vld [vmem:[%s2021_s9 + $0x80] sm:$0xff] }
  0xbc   : > { %v1161_v9 = vpack.c.bf16 %v852_v28, %v850_v52  ;;  %1226 = vmatpush1.bf16.msra.mxu0 %v1225_v51  ;;  %v797_v0 = vld [vmem:[%s2020_s8 + $0x58] sm:$0xff]  ;;  %v1165_v2 = vpack.c.bf16 %v856_v61, %v854_v62  ;;  %v868_v49 = vld [vmem:[%s2021_s9 + $0x90] sm:$0xff]  ;;  %v871_v52 = vld [vmem:[%s2021_s9 + $0xa8] sm:$0xff] }
  0xbd   : > { %v1575_v11 = vadd.f32 %v675_v58, %v669_v6  ;;  %v1577_v12 = vadd.f32 %v679_v59, %v670_v7  ;;  %v1163_v58 = vpack.c.bf16 %v857_v56, %v855_v55  ;;  %v790_v59 = vld [vmem:[%s2020_s8 + $0x20] sm:$0xff]  ;;  %1228 = vmatprep.subr.bf16.mxu0 %v1227_v57  ;;  %v1231_v6 = vpack.c.bf16 %v797_v0, %v795_v63  ;;  %v859_v7 = vld [vmem:[%s2021_s9 + $0x48] sm:$0xff]  ;;  %v809_v51 = vld [vmem:[%s2020_s8 + $0xb8] sm:$0xff] }
  0xbe   : > { %1162 = vmatpush1.bf16.msra.mxu1 %v1161_v9  ;;  %v1229_v8 = vpack.c.bf16 %v792_v60, %v790_v59  ;;  %v873_v28 = vld [vmem:[%s2021_s9 + $0xb8] sm:$0xff]  ;;  %v1177_v9 = vpack.c.bf16 %v868_v49, %v866_v48  ;;  %v1243_v54 = vpack.c.bf16 %v809_v51, %v807_v50  ;;  %v806_v55 = vld [vmem:[%s2020_s8 + $0xa0] sm:$0xff]  ;;  %v808_v56 = vld [vmem:[%s2020_s8 + $0xb0] sm:$0xff] }
  0xbf   : > { %v688_v30 = vmax.f32 %v1575_v11, 0.0  ;;  %v689_v16 = vmax.f32 %v1577_v12, 0.0  ;;  %1164 = vmatprep.subr.bf16.mxu1 %v1163_v58  ;;  %v870_v57 = vld [vmem:[%s2021_s9 + $0xa0] sm:$0xff]  ;;  %v1179_v58 = vpack.c.bf16 %v873_v28, %v871_v52  ;;  %v872_v59 = vld [vmem:[%s2021_s9 + $0xb0] sm:$0xff]  ;;  %v811_v60 = vld [vmem:[%s2020_s8 + $0xc8] sm:$0xff]  ;;  %v1245_v63 = vpack.c.bf16 %v808_v56, %v806_v55 }
  0xc0   : > { %1230 = vmatpush1.bf16.msra.mxu0 %v1229_v8  ;;  %v813_v62 = vld [vmem:[%s2020_s8 + $0xd8] sm:$0xff]  ;;  %v875_v8 = vld [vmem:[%s2021_s9 + $0xc8] sm:$0xff]  ;;  %v1181_v0 = vpack.c.bf16 %v872_v59, %v870_v57  ;;  %v818_v48 = vld [vmem:[%s2020_s8 + $0x100] sm:$0xff] }
  0xc1   : > { %v690_v17 = vadd.f32 %v688_v30, %v686_v14  ;;  %v697_v18 = vadd.f32 %v689_v16, %v687_v15  ;;  %1232 = vmatprep.subr.bf16.mxu0 %v1231_v6  ;;  %v877_v61 = vld [vmem:[%s2021_s9 + $0xd8] sm:$0xff]  ;;  %v810_v6 = vld [vmem:[%s2020_s8 + $0xc0] sm:$0xff]  ;;  %v883_v4 = vld [vmem:[%s2021_s9 + $0x108] sm:$0xff] }
  0xc2   : > { %1166 = vmatpush1.bf16.msra.mxu1 %v1165_v2  ;;  %v1247_v2 = vpack.c.bf16 %v813_v62, %v811_v60  ;;  %v885_v47 = vld [vmem:[%s2021_s9 + $0x118] sm:$0xff]  ;;  %v820_v49 = vld [vmem:[%s2020_s8 + $0x110] sm:$0xff]  ;;  %v882_v50 = vld [vmem:[%s2021_s9 + $0x100] sm:$0xff] }
  0xc3   : > { %v691_v19 = vrot.slane %v690_v17, 4  ;;  %v698_v21 = vrot.slane %v697_v18, 4  ;;  %v884_v51 = vld [vmem:[%s2021_s9 + $0x110] sm:$0xff]  ;;  %v1257_v52 = vpack.c.bf16 %v820_v49, %v818_v48  ;;  %v887_v55 = vld [vmem:[%s2021_s9 + $0x128] sm:$0xff]  ;;  %v889_v56 = vld [vmem:[%s2021_s9 + $0x138] sm:$0xff] }
  0xc4   : > { %v1193_v28 = vpack.c.bf16 %v884_v51, %v882_v50  ;;  %v822_v57 = vld [vmem:[%s2020_s8 + $0x120] sm:$0xff]  ;;  %v824_v59 = vld [vmem:[%s2020_s8 + $0x130] sm:$0xff]  ;;  %v839_v51 = vld [vmem:[%s2020_s8 + $0x1a8] sm:$0xff] }
  0xc5   : > { %v692_v22 = vadd.f32 %v691_v19, %v690_v17  ;;  %v699_v23 = vadd.f32 %v698_v21, %v697_v18  ;;  %v861_v17 = vld [vmem:[%s2021_s9 + $0x58] sm:$0xff]  ;;  %v794_v18 = vld [vmem:[%s2020_s8 + $0x40] sm:$0xff]  ;;  %v796_v21 = vld [vmem:[%s2020_s8 + $0x50] sm:$0xff] }
  0xc6   : > { %v1167_v19 = vpack.c.bf16 %v861_v17, %v859_v7  ;;  %v812_v7 = vld [vmem:[%s2020_s8 + $0xd0] sm:$0xff]  ;;  %v874_v17 = vld [vmem:[%s2021_s9 + $0xc0] sm:$0xff] }
  0xc7   : > { %v693_v24 = vrot.slane %v692_v22, 2  ;;  %v700_v36 = vrot.slane %v699_v23, 2  ;;  %v886_v60 = vld [vmem:[%s2021_s9 + $0x120] sm:$0xff]  ;;  %v888_v62 = vld [vmem:[%s2021_s9 + $0x130] sm:$0xff] }
  0xc8   : > { %1168 = vmatprep.subr.bf16.mxu1 %v1167_v19  ;;  %v876_v19 = vld [vmem:[%s2021_s9 + $0xd0] sm:$0xff]  ;;  %v898_v48 = vld [vmem:[%s2021_s9 + $0x180] sm:$0xff] }
  0xc9   : > { %v694_v31 = vadd.f32 %v693_v24, %v692_v22  ;;  %v701_v32 = vadd.f32 %v700_v36, %v699_v23  ;;  %v858_v22 = vld [vmem:[%s2021_s9 + $0x40] sm:$0xff]  ;;  %v860_v23 = vld [vmem:[%s2021_s9 + $0x50] sm:$0xff]  ;;  %v1233_v24 = vpack.c.bf16 %v796_v21, %v794_v18  ;;  %v799_v36 = vld [vmem:[%s2020_s8 + $0x68] sm:$0xff]  ;;  %v1183_v18 = vpack.c.bf16 %v877_v61, %v875_v8 }
  0xca   : > { %v815_v21 = vld [vmem:[%s2020_s8 + $0xe8] sm:$0xff]  ;;  %v1261_v8 = vpack.c.bf16 %v824_v59, %v822_v57  ;;  %v1197_v61 = vpack.c.bf16 %v888_v62, %v886_v60  ;;  %v904_v59 = vld [vmem:[%s2021_s9 + $0x1b0] sm:$0xff] }
  0xcb   : > { %v695_v35 = vrot.slane %v694_v31, 1  ;;  %v702_v37 = vrot.slane %v701_v32, 1  ;;  %1234 = vmatpush1.bf16.msra.mxu0 %v1233_v24  ;;  %v881_v24 = vld [vmem:[%s2021_s9 + $0xf8] sm:$0xff]  ;;  %v843_v60 = vld [vmem:[%s2020_s8 + $0x1c8] sm:$0xff] }
  0xcd   : > { %v696_v39 = vadd.f32 %v695_v35, %v694_v31  ;;  %v703_v25 = vadd.f32 %v702_v37, %v701_v32  ;;  %v863_v31 = vld [vmem:[%s2021_s9 + $0x68] sm:$0xff]  ;;  %v1169_v32 = vpack.c.bf16 %v860_v23, %v858_v22  ;;  %v1235_v35 = vpack.c.bf16 %v801_v29, %v799_v36  ;;  %v865_v37 = vld [vmem:[%s2021_s9 + $0x78] sm:$0xff] }
  0xce   : > { %v817_v22 = vld [vmem:[%s2020_s8 + $0xf8] sm:$0xff]  ;;  %v879_v23 = vld [vmem:[%s2021_s9 + $0xe8] sm:$0xff]  ;;  %v1249_v36 = vpack.c.bf16 %v812_v7, %v810_v6  ;;  %v1185_v29 = vpack.c.bf16 %v876_v19, %v874_v17  ;;  %v826_v17 = vld [vmem:[%s2020_s8 + $0x140] sm:$0xff] }
  0xcf   : > { %v716_v40 = vmul.f32 %v709_v38, %v696_v39  ;;  %v717_v41 = vmul.f32 %v713_v20, %v703_v25  ;;  %v798_v38 = vld [vmem:[%s2020_s8 + $0x60] sm:$0xff]  ;;  %v800_v20 = vld [vmem:[%s2020_s8 + $0x70] sm:$0xff]  ;;  %v1171_v39 = vpack.c.bf16 %v865_v37, %v863_v31  ;;  %1170 = vmatpush1.bf16.msra.mxu1 %v1169_v32  ;;  %1236 = vmatprep.subr.bf16.mxu0 %v1235_v35  ;;  %v891_v6 = vld [vmem:[%s2021_s9 + $0x148] sm:$0xff] }
  0xd0   : > { %v862_v25 = vld [vmem:[%s2021_s9 + $0x60] sm:$0xff]  ;;  %v1237_v45 = vpack.c.bf16 %v800_v20, %v798_v38  ;;  %v1251_v31 = vpack.c.bf16 %v817_v22, %v815_v21  ;;  %v816_v35 = vld [vmem:[%s2020_s8 + $0xf0] sm:$0xff]  ;;  %v1187_v37 = vpack.c.bf16 %v881_v24, %v879_v23  ;;  %v893_v7 = vld [vmem:[%s2021_s9 + $0x158] sm:$0xff] }
  0xd1   : > { %v718_v42 = vsel %vm398_vm0, %v716_v40, 0.0  ;;  %v719_v43 = vsel %vm398_vm0, %v717_v41, 0.0  ;;  %v864_v40 = vld [vmem:[%s2021_s9 + $0x70] sm:$0xff]  ;;  %v803_v41 = vld [vmem:[%s2020_s8 + $0x88] sm:$0xff]  ;;  %1172 = vmatprep.subr.bf16.mxu1 %v1171_v39  ;;  %v814_v32 = vld [vmem:[%s2020_s8 + $0xe0] sm:$0xff] }
  0xd2   : > { %v720_v44 = vadd.f32 %v719_v43, %v718_v42  ;;  %v805_v42 = vld [vmem:[%s2020_s8 + $0x98] sm:$0xff]  ;;  %v867_v43 = vld [vmem:[%s2021_s9 + $0x88] sm:$0xff]  ;;  %v1173_v46 = vpack.c.bf16 %v864_v40, %v862_v25  ;;  %1238 = vmatpush1.bf16.msra.mxu0 %v1237_v45  ;;  %v1253_v38 = vpack.c.bf16 %v816_v35, %v814_v32  ;;  %v724_v20 = vld [vmem:[#allocation2] sm:$0x1] }
  0xd3   : > { %v1239_v26 = vpack.c.bf16 %v805_v42, %v803_v41  ;;  %v878_v42 = vld [vmem:[%s2021_s9 + $0xe0] sm:$0xff]  ;;  %v819_v45 = vld [vmem:[%s2020_s8 + $0x108] sm:$0xff]  ;;  %v828_v19 = vld [vmem:[%s2020_s8 + $0x150] sm:$0xff] }
  0xd4   : > { %721 = vadd.xlane.f32.xlu0 %v720_v44  ;;  %v869_v44 = vld [vmem:[%s2021_s9 + $0x98] sm:$0xff]  ;;  %1174 = vmatpush1.bf16.msra.mxu1 %v1173_v46  ;;  %v890_v21 = vld [vmem:[%s2021_s9 + $0x140] sm:$0xff]  ;;  %v892_v22 = vld [vmem:[%s2021_s9 + $0x150] sm:$0xff]  ;;  %v1265_v23 = vpack.c.bf16 %v828_v19, %v826_v17 }
  0xd5   : > { %v1175_v27 = vpack.c.bf16 %v869_v44, %v867_v43  ;;  %1240 = vmatprep.subr.bf16.mxu0 %v1239_v26  ;;  %v880_v43 = vld [vmem:[%s2021_s9 + $0xf0] sm:$0xff]  ;;  %v821_v46 = vld [vmem:[%s2020_s8 + $0x118] sm:$0xff]  ;;  %v1201_v24 = vpack.c.bf16 %v892_v22, %v890_v21  ;;  %v895_v32 = vld [vmem:[%s2021_s9 + $0x168] sm:$0xff] }
  0xd6   : > { %1242 = vmatpush1.bf16.msra.mxu0 %v1241_v53  ;;  %v1189_v44 = vpack.c.bf16 %v880_v43, %v878_v42  ;;  %v1255_v26 = vpack.c.bf16 %v821_v46, %v819_v45  ;;  %v823_v53 = vld [vmem:[%s2020_s8 + $0x128] sm:$0xff]  ;;  %v897_v35 = vld [vmem:[%s2021_s9 + $0x178] sm:$0xff]  ;;  %v906_v17 = vld [vmem:[%s2021_s9 + $0x1c0] sm:$0xff] }
  0xd7   : > { %1176 = vmatprep.subr.bf16.mxu1 %v1175_v27  ;;  %1244 = vmatprep.subr.bf16.mxu0 %v1243_v54  ;;  %v1191_v27 = vpack.c.bf16 %v885_v47, %v883_v4  ;;  %v835_v42 = vld [vmem:[%s2020_s8 + $0x188] sm:$0xff]  ;;  %v837_v43 = vld [vmem:[%s2020_s8 + $0x198] sm:$0xff]  ;;  %v836_v47 = vld [vmem:[%s2020_s8 + $0x190] sm:$0xff] }
  0xd8   : > { %1178 = vmatpush1.bf16.msra.mxu1 %v1177_v9  ;;  %v825_v9 = vld [vmem:[%s2020_s8 + $0x138] sm:$0xff]  ;;  %v899_v45 = vld [vmem:[%s2021_s9 + $0x188] sm:$0xff]  ;;  %v908_v19 = vld [vmem:[%s2021_s9 + $0x1d0] sm:$0xff] }
  0xd9   : > { %1180 = vmatprep.subr.bf16.mxu1 %v1179_v58  ;;  %v1259_v54 = vpack.c.bf16 %v825_v9, %v823_v53  ;;  %v1195_v58 = vpack.c.bf16 %v889_v56, %v887_v55  ;;  %v901_v46 = vld [vmem:[%s2021_s9 + $0x198] sm:$0xff]  ;;  %v840_v55 = vld [vmem:[%s2020_s8 + $0x1b0] sm:$0xff]  ;;  %v847_v21 = vld [vmem:[%s2020_s8 + $0x1e8] sm:$0xff] }
  0xda   : > { %1246 = vmatpush1.bf16.msra.mxu0 %v1245_v63  ;;  %v827_v63 = vld [vmem:[%s2020_s8 + $0x148] sm:$0xff]  ;;  %v1207_v4 = vpack.c.bf16 %v901_v46, %v899_v45  ;;  %v905_v9 = vld [vmem:[%s2021_s9 + $0x1b8] sm:$0xff] }
  0xdb   : > { %1248 = vmatprep.subr.bf16.mxu0 %v1247_v2  ;;  %v849_v22 = vld [vmem:[%s2020_s8 + $0x1f8] sm:$0xff] }
  0xdc   : > { %1182 = vmatpush1.bf16.msra.mxu1 %v1181_v0  ;;  %v829_v0 = vld [vmem:[%s2020_s8 + $0x158] sm:$0xff] }
  0xdd   : > { %1184 = vmatprep.subr.bf16.mxu1 %v1183_v18  ;;  %v1263_v2 = vpack.c.bf16 %v829_v0, %v827_v63  ;;  %v1199_v18 = vpack.c.bf16 %v893_v7, %v891_v6  ;;  %v909_v63 = vld [vmem:[%s2021_s9 + $0x1d8] sm:$0xff]  ;;  %v842_v6 = vld [vmem:[%s2020_s8 + $0x1c0] sm:$0xff]  ;;  %v844_v7 = vld [vmem:[%s2020_s8 + $0x1d0] sm:$0xff] }
  0xde   : > { %1250 = vmatpush1.bf16.msra.mxu0 %v1249_v36  ;;  %v831_v36 = vld [vmem:[%s2020_s8 + $0x168] sm:$0xff] }
  0xdf   : > { %1252 = vmatprep.subr.bf16.mxu0 %v1251_v31 }
  0xe0   : > { %1186 = vmatpush1.bf16.msra.mxu1 %v1185_v29  ;;  %v833_v29 = vld [vmem:[%s2020_s8 + $0x178] sm:$0xff] }
  0xe1   : > { %1188 = vmatprep.subr.bf16.mxu1 %v1187_v37  ;;  %v1267_v31 = vpack.c.bf16 %v833_v29, %v831_v36  ;;  %v830_v37 = vld [vmem:[%s2020_s8 + $0x160] sm:$0xff]  ;;  %v911_v36 = vld [vmem:[%s2021_s9 + $0x1e8] sm:$0xff]  ;;  %v913_v29 = vld [vmem:[%s2021_s9 + $0x1f8] sm:$0xff] }
  0xe2   : > { %1254 = vmatpush1.bf16.msra.mxu0 %v1253_v38  ;;  %v1203_v38 = vpack.c.bf16 %v897_v35, %v895_v32  ;;  %v1219_v32 = vpack.c.bf16 %v913_v29, %v911_v36  ;;  %v848_v35 = vld [vmem:[%s2020_s8 + $0x1f0] sm:$0xff] }
  0xe3   : > { %1256 = vmatprep.subr.bf16.mxu0 %v1255_v26  ;;  %v834_v26 = vld [vmem:[%s2020_s8 + $0x180] sm:$0xff] }
  0xe4   : > { %1190 = vmatpush1.bf16.msra.mxu1 %v1189_v44  ;;  %v1271_v44 = vpack.c.bf16 %v837_v43, %v835_v42  ;;  %v1273_v49 = vpack.c.bf16 %v836_v47, %v834_v26 }
  0xe5   : > { %1192 = vmatprep.subr.bf16.mxu1 %v1191_v27  ;;  %v900_v27 = vld [vmem:[%s2021_s9 + $0x190] sm:$0xff] }
  0xe6   : > { %1258 = vmatpush1.bf16.msra.mxu0 %v1257_v52  ;;  %v1209_v50 = vpack.c.bf16 %v900_v27, %v898_v48  ;;  %v841_v52 = vld [vmem:[%s2020_s8 + $0x1b8] sm:$0xff] }
  0xe7   : > { %1260 = vmatprep.subr.bf16.mxu0 %v1259_v54  ;;  %v1275_v53 = vpack.c.bf16 %v841_v52, %v839_v51  ;;  %v838_v54 = vld [vmem:[%s2020_s8 + $0x1a0] sm:$0xff] }
  0xe8   : > { %1194 = vmatpush1.bf16.msra.mxu1 %v1193_v28  ;;  %v903_v28 = vld [vmem:[%s2021_s9 + $0x1a8] sm:$0xff]  ;;  %v1277_v57 = vpack.c.bf16 %v840_v55, %v838_v54 }
  0xe9   : > { %1196 = vmatprep.subr.bf16.mxu1 %v1195_v58  ;;  %v1211_v56 = vpack.c.bf16 %v905_v9, %v903_v28  ;;  %v902_v58 = vld [vmem:[%s2021_s9 + $0x1a0] sm:$0xff] }
  0xea   : > { %1262 = vmatpush1.bf16.msra.mxu0 %v1261_v8  ;;  %v1213_v62 = vpack.c.bf16 %v904_v59, %v902_v58  ;;  %v845_v8 = vld [vmem:[%s2020_s8 + $0x1d8] sm:$0xff] }
  0xeb   : > { %1264 = vmatprep.subr.bf16.mxu0 %v1263_v2  ;;  %v1279_v0 = vpack.c.bf16 %v845_v8, %v843_v60 }
  0xec   : > { %1198 = vmatpush1.bf16.msra.mxu1 %v1197_v61  ;;  %v907_v61 = vld [vmem:[%s2021_s9 + $0x1c8] sm:$0xff] }
  0xed   : > { %1200 = vmatprep.subr.bf16.mxu1 %v1199_v18  ;;  %v1215_v2 = vpack.c.bf16 %v909_v63, %v907_v61  ;;  %v1281_v18 = vpack.c.bf16 %v844_v7, %v842_v6 }
  0xee   : > { %1266 = vmatpush1.bf16.msra.mxu0 %v1265_v23  ;;  %v1217_v23 = vpack.c.bf16 %v908_v19, %v906_v17 }
  0xef   : > { %1268 = vmatprep.subr.bf16.mxu0 %v1267_v31  ;;  %v846_v31 = vld [vmem:[%s2020_s8 + $0x1e0] sm:$0xff] }
  0xf0   : > { %1202 = vmatpush1.bf16.msra.mxu1 %v1201_v24  ;;  %v1283_v24 = vpack.c.bf16 %v849_v22, %v847_v21 }
  0xf1   : > { %1204 = vmatprep.subr.bf16.mxu1 %v1203_v38  ;;  %v912_v38 = vld [vmem:[%s2021_s9 + $0x1f0] sm:$0xff] }
 0x161   : > { %v722_v39 = vpop.xlane.xlu0 %721 }
 0x162   : > { %v723_v25 = vmul.f32 0.00390625, %v722_v39  ;;  %v894_v39 = vld [vmem:[%s2021_s9 + $0x160] sm:$0xff] }
 0x164   : > { %v725_v40 = vadd.f32 %v724_v20, %v723_v25  ;;  %v832_v20 = vld [vmem:[%s2020_s8 + $0x170] sm:$0xff] }
 0x165   : > { %v896_v25 = vld [vmem:[%s2021_s9 + $0x170] sm:$0xff] }
 0x166   : > { %v726_v41 = vmax.f32 %v725_v40, 0.0  ;;  %v1269_v40 = vpack.c.bf16 %v832_v20, %v830_v37  ;;  %v910_v37 = vld [vmem:[%s2021_s9 + $0x1e0] sm:$0xff]  ;;  %v1285_v20 = vpack.c.bf16 %v848_v35, %v846_v31 }
 0x168   : > { %730 = vperm.xlu1 %1302, %v726_v41   ;;  %v1205_v41 = vpack.c.bf16 %v896_v25, %v894_v39  ;;  %1270 = vmatpush1.bf16.msra.mxu0 %v1269_v40  ;;  %v1221_v39 = vpack.c.bf16 %v912_v38, %v910_v37  ;;  %v727_v25 = vld [vmem:[%s2018_s6] sm:$0x3] }
 0x169   : > { %1272 = vmatprep.subr.bf16.mxu0 %v1271_v44  ;;  %v748_v40 = vld [vmem:[%s2019_s7] sm:$0x3]  ;;  %v741_v42 = vrot.slane %v727_v25, %v1483_v33 }
 0x16a   : > { %1206 = vmatpush1.bf16.msra.mxu1 %v1205_v41  ;;  %v737_v41 = vrot.slane %v727_v25, %v1486_v34  ;;  %v753_v43 = vrot.slane %v748_v40, %v1486_v34 }
 0x16b   : > { %1208 = vmatprep.subr.bf16.mxu1 %v1207_v4 }
 0x16c   : > { %1274 = vmatpush1.bf16.msra.mxu0 %v1273_v49 }
 0x16d   : > { %1276 = vmatprep.subr.bf16.mxu0 %v1275_v53 }
 0x16e   : > { %1210 = vmatpush1.bf16.msra.mxu1 %v1209_v50 }
 0x16f   : > { %1212 = vmatprep.subr.bf16.mxu1 %v1211_v56 }
 0x170   : > { %1278 = vmatpush1.bf16.msra.mxu0 %v1277_v57 }
 0x171   : > { %1280 = vmatprep.subr.bf16.mxu0 %v1279_v0 }
 0x172   : > { %1214 = vmatpush1.bf16.msra.mxu1 %v1213_v62 }
 0x173   : > { %1216 = vmatprep.subr.bf16.mxu1 %v1215_v2 }
 0x174   : > { %1282 = vmatpush1.bf16.msra.mxu0 %v1281_v18 }
 0x175   : > { %1284 = vmatprep.subr.bf16.mxu0 %v1283_v24 }
 0x176   : > { %1218 = vmatpush1.bf16.msra.mxu1 %v1217_v23 }
 0x177   : > { %1220 = vmatprep.subr.bf16.mxu1 %v1219_v32 }
 0x178   : > { %1286 = vmatpush1.bf16.msra.mxu0 %v1285_v20 }
 0x17a   : > { %1222 = vmatpush1.bf16.msra.mxu1 %v1221_v39 }
 0x17b   : > { %1056 = vmatmul.mubr.f32.vlgmr.msra.gmra.mrb[0].mxu0 %v1399_v1  ;;  %v757_v1 = vrot.slane %v748_v40, %v1483_v33 }
 0x17c   : > { %1061 = vmatprep.mubr.f32.mxu0 %v1411_v10 }
 0x17f   : > { %1062 = vmatmul.mubr.f32.gmra.mrb[2].mxu0 %v1401_v3 }
 0x1e7   : > { %v731_v44 = vpop.permute.xlu1 %730 }
 0x1e8   : > { %v744_v10 = vmul.f32 %v737_v41, %v731_v44  ;;  %v745_v45 = vmul.f32 %v741_v42, %v731_v44 }
 0x1ea   : > { %v760_v3 = vadd.f32 %v753_v43, %v744_v10  ;;  %v761_v46 = vadd.f32 %v757_v1, %v745_v45 }
 0x1ec   : > { %v1152_v26 = vmul.f32 -1.442695, %v760_v3  ;;  %v1153_v4 = vmul.f32 -1.442695, %v761_v46 }
 0x1ee   : > { %1304 = vpow2.f32 %v1152_v26 }
 0x1ef   : > { %1306 = vpow2.f32 %v1153_v4 }
 0x1f8   : > { %v1305_v47 = vpop.eup %1304 }
 0x1f9   : > { %v1307_v48 = vpop.eup %1306  ;;  %v768_v27 = vadd.f32 1.0, %v1305_v47 }
 0x1fa   : > { %v769_v49 = vadd.f32 1.0, %v1307_v48 }
 0x1fb   : > { %1308 = vrcp.f32 %v768_v27 }
 0x1fc   : > { %1310 = vrcp.f32 %v769_v49 }
 0x205   : > { %v1309_v50 = vpop.eup %1308 }
 0x206   : > { %v1311_v51 = vpop.eup %1310  ;;  %v777_v33 = vrot.slane %v1309_v50, %v1486_v34 }
 0x207   : > { %v781_v52 = vrot.slane %v1311_v51, %v1486_v34 }
 0x208   : > { %v782_v28 = vmul.f32 %v777_v33, %v686_v14  ;;  %v784_v54 = vmul.f32 %v777_v33, %v688_v30 }
 0x209   : > { %v783_v53 = vmul.f32 %v781_v52, %v687_v15  ;;  %v785_v9 = vmul.f32 %v781_v52, %v689_v16 }
 0x20b   : > { %978 = vmatprep.mubr.f32.mxu1 %v783_v53 }
 0x20c   : > { %979 = vmatmul.mubr.f32.vlgmr.msra.gmra.mrb[0].mxu1 %v782_v28 }
 0x20d   : > { %984 = vmatprep.mubr.f32.mxu1 %v785_v9 }
 0x210   : > { %985 = vmatmul.mubr.f32.gmra.mrb[2].mxu1 %v784_v54 }
 0x24e   : > { %v1057_v55 = vpop.f32.mrb[0].mxu0 }
 0x24f   : > { %v1059_v56 = vpop.f32.mrb[1].mxu0 }
 0x252   : > { %v1063_v57 = vpop.f32.mrb[2].mxu0 }
 0x253   : > { %v1065_v34 = vpop.f32.mrb[3].mxu0 }
 0x2df   : > { %v980_v5 = vpop.f32.mrb[0].mxu1 }
 0x2e0   : > { %v1058_v13 = vadd.f32 %v1057_v55, %v980_v5  ;;  %v982_v14 = vpop.f32.mrb[1].mxu1 }
 0x2e1   : > { %v1060_v15 = vadd.f32 %v1059_v56, %v982_v14 }
 0x2e2   : > { %1068 = vst [vmem:[%s381_s13] sm:$0xff] %v1058_v13 }
 0x2e3   : > { %1069 = vst [vmem:[%s381_s13 + $0x8] sm:$0xff] %v1060_v15  ;;  %v986_v12 = vpop.f32.mrb[2].mxu1 }
 0x2e4   : > { %v1064_v16 = vadd.f32 %v1063_v57, %v986_v12  ;;  %v988_v58 = vpop.f32.mrb[3].mxu1 }
 0x2e5   : > { %v1066_v11 = vadd.f32 %v1065_v34, %v988_v58 }
 0x2e6   : > { %1070 = vst [vmem:[%s381_s13 + $0x10] sm:$0xff] %v1064_v16 }
 0x2e7   : > { %1071 = vst [vmem:[%s381_s13 + $0x18] sm:$0xff] %v1066_v11 }
 0x2e8 PF: > { %s22_s15 = sadd.s32 1, %s1318_s15  }
 0x2e9   : > { %p19_p4 = scmp.ge.s32.totalorder %s22_s15, 4  }
 0x2eb   :  { %21 = sbr.rel (!%p19_p4) target bundleno = 3 (0x3), region = 93 }

// kernel: run.12
= control target key start
LH: loop header
LB: loop body
LE: loop exit
PB: predicated region body
PF: predicated region fallthrough
CT: control target
= control target key end

     0   :  { %s824_s21 = smov 0   ;;  %s1132_s0 = inlined_call_operand.vmem [shape: f32[2,8,512], index: 0, kind: input, shape index: {}]   ;;  %s1133_s1 = inlined_call_operand.vmem [shape: f32[9,256], index: 1, kind: input, shape index: {}]   ;;  %s1134_s2 = inlined_call_operand.vmem [shape: f32[1,256], index: 2, kind: input, shape index: {}]   ;;  %s1135_s3 = inlined_call_operand.vmem [shape: f32[256,256], index: 3, kind: input, shape index: {}]   ;;  %s1136_s4 = inlined_call_operand.vmem [shape: f32[1,256], index: 4, kind: input, shape index: {}]   ;;  %s1137_s5 = inlined_call_operand.vmem [shape: f32[2,8,256], index: 5, kind: input, shape index: {}]   ;;  %s1138_s6 = inlined_call_operand.vmem [shape: f32[2,8,256], index: 6, kind: output, shape index: {}]  }
   0x1 LB: > { %s687_s22 = sadd.s32 4294967295, %s785_s21   ;;  %p691_p0 = scmp.ge.s32.totalorder %s785_s21, 1  ;;  %s785_s21 = sphi %s824_s21, %s16_s21  }
   0x2   : > { %p222_p1 = scmp.lt.s32.totalorder %s785_s21, 3 }
   0x4   : > { %p223_p2 = pnand %p691_p0, %p222_p1 }
   0x5   : > { %p257_p3 = scmp.lt.s32.totalorder (!%p223_p2), %s687_s22, 1  ;;  %v466_v0 = vld [vmem:[%s1135_s3 + $0x8] sm:$0xff] (!%p223_p2)  ;;  %v468_v1 = vld [vmem:[%s1135_s3 + $0x18] sm:$0xff] (!%p223_p2)  ;;  %v465_v2 = vld [vmem:[%s1135_s3] sm:$0xff] (!%p223_p2)  ;;  %vm282_vm0 = vcmask (!%p223_p2), 1040384   ;;  %s787_s29 = smov (!%p223_p2), 16  }
   0x6   : > { %226 = sbr.rel (%p223_p2) target bundleno = 385 (0x181), region = 44  ;;  %v467_v3 = vld [vmem:[%s1135_s3 + $0x10] sm:$0xff] (!%p223_p2)  ;;  %v705_v4 = vpack.c.bf16 (!%p223_p2), %v468_v1, %v466_v0  ;;  %v470_v6 = vld [vmem:[%s1135_s3 + $0x28] sm:$0xff] (!%p223_p2)  ;;  %v472_v7 = vld [vmem:[%s1135_s3 + $0x38] sm:$0xff] (!%p223_p2)  ;;  %s788_s14 = smov (!%p223_p2), 112   ;;  %vm296_vm1 = vcmask (!%p223_p2), 130048  }
   0x7   : > { %v707_v5 = vpack.c.bf16 (!%p223_p2), %v467_v3, %v465_v2  ;;  %v469_v8 = vld [vmem:[%s1135_s3 + $0x20] sm:$0xff] (!%p223_p2)  ;;  %v709_v9 = vpack.c.bf16 (!%p223_p2), %v472_v7, %v470_v6  ;;  %v471_v10 = vld [vmem:[%s1135_s3 + $0x30] sm:$0xff] (!%p223_p2)  ;;  %v474_v11 = vld [vmem:[%s1135_s3 + $0x48] sm:$0xff] (!%p223_p2)  ;;  %vm327_vm2 = vcmask (!%p223_p2), 916480  }
   0x8   : > { %v476_v12 = vld [vmem:[%s1135_s3 + $0x58] sm:$0xff] (!%p223_p2)  ;;  %706 = vmatprep.subr.bf16.mxu0 (!%p223_p2), %v705_v4  ;;  %v711_v13 = vpack.c.bf16 (!%p223_p2), %v471_v10, %v469_v8  ;;  %v473_v14 = vld [vmem:[%s1135_s3 + $0x40] sm:$0xff] (!%p223_p2)  ;;  %v475_v15 = vld [vmem:[%s1135_s3 + $0x50] sm:$0xff] (!%p223_p2) }
   0x9   : > { %708 = vmatpush1.bf16.msra.mxu0 (!%p223_p2), %v707_v5  ;;  %v713_v19 = vpack.c.bf16 (!%p223_p2), %v476_v12, %v474_v11  ;;  %v478_v22 = vld [vmem:[%s1135_s3 + $0x68] sm:$0xff] (!%p223_p2)  ;;  %v480_v23 = vld [vmem:[%s1135_s3 + $0x78] sm:$0xff] (!%p223_p2)  ;;  %v715_v26 = vpack.c.bf16 (!%p223_p2), %v475_v15, %v473_v14  ;;  %v477_v28 = vld [vmem:[%s1135_s3 + $0x60] sm:$0xff] (!%p223_p2) }
   0xa   : > { %710 = vmatprep.subr.bf16.mxu0 (!%p223_p2), %v709_v9  ;;  %v717_v27 = vpack.c.bf16 (!%p223_p2), %v480_v23, %v478_v22  ;;  %v479_v29 = vld [vmem:[%s1135_s3 + $0x70] sm:$0xff] (!%p223_p2)  ;;  %v482_v30 = vld [vmem:[%s1135_s3 + $0x88] sm:$0xff] (!%p223_p2)  ;;  %v484_v31 = vld [vmem:[%s1135_s3 + $0x98] sm:$0xff] (!%p223_p2) }
   0xb   : > { %v719_v32 = vpack.c.bf16 (!%p223_p2), %v479_v29, %v477_v28  ;;  %v721_v33 = vpack.c.bf16 (!%p223_p2), %v484_v31, %v482_v30  ;;  %v481_v34 = vld [vmem:[%s1135_s3 + $0x80] sm:$0xff] (!%p223_p2)  ;;  %v483_v35 = vld [vmem:[%s1135_s3 + $0x90] sm:$0xff] (!%p223_p2)  ;;  %v486_v37 = vld [vmem:[%s1135_s3 + $0xa8] sm:$0xff] (!%p223_p2) }
   0xc   : > { %v488_v38 = vld [vmem:[%s1135_s3 + $0xb8] sm:$0xff] (!%p223_p2)  ;;  %v723_v39 = vpack.c.bf16 (!%p223_p2), %v483_v35, %v481_v34  ;;  %v485_v41 = vld [vmem:[%s1135_s3 + $0xa0] sm:$0xff] (!%p223_p2)  ;;  %v487_v42 = vld [vmem:[%s1135_s3 + $0xb0] sm:$0xff] (!%p223_p2) }
   0xd   : > { %s1140_s22 = smov (!%p257_p3, %s687_s22), 1  ;;  %712 = vmatpush1.bf16.msra.mxu0 %v711_v13  ;;  %v725_v40 = vpack.c.bf16 %v488_v38, %v486_v37  ;;  %v490_v43 = vld [vmem:[%s1135_s3 + $0xc8] sm:$0xff]  ;;  %v492_v44 = vld [vmem:[%s1135_s3 + $0xd8] sm:$0xff]  ;;  %v727_v45 = vpack.c.bf16 %v487_v42, %v485_v41  ;;  %v489_v47 = vld [vmem:[%s1135_s3 + $0xc0] sm:$0xff] }
   0xe   : > { %s702_s19 = sshll.u32 %s1140_s22, 5  ;;  %714 = vmatprep.subr.bf16.mxu0 %v713_v19  ;;  %v729_v46 = vpack.c.bf16 %v492_v44, %v490_v43  ;;  %v491_v48 = vld [vmem:[%s1135_s3 + $0xd0] sm:$0xff]  ;;  %v494_v49 = vld [vmem:[%s1135_s3 + $0xe8] sm:$0xff]  ;;  %v496_v50 = vld [vmem:[%s1135_s3 + $0xf8] sm:$0xff]  ;;  %s703_s16 = sshll.u32 %s1140_s22, 4 }
   0xf   : > { %s868_s24 = scalar_lea.vmem %s1132_s0, %s702_s19  ;;  %v731_v51 = vpack.c.bf16 %v491_v48, %v489_v47  ;;  %v733_v52 = vpack.c.bf16 %v496_v50, %v494_v49  ;;  %v493_v53 = vld [vmem:[%s1135_s3 + $0xe0] sm:$0xff]  ;;  %v495_v54 = vld [vmem:[%s1135_s3 + $0xf0] sm:$0xff]  ;;  %v498_v55 = vld [vmem:[%s1135_s3 + $0x108] sm:$0xff]  ;;  %s266_s18 = scalar_lea.vmem %s1137_s5, %s703_s16 }
  0x10   : > { %v877_v16 = vld [vmem:[%s868_s24 + $0x8] sm:$0xff]  ;;  %v880_v17 = vld [vmem:[%s868_s24 + $0x10] sm:$0xff]  ;;  %v883_v18 = vld [vmem:[%s868_s24 + $0x18] sm:$0xff]  ;;  %v735_v57 = vpack.c.bf16 %v495_v54, %v493_v53  ;;  %s271_s23 = scalar_lea.vmem %s1138_s6, %s703_s16 }
  0x11   : > { %348 = vrot.lane.b32.xlu1 %v877_v16, %s787_s29  ;;  %v278_v20 = vrot.slane %v880_v17, 7  ;;  %v279_v21 = vrot.slane %v883_v18, 7  ;;  %716 = vmatpush1.bf16.msra.mxu0 %v715_v26  ;;  %v926_v36 = vld [vmem:[%s868_s24] sm:$0xff]  ;;  %v500_v56 = vld [vmem:[%s1135_s3 + $0x118] sm:$0xff]  ;;  %v499_v60 = vld [vmem:[%s1135_s3 + $0x110] sm:$0xff] }
  0x12   : > { %718 = vmatprep.subr.bf16.mxu0 %v717_v27  ;;  %v737_v58 = vpack.c.bf16 %v500_v56, %v498_v55  ;;  %v497_v59 = vld [vmem:[%s1135_s3 + $0x100] sm:$0xff]  ;;  %v502_v61 = vld [vmem:[%s1135_s3 + $0x128] sm:$0xff]  ;;  %v504_v62 = vld [vmem:[%s1135_s3 + $0x138] sm:$0xff] }
  0x13   : > { %v895_v24 = vsel %vm282_vm0, 0.0, %v278_v20  ;;  %v897_v25 = vsel %vm282_vm0, 0.0, %v279_v21  ;;  %v739_v63 = vpack.c.bf16 %v499_v60, %v497_v59  ;;  %v741_v0 = vpack.c.bf16 %v504_v62, %v502_v61  ;;  %v501_v1 = vld [vmem:[%s1135_s3 + $0x120] sm:$0xff]  ;;  %v503_v2 = vld [vmem:[%s1135_s3 + $0x130] sm:$0xff]  ;;  %v506_v3 = vld [vmem:[%s1135_s3 + $0x148] sm:$0xff] }
  0x14   : > { %292 = vrot.lane.b32.xlu0 %v895_v24, %s787_s29  ;;  %v508_v4 = vld [vmem:[%s1135_s3 + $0x158] sm:$0xff]  ;;  %v743_v5 = vpack.c.bf16 %v503_v2, %v501_v1  ;;  %v505_v7 = vld [vmem:[%s1135_s3 + $0x140] sm:$0xff]  ;;  %v507_v8 = vld [vmem:[%s1135_s3 + $0x150] sm:$0xff] }
  0x15   : > { %325 = vrot.lane.b32.xlu1 %v897_v25, %s788_s14  ;;  %720 = vmatpush1.bf16.msra.mxu0 %v719_v32  ;;  %v745_v6 = vpack.c.bf16 %v508_v4, %v506_v3  ;;  %v510_v9 = vld [vmem:[%s1135_s3 + $0x168] sm:$0xff]  ;;  %v512_v10 = vld [vmem:[%s1135_s3 + $0x178] sm:$0xff]  ;;  %v747_v11 = vpack.c.bf16 %v507_v8, %v505_v7  ;;  %v509_v13 = vld [vmem:[%s1135_s3 + $0x160] sm:$0xff] }
  0x16   : > { %722 = vmatprep.subr.bf16.mxu0 %v721_v33  ;;  %v749_v12 = vpack.c.bf16 %v512_v10, %v510_v9  ;;  %v511_v14 = vld [vmem:[%s1135_s3 + $0x170] sm:$0xff]  ;;  %v514_v15 = vld [vmem:[%s1135_s3 + $0x188] sm:$0xff]  ;;  %v516_v19 = vld [vmem:[%s1135_s3 + $0x198] sm:$0xff] }
  0x17   : > { %v751_v20 = vpack.c.bf16 %v511_v14, %v509_v13  ;;  %v753_v21 = vpack.c.bf16 %v516_v19, %v514_v15  ;;  %v513_v22 = vld [vmem:[%s1135_s3 + $0x180] sm:$0xff]  ;;  %v515_v23 = vld [vmem:[%s1135_s3 + $0x190] sm:$0xff]  ;;  %v518_v26 = vld [vmem:[%s1135_s3 + $0x1a8] sm:$0xff] }
  0x18   : > { %294 = vrot.lane.b32.xlu0 %v897_v25, %s787_s29  ;;  %v520_v27 = vld [vmem:[%s1135_s3 + $0x1b8] sm:$0xff]  ;;  %v755_v28 = vpack.c.bf16 %v515_v23, %v513_v22  ;;  %v517_v30 = vld [vmem:[%s1135_s3 + $0x1a0] sm:$0xff]  ;;  %v519_v31 = vld [vmem:[%s1135_s3 + $0x1b0] sm:$0xff] }
  0x19   : > { %323 = vrot.lane.b32.xlu1 %v895_v24, %s788_s14  ;;  %724 = vmatpush1.bf16.msra.mxu0 %v723_v39  ;;  %v757_v29 = vpack.c.bf16 %v520_v27, %v518_v26  ;;  %v522_v32 = vld [vmem:[%s1135_s3 + $0x1c8] sm:$0xff]  ;;  %v524_v33 = vld [vmem:[%s1135_s3 + $0x1d8] sm:$0xff]  ;;  %v759_v34 = vpack.c.bf16 %v519_v31, %v517_v30  ;;  %v521_v37 = vld [vmem:[%s1135_s3 + $0x1c0] sm:$0xff] }
  0x1a   : > { %726 = vmatprep.subr.bf16.mxu0 %v725_v40  ;;  %v761_v35 = vpack.c.bf16 %v524_v33, %v522_v32  ;;  %v523_v38 = vld [vmem:[%s1135_s3 + $0x1d0] sm:$0xff]  ;;  %v526_v39 = vld [vmem:[%s1135_s3 + $0x1e8] sm:$0xff]  ;;  %v528_v40 = vld [vmem:[%s1135_s3 + $0x1f8] sm:$0xff] }
  0x1b   : > { %v763_v41 = vpack.c.bf16 %v523_v38, %v521_v37  ;;  %v765_v42 = vpack.c.bf16 %v528_v40, %v526_v39  ;;  %v525_v43 = vld [vmem:[%s1135_s3 + $0x1e0] sm:$0xff]  ;;  %v527_v44 = vld [vmem:[%s1135_s3 + $0x1f0] sm:$0xff] }
  0x1c   : > { %346 = vrot.lane.b32.xlu0 %v926_v36, %s787_s29  ;;  %v285_v50 = vld [vmem:[%s1133_s1] sm:$0xff] }
  0x1d   : > { %378 = vrot.lane.b32.xlu1 %v926_v36, %s788_s14  ;;  %728 = vmatpush1.bf16.msra.mxu0 %v727_v45  ;;  %v767_v45 = vpack.c.bf16 %v527_v44, %v525_v43 }
  0x1e   : > { %730 = vmatprep.subr.bf16.mxu0 %v729_v46  ;;  %v301_v46 = vlaneseq }
  0x20   : > { %380 = vrot.lane.b32.xlu0 %v877_v16, %s788_s14  ;;  %v302_v47 = vshrl.u32 %v301_v46, 7 }
  0x21   : > { %400 = vrot.lane.b32.xlu1 %v883_v18, %s787_s29  ;;  %732 = vmatpush1.bf16.msra.mxu0 %v731_v51  ;;  %v286_v51 = vld [vmem:[%s1133_s1 + $0x8] sm:$0xff] }
  0x22   : > { %734 = vmatprep.subr.bf16.mxu0 %v733_v52  ;;  %v1074_v48 = vsub.s32 1, %v302_v47  ;;  %v1076_v49 = vsub.s32 0, %v302_v47  ;;  %v368_v53 = vsub.s32 4, %v302_v47  ;;  %v334_v56 = vsub.s32 2, %v302_v47 }
  0x23   : > { %v388_v7 = vsub.s32 5, %v302_v47  ;;  %v408_v26 = vsub.s32 6, %v302_v47  ;;  %v420_v31 = vsub.s32 7, %v302_v47 }
  0x24   : > { %398 = vrot.lane.b32.xlu0 %v880_v17, %s787_s29  ;;  %v314_v54 = vrot.slane %v285_v50, %v1074_v48  ;;  %v304_v55 = vrot.slane %v285_v50, %v1076_v49  ;;  %v373_v61 = vrot.slane %v286_v51, %v368_v53  ;;  %v308_v62 = vrot.slane %v286_v51, %v1076_v49 }
  0x25   : > { %430 = vrot.lane.b32.xlu1 %v880_v17, %s788_s14  ;;  %736 = vmatpush1.bf16.msra.mxu0 %v735_v57  ;;  %v318_v57 = vrot.slane %v286_v51, %v1074_v48  ;;  %v369_v1 = vrot.slane %v285_v50, %v368_v53  ;;  %v335_v3 = vrot.slane %v285_v50, %v334_v56 }
  0x26   : > { %738 = vmatprep.subr.bf16.mxu0 %v737_v58  ;;  %v389_v23 = vrot.slane %v285_v50, %v388_v7  ;;  %v409_v38 = vrot.slane %v285_v50, %v408_v26  ;;  %v413_v39 = vrot.slane %v286_v51, %v408_v26  ;;  %v421_v43 = vrot.slane %v285_v50, %v420_v31 }
  0x27   : > { %v320_v4 = vmul.f32 %v318_v57, %v897_v25  ;;  %v374_v15 = vmul.f32 %v369_v1, %v926_v36  ;;  %v425_v44 = vrot.slane %v286_v51, %v420_v31 }
  0x28   : > { %432 = vrot.lane.b32.xlu0 %v883_v18, %s788_s14 }
  0x29   : > { %740 = vmatpush1.bf16.msra.mxu0 %v739_v63  ;;  %v356_v63 = vsub.s32 3, %v302_v47  ;;  %v427_v57 = vmul.f32 %v425_v44, %v883_v18 }
  0x2a   : > { %742 = vmatprep.subr.bf16.mxu0 %v741_v0  ;;  %v319_v0 = vmul.f32 %v314_v54, %v895_v24  ;;  %v375_v24 = vmul.f32 %v373_v61, %v877_v16  ;;  %v393_v16 = vrot.slane %v286_v51, %v388_v7 }
  0x2b   : > { %v357_v13 = vrot.slane %v285_v50, %v356_v63  ;;  %v361_v14 = vrot.slane %v286_v51, %v356_v63  ;;  %v289_v50 = vld [vmem:[%s1134_s2] sm:$0x3]  ;;  %v699_v63 = vld [vmem:[%s1133_s1 + $0x18] ss:$0 sm:$0xff] }
  0x2d   : > { %744 = vmatpush1.bf16.msra.mxu0 %v743_v5  ;;  %v339_v5 = vrot.slane %v286_v51, %v334_v56  ;;  %v426_v56 = vmul.f32 %v421_v43, %v880_v17  ;;  %v698_v51 = vld [vmem:[%s1133_s1 + $0x10] ss:$0 sm:$0xff] }
  0x2e   : > { %746 = vmatprep.subr.bf16.mxu0 %v745_v6 }
  0x31   : > { %748 = vmatpush1.bf16.msra.mxu0 %v747_v11 }
  0x32   : > { %750 = vmatprep.subr.bf16.mxu0 %v749_v12 }
  0x35   : > { %752 = vmatpush1.bf16.msra.mxu0 %v751_v20 }
  0x36   : > { %754 = vmatprep.subr.bf16.mxu0 %v753_v21 }
  0x39   : > { %756 = vmatpush1.bf16.msra.mxu0 %v755_v28 }
  0x3a   : > { %758 = vmatprep.subr.bf16.mxu0 %v757_v29 }
  0x3d   : > { %760 = vmatpush1.bf16.msra.mxu0 %v759_v34 }
  0x3e   : > { %762 = vmatprep.subr.bf16.mxu0 %v761_v35 }
  0x41   : > { %764 = vmatpush1.bf16.msra.mxu0 %v763_v41 }
  0x42   : > { %766 = vmatprep.subr.bf16.mxu0 %v765_v42 }
  0x45   : > { %768 = vmatpush1.bf16.msra.mxu0 %v767_v45 }
  0x83   : > { %v349_v52 = vpop.permute.xlu1 %348 }
  0x86   : > { %v293_v58 = vpop.permute.xlu0 %292 }
  0x87   : > { %v300_v59 = vsel %vm296_vm1, 0.0, %v293_v58  ;;  %v326_v60 = vpop.permute.xlu1 %325 }
  0x88   : > { %v309_v2 = vmul.f32 %v304_v55, %v300_v59  ;;  %v331_v8 = vsel %vm327_vm2, %v326_v60, 0.0 }
  0x89   : > { %v341_v25 = vmul.f32 %v339_v5, %v331_v8 }
  0x8a   : > { %v295_v6 = vpop.permute.xlu0 %294  ;;  %v321_v19 = vadd.f32 %v319_v0, %v309_v2 }
  0x8b   : > { %v297_v9 = vsel %vm296_vm1, %v293_v58, %v295_v6  ;;  %v324_v10 = vpop.permute.xlu1 %323 }
  0x8c   : > { %v310_v11 = vmul.f32 %v308_v62, %v297_v9  ;;  %v328_v12 = vsel %vm327_vm2, %v324_v10, %v326_v60 }
  0x8d   : > { %v340_v20 = vmul.f32 %v335_v3, %v328_v12  ;;  %v454_v3 = vrot.slane %v289_v50, %v1076_v49 }
  0x8e   : > { %v322_v21 = vadd.f32 %v320_v4, %v310_v11  ;;  %v347_v22 = vpop.permute.xlu0 %346  ;;  %v458_v4 = vrot.slane %v289_v50, %v1074_v48 }
  0x8f   : > { %v342_v27 = vadd.f32 %v340_v20, %v321_v19  ;;  %v350_v28 = vsel %vm296_vm1, %v347_v22, %v349_v52  ;;  %v353_v29 = vsel %vm296_vm1, 0.0, %v347_v22  ;;  %v379_v30 = vpop.permute.xlu1 %378  ;;  %v614_v22 = vld [vmem:[%s266_s18] sm:$0xff] }
  0x90   : > { %v343_v32 = vadd.f32 %v341_v25, %v322_v21  ;;  %v362_v33 = vmul.f32 %v357_v13, %v353_v29  ;;  %v363_v34 = vmul.f32 %v361_v14, %v350_v28 }
  0x92   : > { %v364_v35 = vadd.f32 %v362_v33, %v342_v27  ;;  %v365_v36 = vadd.f32 %v363_v34, %v343_v32  ;;  %v381_v37 = vpop.permute.xlu0 %380  ;;  %v615_v27 = vld [vmem:[%s266_s18 + $0x8] sm:$0xff] }
  0x93   : > { %v382_v40 = vsel %vm327_vm2, %v379_v30, %v381_v37  ;;  %v385_v41 = vsel %vm327_vm2, %v381_v37, 0.0  ;;  %v401_v42 = vpop.permute.xlu1 %400 }
  0x94   : > { %v377_v45 = vadd.f32 %v375_v24, %v365_v36  ;;  %v376_v46 = vadd.f32 %v374_v15, %v364_v35  ;;  %v394_v52 = vmul.f32 %v389_v23, %v382_v40  ;;  %v395_v47 = vmul.f32 %v393_v16, %v385_v41  ;;  %v529_v24 = vld [vmem:[%s1136_s4] sm:$0x3] }
  0x95   : > { %v534_v15 = vrot.slane %v529_v24, %v1076_v49  ;;  %v538_v19 = vrot.slane %v529_v24, %v1074_v48 }
  0x96   : > { %v399_v53 = vpop.permute.xlu0 %398  ;;  %v396_v58 = vadd.f32 %v394_v52, %v376_v46  ;;  %v397_v59 = vadd.f32 %v395_v47, %v377_v45 }
  0x97   : > { %v402_v54 = vsel %vm296_vm1, %v399_v53, %v401_v42  ;;  %v405_v55 = vsel %vm296_vm1, 0.0, %v399_v53  ;;  %v431_v62 = vpop.permute.xlu1 %430 }
  0x98   : > { %v414_v60 = vmul.f32 %v409_v38, %v405_v55  ;;  %v415_v61 = vmul.f32 %v413_v39, %v402_v54 }
  0x9a   : > { %v416_v17 = vadd.f32 %v414_v60, %v396_v58  ;;  %v417_v0 = vadd.f32 %v415_v61, %v397_v59  ;;  %v433_v18 = vpop.permute.xlu0 %432 }
  0x9b   : > { %v434_v1 = vsel %vm327_vm2, %v431_v62, %v433_v18  ;;  %v437_v2 = vsel %vm327_vm2, %v433_v18, 0.0 }
  0x9c   : > { %v428_v5 = vadd.f32 %v426_v56, %v416_v17  ;;  %v446_v6 = vmul.f32 %v698_v51, %v434_v1  ;;  %v447_v7 = vmul.f32 %v699_v63, %v437_v2  ;;  %v429_v8 = vadd.f32 %v427_v57, %v417_v0 }
  0x9e   : > { %v448_v9 = vadd.f32 %v446_v6, %v428_v5  ;;  %v449_v10 = vadd.f32 %v447_v7, %v429_v8 }
  0xa0   : > { %v462_v11 = vadd.f32 %v458_v4, %v449_v10  ;;  %v461_v12 = vadd.f32 %v454_v3, %v448_v9 }
  0xa2   : > { %v464_v13 = vmax.f32 %v462_v11, 0.0  ;;  %v463_v14 = vmax.f32 %v461_v12, 0.0 }
  0xa4   : > { %605 = vmatprep.mubr.f32.mxu0 %v464_v13 }
  0xa5   : > { %606 = vmatmul.mubr.f32.vlgmr.msra.gmra.mrb[0].mxu0 %v463_v14 }
 0x178   : > { %v607_v20 = vpop.f32.mrb[0].mxu0 }
 0x179   : > { %v608_v25 = vadd.f32 %v607_v20, %v534_v15  ;;  %v609_v21 = vpop.f32.mrb[1].mxu0 }
 0x17a   : > { %v610_v23 = vadd.f32 %v609_v21, %v538_v19 }
 0x17b   : > { %v612_v26 = vmax.f32 %v608_v25, 0.0 }
 0x17c   : > { %v613_v28 = vmax.f32 %v610_v23, 0.0 }
 0x17d   : > { %v616_v29 = vadd.f32 %v614_v22, %v612_v26 }
 0x17e   : > { %v617_v49 = vadd.f32 %v615_v27, %v613_v28 }
 0x17f   : > { %618 = vst [vmem:[%s271_s23] sm:$0xff] %v616_v29 }
 0x180   : > { %619 = vst [vmem:[%s271_s23 + $0x8] sm:$0xff] %v617_v49 }
 0x181 PF: > { %s16_s21 = sadd.s32 1, %s785_s21  }
 0x182   : > { %p13_p4 = scmp.ge.s32.totalorder %s16_s21, 4  }
 0x184   :  { %15 = sbr.rel (!%p13_p4) target bundleno = 1 (0x1), region = 77 }

// kernel: run.14
= control target key start
LH: loop header
LB: loop body
LE: loop exit
PB: predicated region body
PF: predicated region fallthrough
CT: control target
= control target key end

     0   :  { %s711_s18 = smov 0   ;;  %s918_s0 = inlined_call_operand.vmem [shape: f32[2,8,512], index: 0, kind: input, shape index: {}]   ;;  %s919_s1 = inlined_call_operand.vmem [shape: f32[9,256], index: 1, kind: input, shape index: {}]   ;;  %s920_s2 = inlined_call_operand.vmem [shape: f32[1,256], index: 2, kind: input, shape index: {}]   ;;  %s921_s3 = inlined_call_operand.vmem [shape: f32[256,128], index: 3, kind: input, shape index: {}]   ;;  %s922_s4 = inlined_call_operand.vmem [shape: f32[1,128], index: 4, kind: input, shape index: {}]   ;;  %s923_s5 = inlined_call_operand.vmem [shape: f32[2,8,128], index: 5, kind: output, shape index: {}]  }
   0x1 LB: > { %s580_s19 = sadd.s32 4294967295, %s677_s18   ;;  %p584_p0 = scmp.ge.s32.totalorder %s677_s18, 1  ;;  %s677_s18 = sphi %s711_s18, %s15_s18  }
   0x2   : > { %p187_p1 = scmp.lt.s32.totalorder %s677_s18, 3 }
   0x4   : > { %p188_p2 = pnand %p584_p0, %p187_p1 }
   0x5   : > { %p214_p3 = scmp.lt.s32.totalorder (!%p188_p2), %s580_s19, 1  ;;  %v432_v0 = vld [vmem:[%s921_s3 + $0x80] sm:$0xff] (!%p188_p2)  ;;  %v433_v1 = vld [vmem:[%s921_s3 + $0x88] sm:$0xff] (!%p188_p2)  ;;  %v434_v6 = vld [vmem:[%s921_s3 + $0x90] sm:$0xff] (!%p188_p2)  ;;  %vm233_vm0 = vcmask (!%p188_p2), 1040384   ;;  %s679_s25 = smov (!%p188_p2), 16   ;;  %v252_v56 = vlaneseq (!%p188_p2) }
   0x6   : > { %191 = sbr.rel (%p188_p2) target bundleno = 385 (0x181), region = 40  ;;  %v416_v2 = vld [vmem:[%s921_s3] sm:$0xff] (!%p188_p2)  ;;  %v417_v3 = vld [vmem:[%s921_s3 + $0x8] sm:$0xff] (!%p188_p2)  ;;  %v629_v4 = vpack.c.bf16 (!%p188_p2), %v433_v1, %v432_v0  ;;  %v435_v7 = vld [vmem:[%s921_s3 + $0x98] sm:$0xff] (!%p188_p2)  ;;  %s680_s9 = smov (!%p188_p2), 112   ;;  %vm247_vm1 = vcmask (!%p188_p2), 130048  }
   0x7   : > { %v631_v5 = vpack.c.bf16 (!%p188_p2), %v417_v3, %v416_v2  ;;  %v418_v8 = vld [vmem:[%s921_s3 + $0x10] sm:$0xff] (!%p188_p2)  ;;  %v633_v9 = vpack.c.bf16 (!%p188_p2), %v435_v7, %v434_v6  ;;  %v419_v10 = vld [vmem:[%s921_s3 + $0x18] sm:$0xff] (!%p188_p2)  ;;  %v436_v11 = vld [vmem:[%s921_s3 + $0xa0] sm:$0xff] (!%p188_p2)  ;;  %v253_v57 = vshrl.u32 (!%p188_p2), %v252_v56, 7  ;;  %vm278_vm2 = vcmask (!%p188_p2), 916480  }
   0x8   : > { %v437_v12 = vld [vmem:[%s921_s3 + $0xa8] sm:$0xff] (!%p188_p2)  ;;  %630 = vmatprep.subr.bf16.mxu0 (!%p188_p2), %v629_v4  ;;  %v635_v13 = vpack.c.bf16 (!%p188_p2), %v419_v10, %v418_v8  ;;  %v420_v14 = vld [vmem:[%s921_s3 + $0x20] sm:$0xff] (!%p188_p2)  ;;  %v438_v22 = vld [vmem:[%s921_s3 + $0xb0] sm:$0xff] (!%p188_p2) }
   0x9   : > { %632 = vmatpush3.bf16.msra.mxu0 (!%p188_p2), %v631_v5  ;;  %v421_v15 = vld [vmem:[%s921_s3 + $0x28] sm:$0xff] (!%p188_p2)  ;;  %v637_v19 = vpack.c.bf16 (!%p188_p2), %v437_v12, %v436_v11  ;;  %v439_v23 = vld [vmem:[%s921_s3 + $0xb8] sm:$0xff] (!%p188_p2)  ;;  %v422_v27 = vld [vmem:[%s921_s3 + $0x30] sm:$0xff] (!%p188_p2)  ;;  %v865_v58 = vsub.s32 (!%p188_p2), 1, %v253_v57  ;;  %v867_v59 = vsub.s32 (!%p188_p2), 0, %v253_v57  ;;  %v319_v63 = vsub.s32 (!%p188_p2), 4, %v253_v57 }
   0xa   : > { %634 = vmatprep.subr.bf16.mxu0 (!%p188_p2), %v633_v9  ;;  %v639_v26 = vpack.c.bf16 (!%p188_p2), %v421_v15, %v420_v14  ;;  %v423_v28 = vld [vmem:[%s921_s3 + $0x38] sm:$0xff] (!%p188_p2)  ;;  %v641_v29 = vpack.c.bf16 (!%p188_p2), %v439_v23, %v438_v22  ;;  %v440_v30 = vld [vmem:[%s921_s3 + $0xc0] sm:$0xff] (!%p188_p2)  ;;  %v441_v31 = vld [vmem:[%s921_s3 + $0xc8] sm:$0xff] (!%p188_p2)  ;;  %v285_v2 = vsub.s32 (!%p188_p2), 2, %v253_v57  ;;  %v307_v9 = vsub.s32 (!%p188_p2), 3, %v253_v57 }
   0xb   : > { %v643_v32 = vpack.c.bf16 (!%p188_p2), %v423_v28, %v422_v27  ;;  %v645_v33 = vpack.c.bf16 (!%p188_p2), %v441_v31, %v440_v30  ;;  %v424_v34 = vld [vmem:[%s921_s3 + $0x40] sm:$0xff] (!%p188_p2)  ;;  %v425_v35 = vld [vmem:[%s921_s3 + $0x48] sm:$0xff] (!%p188_p2)  ;;  %v442_v37 = vld [vmem:[%s921_s3 + $0xd0] sm:$0xff] (!%p188_p2) }
   0xc   : > { %v443_v38 = vld [vmem:[%s921_s3 + $0xd8] sm:$0xff] (!%p188_p2)  ;;  %v647_v39 = vpack.c.bf16 (!%p188_p2), %v425_v35, %v424_v34  ;;  %v426_v41 = vld [vmem:[%s921_s3 + $0x50] sm:$0xff] (!%p188_p2)  ;;  %v444_v43 = vld [vmem:[%s921_s3 + $0xe0] sm:$0xff] (!%p188_p2) }
   0xd   : > { %s925_s19 = smov (!%p214_p3, %s580_s19), 1  ;;  %636 = vmatpush3.bf16.msra.mxu0 %v635_v13  ;;  %v649_v40 = vpack.c.bf16 %v443_v38, %v442_v37  ;;  %v427_v42 = vld [vmem:[%s921_s3 + $0x58] sm:$0xff]  ;;  %v445_v44 = vld [vmem:[%s921_s3 + $0xe8] sm:$0xff]  ;;  %v428_v47 = vld [vmem:[%s921_s3 + $0x60] sm:$0xff]  ;;  %v359_v37 = vsub.s32 6, %v253_v57 }
   0xe   : > { %s593_s15 = sshll.u32 %s925_s19, 5  ;;  %638 = vmatprep.subr.bf16.mxu0 %v637_v19  ;;  %v651_v45 = vpack.c.bf16 %v427_v42, %v426_v41  ;;  %v653_v46 = vpack.c.bf16 %v445_v44, %v444_v43  ;;  %v429_v48 = vld [vmem:[%s921_s3 + $0x68] sm:$0xff]  ;;  %v446_v49 = vld [vmem:[%s921_s3 + $0xf0] sm:$0xff]  ;;  %v447_v50 = vld [vmem:[%s921_s3 + $0xf8] sm:$0xff]  ;;  %v371_v42 = vsub.s32 7, %v253_v57  ;;  %s587_s10 = sshll.u32 %s925_s19, 3 }
   0xf   : > { %s755_s20 = scalar_lea.vmem %s918_s0, %s593_s15  ;;  %v655_v51 = vpack.c.bf16 %v429_v48, %v428_v47  ;;  %v657_v52 = vpack.c.bf16 %v447_v50, %v446_v49  ;;  %v430_v53 = vld [vmem:[%s921_s3 + $0x70] sm:$0xff]  ;;  %v431_v54 = vld [vmem:[%s921_s3 + $0x78] sm:$0xff]  ;;  %v236_v60 = vld [vmem:[%s919_s1] sm:$0xff]  ;;  %s222_s13 = scalar_lea.vmem %s923_s5, %s587_s10 }
  0x10   : > { %v764_v16 = vld [vmem:[%s755_s20 + $0x8] sm:$0xff]  ;;  %v767_v17 = vld [vmem:[%s755_s20 + $0x10] sm:$0xff]  ;;  %v770_v18 = vld [vmem:[%s755_s20 + $0x18] sm:$0xff]  ;;  %v659_v55 = vpack.c.bf16 %v431_v54, %v430_v53  ;;  %v265_v0 = vrot.slane %v236_v60, %v865_v58  ;;  %v255_v1 = vrot.slane %v236_v60, %v867_v59  ;;  %v320_v11 = vrot.slane %v236_v60, %v319_v63 }
  0x11   : > { %299 = vrot.lane.b32.xlu1 %v764_v16, %s679_s25  ;;  %v229_v20 = vrot.slane %v767_v17, 7  ;;  %v230_v21 = vrot.slane %v770_v18, 7  ;;  %640 = vmatpush3.bf16.msra.mxu0 %v639_v26  ;;  %v813_v36 = vld [vmem:[%s755_s20] sm:$0xff]  ;;  %v237_v61 = vld [vmem:[%s919_s1 + $0x8] sm:$0xff]  ;;  %v286_v13 = vrot.slane %v236_v60, %v285_v2  ;;  %v308_v28 = vrot.slane %v236_v60, %v307_v9 }
  0x12   : > { %642 = vmatprep.subr.bf16.mxu0 %v641_v29  ;;  %v269_v3 = vrot.slane %v237_v61, %v865_v58  ;;  %v324_v7 = vrot.slane %v237_v61, %v319_v63  ;;  %v259_v8 = vrot.slane %v237_v61, %v867_v59  ;;  %v290_v15 = vrot.slane %v237_v61, %v285_v2 }
  0x13   : > { %v782_v24 = vsel %vm233_vm0, 0.0, %v229_v20  ;;  %v784_v25 = vsel %vm233_vm0, 0.0, %v230_v21  ;;  %v339_v20 = vsub.s32 5, %v253_v57  ;;  %v312_v29 = vrot.slane %v237_v61, %v307_v9  ;;  %v589_v9 = vld [vmem:[%s919_s1 + $0x18] ss:$0 sm:$0xff] }
  0x14   : > { %243 = vrot.lane.b32.xlu0 %v782_v24, %s679_s25  ;;  %v270_v10 = vmul.f32 %v265_v0, %v782_v24  ;;  %v271_v14 = vmul.f32 %v269_v3, %v784_v25  ;;  %v325_v30 = vmul.f32 %v320_v11, %v813_v36  ;;  %v360_v48 = vrot.slane %v236_v60, %v359_v37 }
  0x15   : > { %276 = vrot.lane.b32.xlu1 %v784_v25, %s680_s9  ;;  %644 = vmatpush3.bf16.msra.mxu0 %v643_v32  ;;  %v340_v35 = vrot.slane %v236_v60, %v339_v20  ;;  %v364_v49 = vrot.slane %v237_v61, %v359_v37  ;;  %v372_v53 = vrot.slane %v236_v60, %v371_v42  ;;  %v240_v60 = vld [vmem:[%s920_s2] sm:$0x3] }
  0x16   : > { %646 = vmatprep.subr.bf16.mxu0 %v645_v33  ;;  %v376_v54 = vrot.slane %v237_v61, %v371_v42 }
  0x17   : > { %v377_v2 = vmul.f32 %v372_v53, %v767_v17 }
  0x18   : > { %245 = vrot.lane.b32.xlu0 %v784_v25, %s679_s25  ;;  %v378_v3 = vmul.f32 %v376_v54, %v770_v18 }
  0x19   : > { %274 = vrot.lane.b32.xlu1 %v782_v24, %s680_s9  ;;  %648 = vmatpush3.bf16.msra.mxu0 %v647_v39  ;;  %v326_v24 = vmul.f32 %v324_v7, %v764_v16 }
  0x1a   : > { %650 = vmatprep.subr.bf16.mxu0 %v649_v40 }
  0x1c   : > { %297 = vrot.lane.b32.xlu0 %v813_v36, %s679_s25 }
  0x1d   : > { %329 = vrot.lane.b32.xlu1 %v813_v36, %s680_s9  ;;  %652 = vmatpush3.bf16.msra.mxu0 %v651_v45 }
  0x1e   : > { %654 = vmatprep.subr.bf16.mxu0 %v653_v46 }
  0x20   : > { %331 = vrot.lane.b32.xlu0 %v764_v16, %s680_s9  ;;  %v344_v16 = vrot.slane %v237_v61, %v339_v20  ;;  %v588_v61 = vld [vmem:[%s919_s1 + $0x10] ss:$0 sm:$0xff] }
  0x21   : > { %351 = vrot.lane.b32.xlu1 %v770_v18, %s679_s25  ;;  %656 = vmatpush3.bf16.msra.mxu0 %v655_v51 }
  0x22   : > { %658 = vmatprep.subr.bf16.mxu0 %v657_v52 }
  0x24   : > { %349 = vrot.lane.b32.xlu0 %v767_v17, %s679_s25 }
  0x25   : > { %381 = vrot.lane.b32.xlu1 %v767_v17, %s680_s9  ;;  %660 = vmatpush3.bf16.msra.mxu0 %v659_v55 }
  0x28   : > { %383 = vrot.lane.b32.xlu0 %v770_v18, %s680_s9 }
  0x83   : > { %v300_v62 = vpop.permute.xlu1 %299 }
  0x86   : > { %v244_v4 = vpop.permute.xlu0 %243 }
  0x87   : > { %v251_v5 = vsel %vm247_vm1, 0.0, %v244_v4  ;;  %v277_v6 = vpop.permute.xlu1 %276 }
  0x88   : > { %v260_v12 = vmul.f32 %v255_v1, %v251_v5  ;;  %v282_v21 = vsel %vm278_vm2, %v277_v6, 0.0 }
  0x89   : > { %v292_v25 = vmul.f32 %v290_v15, %v282_v21 }
  0x8a   : > { %v246_v19 = vpop.permute.xlu0 %245  ;;  %v272_v31 = vadd.f32 %v270_v10, %v260_v12 }
  0x8b   : > { %v248_v22 = vsel %vm247_vm1, %v244_v4, %v246_v19  ;;  %v275_v23 = vpop.permute.xlu1 %274 }
  0x8c   : > { %v261_v26 = vmul.f32 %v259_v8, %v248_v22  ;;  %v279_v27 = vsel %vm278_vm2, %v275_v23, %v277_v6 }
  0x8d   : > { %v291_v32 = vmul.f32 %v286_v13, %v279_v27  ;;  %v405_v13 = vrot.slane %v240_v60, %v867_v59  ;;  %v590_v59 = vld [vmem:[%s922_s4] ss:$0 sm:$0xff] }
  0x8e   : > { %v273_v33 = vadd.f32 %v271_v14, %v261_v26  ;;  %v298_v34 = vpop.permute.xlu0 %297  ;;  %v409_v14 = vrot.slane %v240_v60, %v865_v58 }
  0x8f   : > { %v293_v38 = vadd.f32 %v291_v32, %v272_v31  ;;  %v301_v39 = vsel %vm247_vm1, %v298_v34, %v300_v62  ;;  %v304_v40 = vsel %vm247_vm1, 0.0, %v298_v34  ;;  %v330_v41 = vpop.permute.xlu1 %329 }
  0x90   : > { %v294_v43 = vadd.f32 %v292_v25, %v273_v33  ;;  %v313_v44 = vmul.f32 %v308_v28, %v304_v40  ;;  %v314_v45 = vmul.f32 %v312_v29, %v301_v39 }
  0x92   : > { %v315_v46 = vadd.f32 %v313_v44, %v293_v38  ;;  %v316_v36 = vadd.f32 %v314_v45, %v294_v43  ;;  %v332_v47 = vpop.permute.xlu0 %331 }
  0x93   : > { %v333_v50 = vsel %vm278_vm2, %v330_v41, %v332_v47  ;;  %v336_v51 = vsel %vm278_vm2, %v332_v47, 0.0  ;;  %v352_v52 = vpop.permute.xlu1 %351 }
  0x94   : > { %v328_v55 = vadd.f32 %v326_v24, %v316_v36  ;;  %v327_v56 = vadd.f32 %v325_v30, %v315_v46  ;;  %v345_v62 = vmul.f32 %v340_v35, %v333_v50  ;;  %v346_v57 = vmul.f32 %v344_v16, %v336_v51 }
  0x96   : > { %v350_v63 = vpop.permute.xlu0 %349  ;;  %v347_v4 = vadd.f32 %v345_v62, %v327_v56  ;;  %v348_v5 = vadd.f32 %v346_v57, %v328_v55 }
  0x97   : > { %v353_v0 = vsel %vm247_vm1, %v350_v63, %v352_v52  ;;  %v356_v1 = vsel %vm247_vm1, 0.0, %v350_v63  ;;  %v382_v8 = vpop.permute.xlu1 %381 }
  0x98   : > { %v365_v6 = vmul.f32 %v360_v48, %v356_v1  ;;  %v366_v7 = vmul.f32 %v364_v49, %v353_v0 }
  0x9a   : > { %v367_v17 = vadd.f32 %v365_v6, %v347_v4  ;;  %v368_v10 = vadd.f32 %v366_v7, %v348_v5  ;;  %v384_v18 = vpop.permute.xlu0 %383 }
  0x9b   : > { %v385_v11 = vsel %vm278_vm2, %v382_v8, %v384_v18  ;;  %v388_v12 = vsel %vm278_vm2, %v384_v18, 0.0 }
  0x9c   : > { %v379_v15 = vadd.f32 %v377_v2, %v367_v17  ;;  %v397_v19 = vmul.f32 %v588_v61, %v385_v11  ;;  %v398_v20 = vmul.f32 %v589_v9, %v388_v12  ;;  %v380_v21 = vadd.f32 %v378_v3, %v368_v10 }
  0x9e   : > { %v399_v22 = vadd.f32 %v397_v19, %v379_v15  ;;  %v400_v23 = vadd.f32 %v398_v20, %v380_v21 }
  0xa0   : > { %v413_v26 = vadd.f32 %v409_v14, %v400_v23  ;;  %v412_v27 = vadd.f32 %v405_v13, %v399_v22 }
  0xa2   : > { %v415_v28 = vmax.f32 %v413_v26, 0.0  ;;  %v414_v29 = vmax.f32 %v412_v27, 0.0 }
  0xa4   : > { %519 = vmatprep.mubr.f32.mxu0 %v415_v28 }
  0xa5   : > { %520 = vmatmul.mubr.f32.vlgmr.msra.gmra.mrb[0].mxu0 %v414_v29 }
 0x178   : > { %v626_v24 = vpop.f32.mrb[0].mxu0 }
 0x179   : > { %v627_v30 = vpop.f32.mrb[1].mxu0 }
 0x17a   : > { %v628_v58 = vadd.f32 %v627_v30, %v626_v24 }
 0x17c   : > { %v522_v31 = vadd.f32 %v628_v58, %v590_v59 }
 0x17e   : > { %v525_v32 = vmax.f32 %v522_v31, 0.0 }
 0x180   : > { %526 = vst [vmem:[%s222_s13] sm:$0xff] %v525_v32 }
 0x181 PF: > { %s15_s18 = sadd.s32 1, %s677_s18  }
 0x182   : > { %p12_p4 = scmp.ge.s32.totalorder %s15_s18, 4  }
 0x184   :  { %14 = sbr.rel (!%p12_p4) target bundleno = 1 (0x1), region = 70 }

// kernel: run.15
= control target key start
LH: loop header
LB: loop body
LE: loop exit
PB: predicated region body
PF: predicated region fallthrough
CT: control target
= control target key end

     0   :  { %s676_s21 = smov 0   ;;  %s826_s0 = inlined_call_operand.vmem [shape: f32[2,4,256], index: 0, kind: input, shape index: {}]   ;;  %s827_s1 = inlined_call_operand.vmem [shape: f32[9,128], index: 1, kind: input, shape index: {}]   ;;  %s828_s2 = inlined_call_operand.vmem [shape: f32[1,128], index: 2, kind: input, shape index: {}]   ;;  %s829_s3 = inlined_call_operand.vmem [shape: f32[128,256], index: 3, kind: input, shape index: {}]   ;;  %s830_s4 = inlined_call_operand.vmem [shape: f32[1,256], index: 4, kind: input, shape index: {}]   ;;  %s831_s5 = inlined_call_operand.vmem [shape: f32[2,4,256], index: 5, kind: input, shape index: {}]   ;;  %s832_s6 = inlined_call_operand.vmem [shape: f32[2,4,256], index: 6, kind: output, shape index: {}]  }
   0x1 LB: > { %s567_s22 = sadd.s32 4294967295, %s636_s21   ;;  %p571_p0 = scmp.ge.s32.totalorder %s636_s21, 1  ;;  %s636_s21 = sphi %s676_s21, %s16_s21  }
   0x2   : > { %p222_p1 = scmp.lt.s32.totalorder %s636_s21, 3 }
   0x4   : > { %p223_p2 = pnand %p571_p0, %p222_p1 }
   0x5   : > { %p257_p3 = scmp.lt.s32.totalorder (!%p223_p2), %s567_s22, 1  ;;  %v373_v0 = vld [vmem:[%s829_s3 + $0x8] sm:$0xff] (!%p223_p2)  ;;  %v375_v1 = vld [vmem:[%s829_s3 + $0x18] sm:$0xff] (!%p223_p2)  ;;  %v372_v3 = vld [vmem:[%s829_s3] sm:$0xff] (!%p223_p2)  ;;  %s638_s8 = smov (!%p223_p2), 16   ;;  %vm277_vm0 = vcmask (!%p223_p2), 1040384   ;;  %v288_v53 = vlaneseq (!%p223_p2) }
   0x6   : > { %226 = sbr.rel (%p223_p2) target bundleno = 384 (0x180), region = 44  ;;  %v585_v2 = vpack.c.bf16 (!%p223_p2), %v375_v1, %v373_v0  ;;  %v374_v4 = vld [vmem:[%s829_s3 + $0x10] sm:$0xff] (!%p223_p2)  ;;  %v377_v5 = vld [vmem:[%s829_s3 + $0x28] sm:$0xff] (!%p223_p2)  ;;  %v379_v7 = vld [vmem:[%s829_s3 + $0x38] sm:$0xff] (!%p223_p2)  ;;  %s639_s17 = smov (!%p223_p2), 112   ;;  %v640_v41 = vmov (!%p223_p2), 0.0  }
   0x7   : > { %v587_v6 = vpack.c.bf16 (!%p223_p2), %v374_v4, %v372_v3  ;;  %v376_v8 = vld [vmem:[%s829_s3 + $0x20] sm:$0xff] (!%p223_p2)  ;;  %v378_v9 = vld [vmem:[%s829_s3 + $0x30] sm:$0xff] (!%p223_p2)  ;;  %v589_v10 = vpack.c.bf16 (!%p223_p2), %v379_v7, %v377_v5  ;;  %v381_v11 = vld [vmem:[%s829_s3 + $0x48] sm:$0xff] (!%p223_p2)  ;;  %480 = vmatprep.mubr.f32.mxu0 (!%p223_p2), %v640_v41  ;;  %v289_v54 = vshrl.u32 (!%p223_p2), %v288_v53, 7  ;;  %vm286_vm1 = vcmask (!%p223_p2), 130048  }
   0x8   : > { %586 = vmatprep.subr.bf16.mxu0 (!%p223_p2), %v585_v2  ;;  %v383_v12 = vld [vmem:[%s829_s3 + $0x58] sm:$0xff] (!%p223_p2)  ;;  %v591_v13 = vpack.c.bf16 (!%p223_p2), %v378_v9, %v376_v8  ;;  %v380_v15 = vld [vmem:[%s829_s3 + $0x40] sm:$0xff] (!%p223_p2)  ;;  %v382_v16 = vld [vmem:[%s829_s3 + $0x50] sm:$0xff] (!%p223_p2)  ;;  %vm302_vm2 = vcmask (!%p223_p2), 916480  }
   0x9   : > { %588 = vmatpush1.bf16.msra.mxu0 (!%p223_p2), %v587_v6  ;;  %v593_v14 = vpack.c.bf16 (!%p223_p2), %v383_v12, %v381_v11  ;;  %v385_v18 = vld [vmem:[%s829_s3 + $0x68] sm:$0xff] (!%p223_p2)  ;;  %v387_v19 = vld [vmem:[%s829_s3 + $0x78] sm:$0xff] (!%p223_p2)  ;;  %v595_v21 = vpack.c.bf16 (!%p223_p2), %v382_v16, %v380_v15  ;;  %v384_v24 = vld [vmem:[%s829_s3 + $0x60] sm:$0xff] (!%p223_p2)  ;;  %v295_v55 = vsub.s32 (!%p223_p2), 1, %v289_v54  ;;  %v290_v56 = vsub.s32 (!%p223_p2), 0, %v289_v54 }
   0xa   : > { %590 = vmatprep.subr.bf16.mxu0 (!%p223_p2), %v589_v10  ;;  %v597_v23 = vpack.c.bf16 (!%p223_p2), %v387_v19, %v385_v18  ;;  %v386_v25 = vld [vmem:[%s829_s3 + $0x70] sm:$0xff] (!%p223_p2)  ;;  %v389_v26 = vld [vmem:[%s829_s3 + $0x88] sm:$0xff] (!%p223_p2)  ;;  %v391_v27 = vld [vmem:[%s829_s3 + $0x98] sm:$0xff] (!%p223_p2)  ;;  %v306_v60 = vsub.s32 (!%p223_p2), 2, %v289_v54  ;;  %v316_v61 = vsub.s32 (!%p223_p2), 3, %v289_v54  ;;  %v322_v0 = vsub.s32 (!%p223_p2), 4, %v289_v54 }
   0xb   : > { %v599_v29 = vpack.c.bf16 (!%p223_p2), %v386_v25, %v384_v24  ;;  %v601_v30 = vpack.c.bf16 (!%p223_p2), %v391_v27, %v389_v26  ;;  %v388_v31 = vld [vmem:[%s829_s3 + $0x80] sm:$0xff] (!%p223_p2)  ;;  %v390_v32 = vld [vmem:[%s829_s3 + $0x90] sm:$0xff] (!%p223_p2)  ;;  %v393_v33 = vld [vmem:[%s829_s3 + $0xa8] sm:$0xff] (!%p223_p2)  ;;  %v332_v2 = vsub.s32 (!%p223_p2), 5, %v289_v54  ;;  %v342_v11 = vsub.s32 (!%p223_p2), 6, %v289_v54 }
   0xc   : > { %v395_v34 = vld [vmem:[%s829_s3 + $0xb8] sm:$0xff] (!%p223_p2)  ;;  %v603_v35 = vpack.c.bf16 (!%p223_p2), %v390_v32, %v388_v31  ;;  %v392_v37 = vld [vmem:[%s829_s3 + $0xa0] sm:$0xff] (!%p223_p2)  ;;  %v394_v38 = vld [vmem:[%s829_s3 + $0xb0] sm:$0xff] (!%p223_p2)  ;;  %v348_v18 = vsub.s32 (!%p223_p2), 7, %v289_v54 }
   0xd   : > { %s834_s22 = smov (!%p257_p3, %s567_s22), 1  ;;  %592 = vmatpush1.bf16.msra.mxu0 %v591_v13  ;;  %v605_v36 = vpack.c.bf16 %v395_v34, %v393_v33  ;;  %v397_v39 = vld [vmem:[%s829_s3 + $0xc8] sm:$0xff]  ;;  %v399_v40 = vld [vmem:[%s829_s3 + $0xd8] sm:$0xff]  ;;  %v607_v42 = vpack.c.bf16 %v394_v38, %v392_v37  ;;  %v396_v44 = vld [vmem:[%s829_s3 + $0xc0] sm:$0xff] }
   0xe   : > { %s714_s19 = sshll.u32 %s834_s22, 3  ;;  %594 = vmatprep.subr.bf16.mxu0 %v593_v14  ;;  %v609_v43 = vpack.c.bf16 %v399_v40, %v397_v39  ;;  %v398_v45 = vld [vmem:[%s829_s3 + $0xd0] sm:$0xff]  ;;  %v401_v46 = vld [vmem:[%s829_s3 + $0xe8] sm:$0xff]  ;;  %v403_v47 = vld [vmem:[%s829_s3 + $0xf8] sm:$0xff] }
   0xf   : > { %s261_s24 = scalar_lea.vmem %s826_s0, %s714_s19  ;;  %v611_v48 = vpack.c.bf16 %v398_v45, %v396_v44  ;;  %v613_v49 = vpack.c.bf16 %v403_v47, %v401_v46  ;;  %v400_v50 = vld [vmem:[%s829_s3 + $0xe0] sm:$0xff]  ;;  %v402_v51 = vld [vmem:[%s829_s3 + $0xf0] sm:$0xff]  ;;  %v578_v32 = vld [vmem:[%s827_s1 + $0x8] ss:$0 sm:$0xff]  ;;  %s266_s13 = scalar_lea.vmem %s831_s5, %s714_s19 }
  0x10   : > { %v726_v17 = vld [vmem:[%s261_s24] sm:$0xff]  ;;  %v615_v52 = vpack.c.bf16 %v402_v51, %v400_v50  ;;  %s271_s16 = scalar_lea.vmem %s832_s6, %s714_s19 }
  0x11   : > { %v274_v20 = vcombine.high %v726_v17, %v726_v17  ;;  %310 = vrot.lane.b32.xlu1 %v726_v17, %s638_s8  ;;  %596 = vmatpush1.bf16.msra.mxu0 %v595_v21  ;;  %v279_v57 = vld [vmem:[%s827_s1] sm:$0xff] }
  0x12   : > { %598 = vmatprep.subr.bf16.mxu0 %v597_v23  ;;  %v296_v58 = vrot.slane %v279_v57, %v295_v55  ;;  %v291_v59 = vrot.slane %v279_v57, %v290_v56  ;;  %v307_v5 = vrot.slane %v279_v57, %v306_v60  ;;  %v317_v6 = vrot.slane %v279_v57, %v316_v61  ;;  %v579_v39 = vld [vmem:[%s828_s2] ss:$0 sm:$0xff] }
  0x13   : > { %v275_v22 = vrot.slane %v274_v20, 7  ;;  %v323_v9 = vrot.slane %v279_v57, %v322_v0  ;;  %v333_v13 = vrot.slane %v279_v57, %v332_v2  ;;  %v349_v27 = vrot.slane %v279_v57, %v348_v18  ;;  %v489_v45 = vld [vmem:[%s266_s13] sm:$0xff] }
  0x14   : > { %v491_v50 = vcombine.high %v489_v45, %v489_v45 }
  0x15   : > { %v278_v28 = vsel %vm277_vm0, 0.0, %v275_v22  ;;  %326 = vrot.lane.b32.xlu1 %v726_v17, %s639_s17  ;;  %600 = vmatpush1.bf16.msra.mxu0 %v599_v29  ;;  %v324_v21 = vmul.f32 %v323_v9, %v726_v17  ;;  %v343_v22 = vrot.slane %v279_v57, %v342_v11 }
  0x16   : > { %283 = vrot.lane.b32.xlu0 %v278_v28, %s638_s8  ;;  %602 = vmatprep.subr.bf16.mxu0 %v601_v30  ;;  %v297_v3 = vmul.f32 %v296_v58, %v278_v28 }
  0x19   : > { %354 = vrot.lane.b32.xlu1 %v274_v20, %s639_s17  ;;  %604 = vmatpush1.bf16.msra.mxu0 %v603_v35 }
  0x1a   : > { %299 = vrot.lane.b32.xlu0 %v278_v28, %s639_s17  ;;  %606 = vmatprep.subr.bf16.mxu0 %v605_v36  ;;  %v350_v28 = vrot.slane %v726_v17, 4 }
  0x1c   : > { %v352_v35 = vmul.f32 %v350_v28, %v349_v27 }
  0x1d   : > { %608 = vmatpush1.bf16.msra.mxu0 %v607_v42  ;;  %v404_v42 = vld [vmem:[%s830_s4] sm:$0x3] }
  0x1e   : > { %336 = vrot.lane.b32.xlu0 %v274_v20, %s638_s8  ;;  %610 = vmatprep.subr.bf16.mxu0 %v609_v43  ;;  %v409_v43 = vrot.slane %v404_v42, %v290_v56  ;;  %v413_v44 = vrot.slane %v404_v42, %v295_v55 }
  0x21   : > { %612 = vmatpush1.bf16.msra.mxu0 %v611_v48 }
  0x22   : > { %614 = vmatprep.subr.bf16.mxu0 %v613_v49 }
  0x25   : > { %616 = vmatpush1.bf16.msra.mxu0 %v615_v52 }
  0x83   : > { %v311_v62 = vpop.permute.xlu1 %310 }
  0x84   : > { %v313_v7 = vsel %vm286_vm1, 0.0, %v311_v62 }
  0x85   : > { %v318_v16 = vmul.f32 %v317_v6, %v313_v7 }
  0x87   : > { %v327_v10 = vpop.permute.xlu1 %326 }
  0x88   : > { %v284_v63 = vpop.permute.xlu0 %283  ;;  %v329_v19 = vsel %vm302_vm2, %v327_v10, 0.0 }
  0x89   : > { %v287_v1 = vsel %vm286_vm1, 0.0, %v284_v63  ;;  %v334_v26 = vmul.f32 %v333_v13, %v329_v19 }
  0x8a   : > { %v292_v4 = vmul.f32 %v291_v59, %v287_v1 }
  0x8b   : > { %v355_v29 = vpop.permute.xlu1 %354 }
  0x8c   : > { %v300_v8 = vpop.permute.xlu0 %299  ;;  %v298_v14 = vadd.f32 %v297_v3, %v292_v4  ;;  %v357_v33 = vsel %vm302_vm2, %v355_v29, 0.0 }
  0x8d   : > { %v303_v12 = vsel %vm302_vm2, %v300_v8, 0.0  ;;  %v362_v37 = vmul.f32 %v578_v32, %v357_v33 }
  0x8e   : > { %v308_v15 = vmul.f32 %v307_v5, %v303_v12 }
  0x90   : > { %v309_v20 = vadd.f32 %v308_v15, %v298_v14  ;;  %v337_v23 = vpop.permute.xlu0 %336 }
  0x91   : > { %v339_v24 = vsel %vm286_vm1, 0.0, %v337_v23 }
  0x92   : > { %v319_v25 = vadd.f32 %v318_v16, %v309_v20  ;;  %v344_v31 = vmul.f32 %v343_v22, %v339_v24 }
  0x94   : > { %v325_v30 = vadd.f32 %v324_v21, %v319_v25 }
  0x96   : > { %v335_v34 = vadd.f32 %v334_v26, %v325_v30 }
  0x98   : > { %v345_v36 = vadd.f32 %v344_v31, %v335_v34 }
  0x9a   : > { %v353_v38 = vadd.f32 %v352_v35, %v345_v36 }
  0x9c   : > { %v363_v17 = vadd.f32 %v362_v37, %v353_v38 }
  0x9e   : > { %v370_v40 = vadd.f32 %v579_v39, %v363_v17 }
  0xa0   : > { %v371_v41 = vmax.f32 %v370_v40, 0.0 }
  0xa2   : > { %481 = vmatmul.mubr.f32.vlgmr.msra.gmra.mrb[0].mxu0 %v371_v41 }
 0x175   : > { %v482_v46 = vpop.f32.mrb[0].mxu0 }
 0x176   : > { %v483_v47 = vadd.f32 %v482_v46, %v409_v43  ;;  %v484_v48 = vpop.f32.mrb[1].mxu0 }
 0x177   : > { %v485_v49 = vadd.f32 %v484_v48, %v413_v44 }
 0x178   : > { %v487_v51 = vmax.f32 %v483_v47, 0.0 }
 0x179   : > { %v488_v52 = vmax.f32 %v485_v49, 0.0 }
 0x17a   : > { %v493_v53 = vadd.f32 %v489_v45, %v487_v51 }
 0x17b   : > { %v494_v54 = vadd.f32 %v491_v50, %v488_v52 }
 0x17d   : > { %v497_v57 = vcombine.low %v493_v53, %v494_v54 }
 0x17f   : > { %499 = vst [vmem:[%s271_s16] sm:$0xff] %v497_v57 }
 0x180 PF: > { %s16_s21 = sadd.s32 1, %s636_s21  }
 0x181   : > { %p13_p4 = scmp.ge.s32.totalorder %s16_s21, 4  }
 0x183   :  { %15 = sbr.rel (!%p13_p4) target bundleno = 1 (0x1), region = 77 }

// kernel: run.13
= control target key start
LH: loop header
LB: loop body
LE: loop exit
PB: predicated region body
PF: predicated region fallthrough
CT: control target
= control target key end

     0   :  { %s768_s18 = smov 0   ;;  %s1077_s0 = inlined_call_operand.vmem [shape: f32[2,4,512], index: 0, kind: input, shape index: {}]   ;;  %s1078_s1 = inlined_call_operand.vmem [shape: f32[9,256], index: 1, kind: input, shape index: {}]   ;;  %s1079_s2 = inlined_call_operand.vmem [shape: f32[1,256], index: 2, kind: input, shape index: {}]   ;;  %s1080_s3 = inlined_call_operand.vmem [shape: f32[256,256], index: 3, kind: input, shape index: {}]   ;;  %s1081_s4 = inlined_call_operand.vmem [shape: f32[1,256], index: 4, kind: input, shape index: {}]   ;;  %s1082_s5 = inlined_call_operand.vmem [shape: f32[2,4,256], index: 5, kind: output, shape index: {}]  }
   0x1 LB: > { %s637_s19 = sadd.s32 4294967295, %s734_s18   ;;  %p641_p0 = scmp.ge.s32.totalorder %s734_s18, 1  ;;  %s734_s18 = sphi %s768_s18, %s15_s18  }
   0x2   : > { %p187_p1 = scmp.lt.s32.totalorder %s734_s18, 3 }
   0x4   : > { %p188_p2 = pnand %p641_p0, %p187_p1 }
   0x5   : > { %p215_p3 = scmp.lt.s32.totalorder (!%p188_p2), %s637_s19, 1  ;;  %v429_v0 = vld [vmem:[%s1080_s3 + $0x8] sm:$0xff] (!%p188_p2)  ;;  %v431_v1 = vld [vmem:[%s1080_s3 + $0x18] sm:$0xff] (!%p188_p2)  ;;  %v428_v2 = vld [vmem:[%s1080_s3] sm:$0xff] (!%p188_p2)  ;;  %vm233_vm0 = vcmask (!%p188_p2), 1040384   ;;  %s736_s29 = smov (!%p188_p2), 96  }
   0x6   : > { %191 = sbr.rel (%p188_p2) target bundleno = 385 (0x181), region = 40  ;;  %v430_v3 = vld [vmem:[%s1080_s3 + $0x10] sm:$0xff] (!%p188_p2)  ;;  %v652_v4 = vpack.c.bf16 (!%p188_p2), %v431_v1, %v429_v0  ;;  %v433_v6 = vld [vmem:[%s1080_s3 + $0x28] sm:$0xff] (!%p188_p2)  ;;  %v435_v7 = vld [vmem:[%s1080_s3 + $0x38] sm:$0xff] (!%p188_p2)  ;;  %s737_s30 = smov (!%p188_p2), 32   ;;  %vm247_vm1 = vcmask (!%p188_p2), 261120  }
   0x7   : > { %v654_v5 = vpack.c.bf16 (!%p188_p2), %v430_v3, %v428_v2  ;;  %v432_v8 = vld [vmem:[%s1080_s3 + $0x20] sm:$0xff] (!%p188_p2)  ;;  %v656_v9 = vpack.c.bf16 (!%p188_p2), %v435_v7, %v433_v6  ;;  %v434_v10 = vld [vmem:[%s1080_s3 + $0x30] sm:$0xff] (!%p188_p2)  ;;  %v437_v11 = vld [vmem:[%s1080_s3 + $0x48] sm:$0xff] (!%p188_p2)  ;;  %vm278_vm2 = vcmask (!%p188_p2), 785408  }
   0x8   : > { %653 = vmatprep.subr.bf16.mxu0 (!%p188_p2), %v652_v4  ;;  %v439_v12 = vld [vmem:[%s1080_s3 + $0x58] sm:$0xff] (!%p188_p2)  ;;  %v658_v13 = vpack.c.bf16 (!%p188_p2), %v434_v10, %v432_v8  ;;  %v436_v15 = vld [vmem:[%s1080_s3 + $0x40] sm:$0xff] (!%p188_p2)  ;;  %v438_v16 = vld [vmem:[%s1080_s3 + $0x50] sm:$0xff] (!%p188_p2) }
   0x9   : > { %655 = vmatpush1.bf16.msra.mxu0 (!%p188_p2), %v654_v5  ;;  %v660_v20 = vpack.c.bf16 (!%p188_p2), %v439_v12, %v437_v11  ;;  %v441_v21 = vld [vmem:[%s1080_s3 + $0x68] sm:$0xff] (!%p188_p2)  ;;  %v443_v22 = vld [vmem:[%s1080_s3 + $0x78] sm:$0xff] (!%p188_p2)  ;;  %v662_v25 = vpack.c.bf16 (!%p188_p2), %v438_v16, %v436_v15  ;;  %v440_v27 = vld [vmem:[%s1080_s3 + $0x60] sm:$0xff] (!%p188_p2) }
   0xa   : > { %657 = vmatprep.subr.bf16.mxu0 (!%p188_p2), %v656_v9  ;;  %v442_v28 = vld [vmem:[%s1080_s3 + $0x70] sm:$0xff] (!%p188_p2)  ;;  %v664_v30 = vpack.c.bf16 (!%p188_p2), %v443_v22, %v441_v21  ;;  %v445_v31 = vld [vmem:[%s1080_s3 + $0x88] sm:$0xff] (!%p188_p2)  ;;  %v447_v32 = vld [vmem:[%s1080_s3 + $0x98] sm:$0xff] (!%p188_p2) }
   0xb   : > { %v666_v33 = vpack.c.bf16 (!%p188_p2), %v442_v28, %v440_v27  ;;  %v444_v34 = vld [vmem:[%s1080_s3 + $0x80] sm:$0xff] (!%p188_p2)  ;;  %v446_v35 = vld [vmem:[%s1080_s3 + $0x90] sm:$0xff] (!%p188_p2)  ;;  %v668_v36 = vpack.c.bf16 (!%p188_p2), %v447_v32, %v445_v31  ;;  %v449_v37 = vld [vmem:[%s1080_s3 + $0xa8] sm:$0xff] (!%p188_p2) }
   0xc   : > { %v451_v38 = vld [vmem:[%s1080_s3 + $0xb8] sm:$0xff] (!%p188_p2)  ;;  %v670_v39 = vpack.c.bf16 (!%p188_p2), %v446_v35, %v444_v34  ;;  %v448_v40 = vld [vmem:[%s1080_s3 + $0xa0] sm:$0xff] (!%p188_p2)  ;;  %v450_v41 = vld [vmem:[%s1080_s3 + $0xb0] sm:$0xff] (!%p188_p2) }
   0xd   : > { %s1084_s19 = smov (!%p215_p3, %s637_s19), 1  ;;  %659 = vmatpush1.bf16.msra.mxu0 %v658_v13  ;;  %v672_v42 = vpack.c.bf16 %v451_v38, %v449_v37  ;;  %v453_v43 = vld [vmem:[%s1080_s3 + $0xc8] sm:$0xff]  ;;  %v455_v44 = vld [vmem:[%s1080_s3 + $0xd8] sm:$0xff]  ;;  %v674_v45 = vpack.c.bf16 %v450_v41, %v448_v40  ;;  %v452_v46 = vld [vmem:[%s1080_s3 + $0xc0] sm:$0xff] }
   0xe   : > { %s650_s11 = sshll.u32 %s1084_s19, 4  ;;  %661 = vmatprep.subr.bf16.mxu0 %v660_v20  ;;  %v454_v47 = vld [vmem:[%s1080_s3 + $0xd0] sm:$0xff]  ;;  %v676_v48 = vpack.c.bf16 %v455_v44, %v453_v43  ;;  %v457_v49 = vld [vmem:[%s1080_s3 + $0xe8] sm:$0xff]  ;;  %v459_v50 = vld [vmem:[%s1080_s3 + $0xf8] sm:$0xff]  ;;  %v252_v44 = vlaneseq  ;;  %s651_s6 = sshll.u32 %s1084_s19, 3 }
   0xf   : > { %s219_s20 = scalar_lea.vmem %s1077_s0, %s650_s11  ;;  %v678_v51 = vpack.c.bf16 %v454_v47, %v452_v46  ;;  %v456_v52 = vld [vmem:[%s1080_s3 + $0xe0] sm:$0xff]  ;;  %v458_v53 = vld [vmem:[%s1080_s3 + $0xf0] sm:$0xff]  ;;  %v680_v54 = vpack.c.bf16 %v459_v50, %v457_v49  ;;  %v461_v55 = vld [vmem:[%s1080_s3 + $0x108] sm:$0xff]  ;;  %s224_s9 = scalar_lea.vmem %s1082_s5, %s651_s6 }
  0x10   : > { %v812_v14 = vld [vmem:[%s219_s20 + $0x8] sm:$0xff]  ;;  %v825_v19 = vld [vmem:[%s219_s20] sm:$0xff]  ;;  %v463_v56 = vld [vmem:[%s1080_s3 + $0x118] sm:$0xff]  ;;  %v682_v57 = vpack.c.bf16 %v458_v53, %v456_v52 }
  0x11   : > { %v229_v17 = vrot.slane %v812_v14, 7  ;;  %v823_v18 = vcombine.high %v812_v14, %v812_v14  ;;  %v296_v26 = vcombine.high %v825_v19, %v825_v19  ;;  %663 = vmatpush1.bf16.msra.mxu0 %v662_v25  ;;  %v684_v58 = vpack.c.bf16 %v463_v56, %v461_v55  ;;  %v460_v59 = vld [vmem:[%s1080_s3 + $0x100] sm:$0xff]  ;;  %v462_v60 = vld [vmem:[%s1080_s3 + $0x110] sm:$0xff]  ;;  %v465_v61 = vld [vmem:[%s1080_s3 + $0x128] sm:$0xff] }
  0x12   : > { %665 = vmatprep.subr.bf16.mxu0 %v664_v30  ;;  %v467_v62 = vld [vmem:[%s1080_s3 + $0x138] sm:$0xff]  ;;  %v686_v63 = vpack.c.bf16 %v462_v60, %v460_v59  ;;  %v464_v1 = vld [vmem:[%s1080_s3 + $0x120] sm:$0xff]  ;;  %v466_v2 = vld [vmem:[%s1080_s3 + $0x130] sm:$0xff] }
  0x13   : > { %v834_v23 = vsel %vm233_vm0, 0.0, %v229_v17  ;;  %v230_v24 = vrot.slane %v823_v18, 7  ;;  %v688_v0 = vpack.c.bf16 %v467_v62, %v465_v61  ;;  %v469_v3 = vld [vmem:[%s1080_s3 + $0x148] sm:$0xff]  ;;  %v471_v4 = vld [vmem:[%s1080_s3 + $0x158] sm:$0xff]  ;;  %v690_v5 = vpack.c.bf16 %v466_v2, %v464_v1  ;;  %v468_v7 = vld [vmem:[%s1080_s3 + $0x140] sm:$0xff] }
  0x14   : > { %274 = vrot.lane.b32.xlu1 %v834_v23, %s736_s29  ;;  %243 = vrot.lane.b32.xlu0 %v834_v23, %s737_s30  ;;  %v692_v6 = vpack.c.bf16 %v471_v4, %v469_v3  ;;  %v470_v8 = vld [vmem:[%s1080_s3 + $0x150] sm:$0xff]  ;;  %v473_v9 = vld [vmem:[%s1080_s3 + $0x168] sm:$0xff] }
  0x15   : > { %v850_v29 = vsel %vm233_vm0, 0.0, %v230_v24  ;;  %667 = vmatpush1.bf16.msra.mxu0 %v666_v33  ;;  %v475_v10 = vld [vmem:[%s1080_s3 + $0x178] sm:$0xff]  ;;  %v694_v11 = vpack.c.bf16 %v470_v8, %v468_v7  ;;  %v472_v13 = vld [vmem:[%s1080_s3 + $0x160] sm:$0xff]  ;;  %v474_v15 = vld [vmem:[%s1080_s3 + $0x170] sm:$0xff] }
  0x16   : > { %669 = vmatprep.subr.bf16.mxu0 %v668_v36  ;;  %v696_v12 = vpack.c.bf16 %v475_v10, %v473_v9  ;;  %v477_v16 = vld [vmem:[%s1080_s3 + $0x188] sm:$0xff]  ;;  %v479_v17 = vld [vmem:[%s1080_s3 + $0x198] sm:$0xff]  ;;  %v476_v21 = vld [vmem:[%s1080_s3 + $0x180] sm:$0xff] }
  0x17   : > { %v700_v20 = vpack.c.bf16 %v479_v17, %v477_v16  ;;  %v478_v22 = vld [vmem:[%s1080_s3 + $0x190] sm:$0xff]  ;;  %v481_v24 = vld [vmem:[%s1080_s3 + $0x1a8] sm:$0xff]  ;;  %v483_v25 = vld [vmem:[%s1080_s3 + $0x1b8] sm:$0xff] }
  0x18   : > { %245 = vrot.lane.b32.xlu0 %v850_v29, %s737_s30  ;;  %299 = vrot.lane.b32.xlu1 %v296_v26, %s737_s30  ;;  %v704_v27 = vpack.c.bf16 %v483_v25, %v481_v24  ;;  %v480_v28 = vld [vmem:[%s1080_s3 + $0x1a0] sm:$0xff]  ;;  %v482_v30 = vld [vmem:[%s1080_s3 + $0x1b0] sm:$0xff] }
  0x19   : > { %671 = vmatpush1.bf16.msra.mxu0 %v670_v39  ;;  %v485_v31 = vld [vmem:[%s1080_s3 + $0x1c8] sm:$0xff]  ;;  %v487_v32 = vld [vmem:[%s1080_s3 + $0x1d8] sm:$0xff]  ;;  %v706_v33 = vpack.c.bf16 %v482_v30, %v480_v28  ;;  %v484_v35 = vld [vmem:[%s1080_s3 + $0x1c0] sm:$0xff] }
  0x1a   : > { %673 = vmatprep.subr.bf16.mxu0 %v672_v42  ;;  %v708_v34 = vpack.c.bf16 %v487_v32, %v485_v31  ;;  %v486_v36 = vld [vmem:[%s1080_s3 + $0x1d0] sm:$0xff]  ;;  %v489_v37 = vld [vmem:[%s1080_s3 + $0x1e8] sm:$0xff]  ;;  %v491_v38 = vld [vmem:[%s1080_s3 + $0x1f8] sm:$0xff] }
  0x1b   : > { %v710_v39 = vpack.c.bf16 %v486_v36, %v484_v35  ;;  %v712_v40 = vpack.c.bf16 %v491_v38, %v489_v37  ;;  %v488_v41 = vld [vmem:[%s1080_s3 + $0x1e0] sm:$0xff]  ;;  %v490_v42 = vld [vmem:[%s1080_s3 + $0x1f0] sm:$0xff]  ;;  %v237_v49 = vld [vmem:[%s1078_s1 + $0x8] sm:$0xff] }
  0x1c   : > { %297 = vrot.lane.b32.xlu0 %v825_v19, %s737_s30  ;;  %276 = vrot.lane.b32.xlu1 %v850_v29, %s736_s29  ;;  %v714_v43 = vpack.c.bf16 %v490_v42, %v488_v41 }
  0x1d   : > { %675 = vmatpush1.bf16.msra.mxu0 %v674_v45  ;;  %v1014_v45 = vshrl.u32 %v252_v44, 7 }
  0x1e   : > { %677 = vmatprep.subr.bf16.mxu0 %v676_v48  ;;  %v236_v48 = vld [vmem:[%s1078_s1] sm:$0xff] }
  0x1f   : > { %v319_v46 = vsub.s32 4, %v1014_v45  ;;  %v1018_v47 = vsub.s32 1, %v1014_v45  ;;  %v1027_v50 = vsub.s32 0, %v1014_v45  ;;  %v377_v55 = vsub.s32 7, %v1014_v45 }
  0x20   : > { %337 = vrot.lane.b32.xlu0 %v296_v26, %s736_s29  ;;  %335 = vrot.lane.b32.xlu1 %v825_v19, %s736_s29  ;;  %v702_v26 = vpack.c.bf16 %v478_v22, %v476_v21  ;;  %v307_v1 = vsub.s32 3, %v1014_v45 }
  0x21   : > { %679 = vmatpush1.bf16.msra.mxu0 %v678_v51  ;;  %v320_v51 = vrot.slane %v236_v48, %v319_v46  ;;  %v324_v52 = vrot.slane %v237_v49, %v319_v46  ;;  %v265_v56 = vrot.slane %v236_v48, %v1018_v47  ;;  %v255_v59 = vrot.slane %v236_v48, %v1027_v50 }
  0x22   : > { %681 = vmatprep.subr.bf16.mxu0 %v680_v54  ;;  %v259_v60 = vrot.slane %v237_v49, %v1027_v50  ;;  %v378_v2 = vrot.slane %v236_v48, %v377_v55  ;;  %v382_v3 = vrot.slane %v237_v49, %v377_v55 }
  0x23   : > { %v327_v62 = vcombine.low %v320_v51, %v324_v52  ;;  %v270_v4 = vmul.f32 %v265_v56, %v834_v23 }
  0x24   : > { %355 = vrot.lane.b32.xlu0 %v812_v14, %s737_s30  ;;  %357 = vrot.lane.b32.xlu1 %v823_v18, %s737_s30  ;;  %v385_v23 = vcombine.low %v378_v2, %v382_v3 }
  0x25   : > { %683 = vmatpush1.bf16.msra.mxu0 %v682_v57  ;;  %v285_v57 = vsub.s32 2, %v1014_v45 }
  0x26   : > { %685 = vmatprep.subr.bf16.mxu0 %v684_v58  ;;  %v269_v58 = vrot.slane %v237_v49, %v1018_v47 }
  0x27   : > { %v290_v10 = vrot.slane %v237_v49, %v285_v57 }
  0x28   : > { %395 = vrot.lane.b32.xlu0 %v823_v18, %s736_s29  ;;  %393 = vrot.lane.b32.xlu1 %v812_v14, %s736_s29  ;;  %v698_v18 = vpack.c.bf16 %v474_v15, %v472_v13  ;;  %v271_v7 = vmul.f32 %v269_v58, %v850_v29  ;;  %v308_v13 = vrot.slane %v236_v48, %v307_v1 }
  0x29   : > { %687 = vmatpush1.bf16.msra.mxu0 %v686_v63  ;;  %v312_v15 = vrot.slane %v237_v49, %v307_v1 }
  0x2a   : > { %689 = vmatprep.subr.bf16.mxu0 %v688_v0 }
  0x2d   : > { %691 = vmatpush1.bf16.msra.mxu0 %v690_v5 }
  0x2e   : > { %693 = vmatprep.subr.bf16.mxu0 %v692_v6  ;;  %v286_v6 = vrot.slane %v236_v48, %v285_v57 }
  0x31   : > { %695 = vmatpush1.bf16.msra.mxu0 %v694_v11  ;;  %v329_v11 = vmul.f32 %v327_v62, %v825_v19 }
  0x32   : > { %697 = vmatprep.subr.bf16.mxu0 %v696_v12  ;;  %v345_v12 = vsub.s32 5, %v1014_v45 }
  0x34   : > { %v350_v28 = vrot.slane %v237_v49, %v345_v12  ;;  %v346_v30 = vrot.slane %v236_v48, %v345_v12 }
  0x35   : > { %699 = vmatpush1.bf16.msra.mxu0 %v698_v18  ;;  %v365_v18 = vsub.s32 6, %v1014_v45 }
  0x36   : > { %701 = vmatprep.subr.bf16.mxu0 %v700_v20 }
  0x37   : > { %v366_v42 = vrot.slane %v236_v48, %v365_v18  ;;  %v647_v48 = vld [vmem:[%s1078_s1 + $0x18] ss:$0 sm:$0xff] }
  0x39   : > { %703 = vmatpush1.bf16.msra.mxu0 %v702_v26 }
  0x3a   : > { %705 = vmatprep.subr.bf16.mxu0 %v704_v27  ;;  %v331_v27 = vcombine.high %v329_v11, %v329_v11 }
  0x3d   : > { %707 = vmatpush1.bf16.msra.mxu0 %v706_v33 }
  0x3e   : > { %709 = vmatprep.subr.bf16.mxu0 %v708_v34 }
  0x41   : > { %711 = vmatpush1.bf16.msra.mxu0 %v710_v39  ;;  %v387_v39 = vmul.f32 %v385_v23, %v812_v14  ;;  %v240_v14 = vld [vmem:[%s1079_s2] sm:$0x3] }
  0x42   : > { %713 = vmatprep.subr.bf16.mxu0 %v712_v40  ;;  %v417_v3 = vrot.slane %v240_v14, %v1027_v50 }
  0x43   : > { %v389_v56 = vcombine.high %v387_v39, %v387_v39 }
  0x45   : > { %715 = vmatpush1.bf16.msra.mxu0 %v714_v43  ;;  %v370_v43 = vrot.slane %v237_v49, %v365_v18  ;;  %v646_v49 = vld [vmem:[%s1078_s1 + $0x10] ss:$0 sm:$0xff] }
  0x86   : > { %v275_v53 = vpop.permute.xlu1 %274  ;;  %v244_v54 = vpop.permute.xlu0 %243 }
  0x87   : > { %v251_v61 = vsel %vm247_vm1, 0.0, %v244_v54 }
  0x88   : > { %v260_v8 = vmul.f32 %v255_v59, %v251_v61 }
  0x8a   : > { %v246_v63 = vpop.permute.xlu0 %245  ;;  %v300_v0 = vpop.permute.xlu1 %299  ;;  %v272_v24 = vadd.f32 %v270_v4, %v260_v8  ;;  %v421_v4 = vrot.slane %v240_v14, %v1018_v47 }
  0x8b   : > { %v248_v5 = vsel %vm247_vm1, %v244_v54, %v246_v63 }
  0x8c   : > { %v261_v9 = vmul.f32 %v259_v60, %v248_v5 }
  0x8e   : > { %v298_v16 = vpop.permute.xlu0 %297  ;;  %v277_v17 = vpop.permute.xlu1 %276  ;;  %v273_v25 = vadd.f32 %v271_v7, %v261_v9 }
  0x8f   : > { %v301_v20 = vsel %vm247_vm1, %v298_v16, %v300_v0  ;;  %v304_v21 = vsel %vm247_vm1, 0.0, %v298_v16  ;;  %v279_v29 = vsel %vm278_vm2, %v275_v53, %v277_v17  ;;  %v282_v22 = vsel %vm278_vm2, %v277_v17, 0.0  ;;  %v492_v16 = vld [vmem:[%s1081_s4] sm:$0x3] }
  0x90   : > { %v291_v19 = vmul.f32 %v286_v6, %v279_v29  ;;  %v292_v26 = vmul.f32 %v290_v10, %v282_v22  ;;  %v313_v31 = vmul.f32 %v308_v13, %v304_v21  ;;  %v314_v32 = vmul.f32 %v312_v15, %v301_v20 }
  0x91   : > { %v497_v17 = vrot.slane %v492_v16, %v1027_v50  ;;  %v501_v18 = vrot.slane %v492_v16, %v1018_v47 }
  0x92   : > { %v293_v33 = vadd.f32 %v291_v19, %v272_v24  ;;  %v294_v34 = vadd.f32 %v292_v26, %v273_v25  ;;  %v338_v35 = vpop.permute.xlu0 %337  ;;  %v336_v36 = vpop.permute.xlu1 %335 }
  0x93   : > { %v342_v37 = vsel %vm278_vm2, %v338_v35, 0.0  ;;  %v339_v38 = vsel %vm278_vm2, %v336_v36, %v338_v35 }
  0x94   : > { %v315_v40 = vadd.f32 %v313_v31, %v293_v33  ;;  %v316_v41 = vadd.f32 %v314_v32, %v294_v34  ;;  %v352_v45 = vmul.f32 %v350_v28, %v342_v37  ;;  %v351_v51 = vmul.f32 %v346_v30, %v339_v38 }
  0x96   : > { %v334_v44 = vadd.f32 %v331_v27, %v316_v41  ;;  %v333_v46 = vadd.f32 %v329_v11, %v315_v40  ;;  %v356_v52 = vpop.permute.xlu0 %355  ;;  %v358_v53 = vpop.permute.xlu1 %357 }
  0x97   : > { %v362_v54 = vsel %vm247_vm1, 0.0, %v356_v52  ;;  %v359_v55 = vsel %vm247_vm1, %v356_v52, %v358_v53 }
  0x98   : > { %v354_v57 = vadd.f32 %v352_v45, %v334_v44  ;;  %v353_v58 = vadd.f32 %v351_v51, %v333_v46  ;;  %v371_v59 = vmul.f32 %v366_v42, %v362_v54  ;;  %v372_v60 = vmul.f32 %v370_v43, %v359_v55 }
  0x9a   : > { %v373_v61 = vadd.f32 %v371_v59, %v353_v58  ;;  %v374_v62 = vadd.f32 %v372_v60, %v354_v57  ;;  %v396_v63 = vpop.permute.xlu0 %395  ;;  %v394_v0 = vpop.permute.xlu1 %393 }
  0x9b   : > { %v400_v1 = vsel %vm278_vm2, %v396_v63, 0.0  ;;  %v397_v2 = vsel %vm278_vm2, %v394_v0, %v396_v63 }
  0x9c   : > { %v410_v5 = vmul.f32 %v647_v48, %v400_v1  ;;  %v391_v6 = vadd.f32 %v387_v39, %v373_v61  ;;  %v409_v7 = vmul.f32 %v646_v49, %v397_v2  ;;  %v392_v8 = vadd.f32 %v389_v56, %v374_v62 }
  0x9e   : > { %v411_v9 = vadd.f32 %v409_v7, %v391_v6  ;;  %v412_v10 = vadd.f32 %v410_v5, %v392_v8 }
  0xa0   : > { %v425_v11 = vadd.f32 %v421_v4, %v412_v10  ;;  %v424_v12 = vadd.f32 %v417_v3, %v411_v9 }
  0xa2   : > { %v427_v13 = vmax.f32 %v425_v11, 0.0  ;;  %v426_v15 = vmax.f32 %v424_v12, 0.0 }
  0xa4   : > { %568 = vmatprep.mubr.f32.mxu0 %v427_v13 }
  0xa5   : > { %569 = vmatmul.mubr.f32.vlgmr.msra.gmra.mrb[0].mxu0 %v426_v15 }
 0x178   : > { %v570_v23 = vpop.f32.mrb[0].mxu0 }
 0x179   : > { %v571_v20 = vadd.f32 %v570_v23, %v497_v17  ;;  %v572_v21 = vpop.f32.mrb[1].mxu0 }
 0x17a   : > { %v573_v29 = vadd.f32 %v572_v21, %v501_v18 }
 0x17b   : > { %v575_v22 = vmax.f32 %v571_v20, 0.0 }
 0x17c   : > { %v576_v24 = vmax.f32 %v573_v29, 0.0 }
 0x17e   : > { %v579_v25 = vcombine.low %v575_v22, %v576_v24 }
 0x180   : > { %581 = vst [vmem:[%s224_s9] sm:$0xff] %v579_v25 }
 0x181 PF: > { %s15_s18 = sadd.s32 1, %s734_s18  }
 0x182   : > { %p12_p4 = scmp.ge.s32.totalorder %s15_s18, 4  }
 0x184   :  { %14 = sbr.rel (!%p12_p4) target bundleno = 1 (0x1), region = 70 }

</bundles_post_ra>
